<compile_context>
chip_gen: v7x
topology: tpu7x:2x2x1
jax: 0.10.0
libtpu: 0.0.40
codegen_flags: <defaults>
</compile_context>

<pallas_src>
import jax
import jax.numpy as jnp
from jax import lax
from jax.experimental import pallas as pl
from jax.experimental.pallas import tpu as pltpu

# ----------------------------- configuration --------------------------------
BATCH      = 2
S          = 32            # base spatial size (original: 256)
D0         = 8             # depth            (original: 8)
N_CLASSES  = 5
N_NODES    = 5
H4         = S // 16       # spatial size of features[3]
V_DIM      = H4 * H4       # Self_Attention value dim  (original: 16*16)
GCN_IN     = 4 * H4 * H4   # SemGraphConv in_features  (original: 16*16*4)
FC_IN      = D0 * S * S    # nn.Linear in_features     (original: 256*256*8)


def _device_kind():
    try:
        return jax.devices()[0].device_kind.lower()
    except Exception:
        return ""


def _pick_max_tn():
    k = _device_kind()
    if "v5" in k and ("lite" in k or "v5e" in k):     # v5e MXU N = 128
        return 128
    return 256


def _pick_vmem_limit():
    k = _device_kind()
    if "v7" in k:                                     # 64 MiB physical VMEM per TC
        return 40 * 1024 * 1024
    return 64 * 1024 * 1024


_TN_MAX         = _pick_max_tn()
_VMEM_LIMIT     = _pick_vmem_limit()
_PALLAS_CONV_OK = None            # capability / correctness probe result (set in __main__)


def _pallas_conv_usable():
    return _PALLAS_CONV_OK is not False


# ------------------- Pallas kernel: implicit-GEMM 3D conv --------------------
def conv3d_tap_pallas(x, w, dilation=(1, 1, 1)):
    """Same-padding, stride-1 Conv3d (no bias), NDHWC, implicit GEMM.

    Returns (y[N,D,H,W,Cout] bf16, ch_sum[Cout] f32, ch_sumsq[Cout] f32); the channel
    sums cover all N*D*H*W positions and feed fused BatchNorm statistics.
    """
    N, D, H, W, Cin = x.shape
    kd, kh, kw, _, Cout = w.shape
    dd, dh, dw = dilation
    pd, ph, pw = dd * (kd - 1) // 2, dh * (kh - 1) // 2, dw * (kw - 1) // 2

    x = x.astype(jnp.bfloat16)
    xp = jnp.pad(x, ((0, 0), (pd, pd), (ph, ph), (pw, pw), (0, 0)))
    # fold the kw width taps into the K (channel) axis -> aligned, lane-major loads
    xw = jnp.concatenate([xp[:, :, :, i * dw:i * dw + W, :] for i in range(kw)], axis=-1)
    K = kw * Cin
    ntaps = kd * kh
    w9 = w.astype(jnp.bfloat16).reshape(ntaps, K, Cout)     # tap-major weights

    tn = Cout
    if Cout > _TN_MAX and Cout % _TN_MAX == 0:
        tn = _TN_MAX
    ct = Cout // tn

    offs = [((t // kh) * dd, (t % kh) * dh) for t in range(ntaps)]

    if ct == 1:
        grid = (H, D, N)                 # leading H: large parallel axis for megacore
        def tap_map(od, oh):
            return lambda h, d, n, od=od, oh=oh: (n, d + od, h + oh, 0, 0)
        w_map = lambda h, d, n: (0, 0, 0)
        o_map = lambda h, d, n: (n, d, h, 0, 0)
    else:
        grid = (ct, H, D, N)             # c-tile outermost: weights fetched once per tile
        def tap_map(od, oh):
            return lambda c, h, d, n, od=od, oh=oh: (n, d + od, h + oh, 0, 0)
        w_map = lambda c, h, d, n: (0, 0, c)
        o_map = lambda c, h, d, n: (n, d, h, 0, c)

    in_specs = [pl.BlockSpec((None, None, None, W, K), tap_map(od, oh)) for od, oh in offs]
    in_specs.append(pl.BlockSpec((ntaps, K, tn), w_map))
    out_specs = [pl.BlockSpec((None, None, None, W, tn), o_map),
                 pl.BlockSpec((None, None, None, 2, tn), o_map)]

    def kernel(*refs):
        xs, w_ref = refs[:ntaps], refs[ntaps]
        o_ref, p_ref = refs[ntaps + 1], refs[ntaps + 2]
        # register-held f32 accumulation over the 9 statically-unrolled taps
        acc = jnp.dot(xs[0][...], w_ref[0], preferred_element_type=jnp.float32)
        for t in range(1, ntaps):
            acc = acc + jnp.dot(xs[t][...], w_ref[t], preferred_element_type=jnp.float32)
        o_ref[...] = acc.astype(o_ref.dtype)
        # f32 partial (sum, sum^2) for fused BatchNorm statistics
        p_ref[...] = jnp.concatenate(
            [jnp.sum(acc, axis=0, keepdims=True),
             jnp.sum(acc * acc, axis=0, keepdims=True)], axis=0)

    flops = 2 * N * D * H * W * K * Cout * ntaps
    bytes_accessed = (ntaps * N * D * H * W * K * 2      # tap reads (bf16)
                      + ntaps * K * Cout * 2             # weights   (bf16)
                      + N * D * H * W * Cout * 2         # output    (bf16)
                      + N * D * H * 2 * Cout * 4)        # stat partials (f32)

    y, parts = pl.pallas_call(
        kernel,
        out_shape=(jax.ShapeDtypeStruct((N, D, H, W, Cout), jnp.bfloat16),
                   jax.ShapeDtypeStruct((N, D, H, 2, Cout), jnp.float32)),
        grid_spec=pltpu.PrefetchScalarGridSpec(
            num_scalar_prefetch=0, grid=grid,
            in_specs=in_specs, out_specs=out_specs),
        compiler_params=pltpu.CompilerParams(
            dimension_semantics=("parallel",) * len(grid),
            vmem_limit_bytes=_VMEM_LIMIT),
        cost_estimate=pl.CostEstimate(flops=int(flops), transcendentals=0,
                                      bytes_accessed=int(bytes_accessed)),
    )(*([xw] * ntaps), w9)

    ch_sum = jnp.sum(parts[:, :, :, 0, :], axis=(0, 1, 2))
    ch_sumsq = jnp.sum(parts[:, :, :, 1, :], axis=(0, 1, 2))
    return y, ch_sum, ch_sumsq


# ------------------ Pallas kernel: fused BN affine + ReLU --------------------
def _affine_relu_kernel(x_ref, s_ref, t_ref, o_ref):
    xv = x_ref[...].astype(jnp.float32)                      # math in f32 (v5e-safe)
    o_ref[...] = jnp.maximum(xv * s_ref[...] + t_ref[...], 0.0).astype(o_ref.dtype)


def affine_relu_pallas(y, scale, shift):
    """relu(y * scale + shift) per channel, channels-last, bf16 out (lane-dense stores)."""
    shp = y.shape
    C = shp[-1]
    y2 = y.reshape(-1, C)
    M = y2.shape[0]

    # lane-dense folding: view (M, C<128) as (M/f, 128) so stores are unmasked
    f = 1
    if C < 128 and 128 % C == 0:
        cand = 128 // C
        while cand > 1 and (M % cand != 0 or (M // cand) % 8 != 0):
            cand //= 2
        f = cand
    Mf, Cf = M // f, C * f

    if Mf % 8 != 0:      # tiny / odd shapes: plain XLA
        out = jnp.maximum(y2.astype(jnp.float32) * scale + shift, 0.0)
        return out.astype(jnp.bfloat16).reshape(shp)

    y2 = y2.reshape(Mf, Cf)
    s2 = jnp.tile(scale.astype(jnp.float32).reshape(1, C), (1, f))
    t2 = jnp.tile(shift.astype(jnp.float32).reshape(1, C), (1, f))

    tm = Mf
    for cand in (1024, 512, 256, 128, 64, 32, 16, 8):
        if Mf % cand == 0:
            tm = cand
            break

    out = pl.pallas_call(
        _affine_relu_kernel,
        out_shape=jax.ShapeDtypeStruct((Mf, Cf), jnp.bfloat16),
        grid_spec=pltpu.PrefetchScalarGridSpec(
            num_scalar_prefetch=0, grid=(Mf // tm,),
            in_specs=[pl.BlockSpec((tm, Cf), lambda i: (i, 0)),
                      pl.BlockSpec((1, Cf), lambda i: (0, 0)),
                      pl.BlockSpec((1, Cf), lambda i: (0, 0))],
            out_specs=pl.BlockSpec((tm, Cf), lambda i: (i, 0))),
        compiler_params=pltpu.CompilerParams(dimension_semantics=("parallel",)),
        cost_estimate=pl.CostEstimate(flops=int(2 * Mf * Cf), transcendentals=0,
                                      bytes_accessed=int(4 * Mf * Cf + 8 * Cf)),
    )(y2.astype(jnp.bfloat16), s2, t2)
    return out.reshape(shp)


# ------------------------ Pallas kernel: matmul + bias -----------------------
def _mm_bias_kernel(a_ref, b_ref, bias_ref, o_ref):
    acc = jnp.dot(a_ref[...], b_ref[...], preferred_element_type=jnp.float32)
    o_ref[...] = (acc + bias_ref[...]).astype(o_ref.dtype)


def matmul_bias_pallas(a, b, bias, tm=256, out_dtype=jnp.bfloat16):
    """out = a @ b + bias.  a:(M,K), b:(K,N), bias:(N,).  M % tm == 0, N <= 256."""
    M, K = a.shape
    _, Nn = b.shape
    a = a.astype(jnp.bfloat16)
    b = b.astype(jnp.bfloat16)
    bias2 = bias.astype(jnp.float32).reshape(1, Nn)
    return pl.pallas_call(
        _mm_bias_kernel,
        out_shape=jax.ShapeDtypeStruct((M, Nn), out_dtype),
        grid_spec=pltpu.PrefetchScalarGridSpec(
            num_scalar_prefetch=0, grid=(M // tm,),
            in_specs=[pl.BlockSpec((tm, K), lambda i: (i, 0)),
                      pl.BlockSpec((K, Nn), lambda i: (0, 0)),
                      pl.BlockSpec((1, Nn), lambda i: (0, 0))],
            out_specs=pl.BlockSpec((tm, Nn), lambda i: (i, 0))),
        compiler_params=pltpu.CompilerParams(dimension_semantics=("parallel",),
                                             vmem_limit_bytes=_VMEM_LIMIT),
        cost_estimate=pl.CostEstimate(
            flops=int(2 * M * K * Nn), transcendentals=0,
            bytes_accessed=int(2 * M * K + 2 * K * Nn + 2 * M * Nn + 4 * Nn)),
    )(a, b, bias2)


# ------------------------------ conv helpers ---------------------------------
def conv_pointwise(x, w2, b, out_dtype=jnp.bfloat16):
    """1x1x1 conv == matmul over the channel axis (channels-last).  Consistent bf16 out."""
    shp = x.shape
    Cin = shp[-1]
    Cout = w2.shape[-1]
    x2 = x.reshape(-1, Cin)
    M = x2.shape[0]
    if M % 256 == 0 and M >= 512 and 64 <= Cout <= 256:
        out = matmul_bias_pallas(x2, w2, b, out_dtype=out_dtype)
    else:
        # tiny M or tiny Cout (3/5/20-wide heads): MXU tiles would be mostly masked
        out = (jnp.dot(x2.astype(jnp.bfloat16), w2.astype(jnp.bfloat16),
                       preferred_element_type=jnp.float32)
               + b.astype(jnp.float32)).astype(out_dtype)
    return out.reshape(shp[:-1] + (Cout,))


def _conv3d_xla(x, w, dilation):
    """XLA same-padding Conv3d, bf16 operands, f32 accumulation (fallback / reference)."""
    kd, kh, kw = w.shape[:3]
    dd, dh, dw = dilation
    pad = ((dd * (kd - 1) // 2,) * 2, (dh * (kh - 1) // 2,) * 2, (dw * (kw - 1) // 2,) * 2)
    return lax.conv_general_dilated(
        x.astype(jnp.bfloat16), w.astype(jnp.bfloat16),
        window_strides=(1, 1, 1), padding=pad, rhs_dilation=dilation,
        dimension_numbers=('NDHWC', 'DHWIO', 'NDHWC'),
        preferred_element_type=jnp.float32)


def conv_bn_relu(p, x, dilation=(1, 1, 1), eps=1e-5):
    """Conv3d(k=3, same) + BatchNorm3d (train-mode batch stats) + ReLU, NDHWC -> bf16.

    The conv bias is omitted: with train-mode batch statistics BatchNorm exactly cancels
    any per-channel constant shift, so this equals PyTorch conv(bias)->BN->ReLU.
    """
    N, D, H, W, _ = x.shape
    gamma, beta = p["gamma"], p["beta"]
    if _pallas_conv_usable() and W >= 8:
        y, ch_sum, ch_sumsq = conv3d_tap_pallas(x, p["w"], dilation)
        cnt = float(N * D * H * W)
        mean = ch_sum / cnt
        var = jnp.maximum(ch_sumsq / cnt - mean * mean, 0.0)
        scale = gamma / jnp.sqrt(var + eps)
        shift = beta - mean * scale
        return affine_relu_pallas(y, scale, shift)
    # tiny-spatial layers (negligible FLOP share): XLA conv fallback, f32 statistics
    y = _conv3d_xla(x, p["w"], dilation)
    mean = jnp.mean(y, axis=(0, 1, 2, 3))
    var = jnp.maximum(jnp.mean(y * y, axis=(0, 1, 2, 3)) - mean * mean, 0.0)
    yn = (y - mean) * (gamma / jnp.sqrt(var + eps)) + beta
    return jnp.maximum(yn, 0.0).astype(jnp.bfloat16)


# ------------------------------- module pieces --------------------------------
def avg_pool(x, k):
    N, D, H, W, C = x.shape
    kd, kh, kw = k
    x = x.reshape(N, D // kd, kd, H // kh, kh, W // kw, kw, C).astype(jnp.float32)
    return jnp.mean(x, axis=(2, 4, 6)).astype(jnp.bfloat16)


def double_conv(p, x1, x2=None):
    """DoubleConv_1.forward; conv1 & conv2 (identical config) fused along Cout (lane-dense)."""
    if x2 is not None:
        x = jnp.concatenate([x2, x1.astype(x2.dtype)], axis=-1)   # cat([x2, x1], dim=1)
    else:
        x = x1
    y12 = conv_bn_relu(p["c12"], x)                               # conv1 ++ conv2 (2*Cout wide)
    y3 = conv_bn_relu(p["c3"], x, dilation=(2, 2, 2))
    y = jnp.concatenate([y12, y3], axis=-1)                       # == cat([y1, y2, y3], dim=1)
    return conv_pointwise(y, p["c4_w"], p["c4_b"])


def _interp_matrix(n_in, n_out):
    if n_out == n_in:
        return jnp.eye(n_in, dtype=jnp.float32)
    if n_in == 1:
        return jnp.ones((n_out, 1), jnp.float32)
    pos = jnp.arange(n_out, dtype=jnp.float32) * (n_in - 1) / (n_out - 1)
    i0 = jnp.floor(pos).astype(jnp.int32)
    i1 = jnp.minimum(i0 + 1, n_in - 1)
    frac = pos - i0.astype(jnp.float32)
    rows = jnp.arange(n_out)
    m = jnp.zeros((n_out, n_in), jnp.float32)
    m = m.at[rows, i0].add(1.0 - frac)
    m = m.at[rows, i1].add(frac)
    return m


def upsample_trilinear(x, scale):
    """nn.Upsample(mode='trilinear', align_corners=True) as three small dense matmuls
    (bf16 operands, f32 accumulation)."""
    N, D, H, W, C = x.shape
    sd, sh, sw = scale
    x = x.astype(jnp.bfloat16)
    if sd != 1:
        m = _interp_matrix(D, D * sd).astype(jnp.bfloat16)
        x = jnp.einsum("pd,ndhwc->nphwc", m, x,
                       preferred_element_type=jnp.float32).astype(jnp.bfloat16)
    if sh != 1:
        m = _interp_matrix(H, H * sh).astype(jnp.bfloat16)
        x = jnp.einsum("qh,ndhwc->ndqwc", m, x,
                       preferred_element_type=jnp.float32).astype(jnp.bfloat16)
    if sw != 1:
        m = _interp_matrix(W, W * sw).astype(jnp.bfloat16)
        x = jnp.einsum("rw,ndhwc->ndhrc", m, x,
                       preferred_element_type=jnp.float32).astype(jnp.bfloat16)
    return x


def backbone(p, x):
    # TODO(synk): stand-in feature pyramid for the external pretrained torchvision
    # r2plus1d_18 (not defined in the provided source); same channel counts / strides
    # (64,128,256,512; D 8->8->4->2->1, HW /2 per stage) via stride-1 convs + avg-pool.
    h = conv_bn_relu(p["stem"], x)            # 3 -> 64   @ (8, S, S)
    h = avg_pool(h, (1, 2, 2))
    f0 = conv_bn_relu(p["l1"], h)             # 64 -> 64  @ (8, S/2, S/2)
    h = conv_bn_relu(p["l2"], f0)             # 64 -> 128
    f1 = avg_pool(h, (2, 2, 2))               # (4, S/4, S/4)
    h = conv_bn_relu(p["l3"], f1)             # 128 -> 256
    f2 = avg_pool(h, (2, 2, 2))               # (2, S/8, S/8)
    h = conv_bn_relu(p["l4"], f2)             # 256 -> 512
    f3 = avg_pool(h, (2, 2, 2))               # (1, S/16, S/16)
    return [f0, f1, f2, f3]


def map_to_node(p, f2d):
    # TODO(synk): MapToNode(512, 5) is not in the provided source; stand-in:
    # 1x1 conv 512 -> 5*4 channels, then view(N, 5, -1) in the original NCHW layout.
    N, H, W, C = f2d.shape
    y = jnp.dot(f2d.reshape(-1, C).astype(jnp.float32), p["mtn_w"]) + p["mtn_b"]
    y = y.reshape(N, H, W, N_NODES * 4).transpose(0, 3, 1, 2)      # (N, 20, H, W)
    return y.reshape(N, N_NODES, -1)                               # (N, 5, 4*H*W)


def sem_graph_conv(p, x, adj):
    # TODO(synk): SemGraphConv not in the provided source; SemGCN-style stand-in.
    N, J, Fin = x.shape
    xf = x.reshape(N * J, Fin)
    h0 = jnp.dot(xf, p["gcn_W0"]).reshape(N, J, -1)
    h1 = jnp.dot(xf, p["gcn_W1"]).reshape(N, J, -1)
    e = jnp.where(adj > 0, p["gcn_E"], -9e15)
    adj_n = jax.nn.softmax(e, axis=-1)
    eye = jnp.eye(J, dtype=jnp.float32)
    out = (jnp.einsum("ij,njk->nik", adj_n * eye, h0)
           + jnp.einsum("ij,njk->nik", adj_n * (1.0 - eye), h1)
           + p["gcn_b"])
    return out, jnp.broadcast_to(adj_n, (N, J, J))


def self_attention(p, x):
    # TODO(synk): Self_Attention not in the provided source; stand-in returning
    # (softmax(QK^T), V) with V dim = H4*W4 as the downstream reshape requires.
    N, J, C = x.shape
    xf = x.reshape(N * J, C)
    q = jnp.dot(xf, p["sa_Wq"]).reshape(N, J, -1)
    k = jnp.dot(xf, p["sa_Wk"]).reshape(N, J, -1)
    v = jnp.dot(xf, p["sa_Wv"]).reshape(N, J, -1)
    attn = jax.nn.softmax(jnp.einsum("njd,nkd->njk", q, k), axis=-1)
    return attn, v


# --------------------------------- forward ------------------------------------
def forward(params, x):
    adj = params["adj"]
    N = x.shape[0]
    x = x.reshape(N, 3 * 8, D0, S, S)                      # x.view(N, 3*8, 8, 256, 256)
    x = jnp.transpose(x, (0, 2, 3, 4, 1))                  # NCDHW -> NDHWC (layout only)
    x = conv_pointwise(x, params["squeeze_w"], params["squeeze_b"])

    features = backbone(params, x)
    f3 = features[3]                                       # (N, 1, H4, W4, 512)
    _, _, H4_, W4_, _ = f3.shape
    f2d = f3[:, 0]                                         # squeeze(2)

    node = map_to_node(params, f2d)                        # (N, 5, GCN_IN)
    gcn_out, adj_n = sem_graph_conv(params, node, adj)     # (N,5,512), (N,5,5)
    sa_attn, v = self_attention(params, gcn_out)           # (N,5,5), (N,5,V_DIM)
    attn = 0.9 * sa_attn + 0.1 * adj_n
    out = jnp.einsum("nij,njd->nid", attn, v)              # bmm (tiny)

    # conv1: 1x1x1 conv over the 5-channel dim at V_DIM positions (tiny -> XLA)
    o = (jnp.dot(out.transpose(0, 2, 1).reshape(-1, N_NODES), params["conv1_w"])
         + params["conv1_b"])                              # (N*V_DIM, 256)
    x = o.reshape(N, 1, H4_, W4_, 256)                     # == (N,256,1,H4,W4) channels-last

    x = upsample_trilinear(x, (2, 2, 2))
    x = double_conv(params["dc1"], x, features[2])
    x = upsample_trilinear(x, (2, 2, 2))
    x = double_conv(params["dc2"], x, features[1])
    x = upsample_trilinear(x, (2, 2, 2))
    x = double_conv(params["dc3"], x, features[0])
    x = upsample_trilinear(x, (1, 2, 2))
    x = double_conv(params["dc4"], x, None)
    x = conv_pointwise(x, params["final_w"], params["final_b"])   # (N, 8, S, S, 5)

    x = jnp.transpose(x, (0, 4, 1, 2, 3)).reshape(N, N_CLASSES, FC_IN)   # view(N, 5, -1)
    y = (jnp.dot(x.reshape(N * N_CLASSES, FC_IN).astype(jnp.float32), params["fc_w"])
         + params["fc_b"]).reshape(N, N_CLASSES, 3)
    return jax.nn.sigmoid(y)


# ------------------------------- parameter init --------------------------------
def init_params(key):
    counter = [0]

    def nrm(shape, s=0.05):
        counter[0] += 1
        k = jax.random.fold_in(key, counter[0])
        return s * jax.random.normal(k, shape, jnp.float32)

    def conv_bn(cin, cout):
        # conv bias omitted: exactly absorbed by the train-mode BatchNorm that follows
        return dict(w=nrm((3, 3, 3, cin, cout)),
                    gamma=jnp.ones((cout,), jnp.float32),
                    beta=jnp.zeros((cout,), jnp.float32))

    def dc(cin, cout):
        # conv1 and conv2 share input & config -> fused into one 2*cout-wide conv (c12)
        return dict(c12=conv_bn(cin, 2 * cout), c3=conv_bn(cin, cout),
                    c4_w=nrm((3 * cout, cout)), c4_b=jnp.zeros((cout,), jnp.float32))

    adj = jnp.eye(N_NODES, dtype=jnp.float32)
    idx = jnp.arange(N_NODES - 1)
    adj = adj.at[idx, idx + 1].set(1.0).at[idx + 1, idx].set(1.0)

    return dict(
        adj=adj,
        squeeze_w=nrm((3 * 8, 3)), squeeze_b=jnp.zeros((3,), jnp.float32),
        stem=conv_bn(3, 64), l1=conv_bn(64, 64), l2=conv_bn(64, 128),
        l3=conv_bn(128, 256), l4=conv_bn(256, 512),
        mtn_w=nrm((512, N_NODES * 4)), mtn_b=jnp.zeros((N_NODES * 4,), jnp.float32),
        gcn_W0=nrm((GCN_IN, 512)), gcn_W1=nrm((GCN_IN, 512)),
        gcn_E=nrm((N_NODES, N_NODES), 1.0), gcn_b=jnp.zeros((512,), jnp.float32),
        sa_Wq=nrm((512, 64)), sa_Wk=nrm((512, 64)), sa_Wv=nrm((512, V_DIM)),
        conv1_w=nrm((N_NODES, 256)), conv1_b=jnp.zeros((256,), jnp.float32),
        dc1=dc(512, 128), dc2=dc(256, 64), dc3=dc(128, 64), dc4=dc(64, 64),
        final_w=nrm((64, N_CLASSES)), final_b=jnp.zeros((N_CLASSES,), jnp.float32),
        fc_w=nrm((FC_IN, 3), 0.01), fc_b=jnp.zeros((3,), jnp.float32),
    )


# ----------------------------- capability probe --------------------------------
def _probe_pallas_conv():
    """Compile + numerically check the implicit-GEMM conv kernel on the shape classes
    used by the network; on any failure every 3x3x3 conv falls back to XLA."""
    global _PALLAS_CONV_OK
    try:
        ok = True
        key = jax.random.PRNGKey(1)
        cfgs = [(3, 64, (2, 4, 8), (1, 1, 1)),     # tiny-K stem class, W=8, narrow Cout
                (8, 64, (2, 8, 16), (2, 2, 2))]    # dilation-2 branch
        for i, (cin, cout, dhw, dil) in enumerate(cfgs):
            d, h, w_ = dhw
            kx = jax.random.fold_in(key, 2 * i)
            kw_ = jax.random.fold_in(key, 2 * i + 1)
            xt = jax.random.normal(kx, (1, d, h, w_, cin), jnp.float32)
            wt = 0.1 * jax.random.normal(kw_, (3, 3, 3, cin, cout), jnp.float32)
            y, s1, s2 = conv3d_tap_pallas(xt, wt, dil)
            y = jax.block_until_ready(y).astype(jnp.float32)
            ref = _conv3d_xla(xt, wt, dil)
            ok = ok and bool(jnp.allclose(y, ref, rtol=5e-2, atol=5e-2))
            ok = ok and bool(jnp.all(jnp.isfinite(s1))) and bool(jnp.all(jnp.isfinite(s2)))
        _PALLAS_CONV_OK = bool(ok)
    except Exception:
        _PALLAS_CONV_OK = False
    return _PALLAS_CONV_OK


# ----------------------------------- main --------------------------------------
if __name__ == "__main__":
    _probe_pallas_conv()

    key = jax.random.PRNGKey(0)
    params = init_params(key)
    x = jax.random.normal(jax.random.fold_in(key, 9999),
                          (BATCH, 3 * 8, D0, S, S), jnp.float32)

    fwd = jax.jit(forward)
    out = jax.block_until_ready(fwd(params, x))

    assert out.shape == (BATCH, N_CLASSES, 3), out.shape
    assert bool(jnp.all(jnp.isfinite(out)))
    print("KERNEL_OK")
</pallas_src>

<mosaic_0001>
module attributes {stable_mosaic.version = 11 : i64} {
  func.func @kernel(%arg0: i32, %arg1: i32, %arg2: i32, %arg3: memref<1x1x1x8x9xbf16, #tpu.memory_space<vmem>>, %arg4: memref<1x1x1x8x9xbf16, #tpu.memory_space<vmem>>, %arg5: memref<1x1x1x8x9xbf16, #tpu.memory_space<vmem>>, %arg6: memref<1x1x1x8x9xbf16, #tpu.memory_space<vmem>>, %arg7: memref<1x1x1x8x9xbf16, #tpu.memory_space<vmem>>, %arg8: memref<1x1x1x8x9xbf16, #tpu.memory_space<vmem>>, %arg9: memref<1x1x1x8x9xbf16, #tpu.memory_space<vmem>>, %arg10: memref<1x1x1x8x9xbf16, #tpu.memory_space<vmem>>, %arg11: memref<1x1x1x8x9xbf16, #tpu.memory_space<vmem>>, %arg12: memref<9x9x64xbf16, #tpu.memory_space<vmem>>, %arg13: memref<1x1x1x8x64xbf16, #tpu.memory_space<vmem>>, %arg14: memref<1x1x1x2x64xf32, #tpu.memory_space<vmem>>) attributes {dimension_semantics = [#tpu.dimension_semantics<parallel>, #tpu.dimension_semantics<parallel>, #tpu.dimension_semantics<parallel>], iteration_bounds = array<i64: 4, 2, 1>, scalar_prefetch = 0 : i64, scratch_operands = 0 : i64, tpu.core_type = #tpu.core_type<tc>, window_params = [{transform_indices = @transform_0, window_bounds = array<i64: 1, 1, 1, 8, 9>}, {transform_indices = @transform_1, window_bounds = array<i64: 1, 1, 1, 8, 9>}, {transform_indices = @transform_2, window_bounds = array<i64: 1, 1, 1, 8, 9>}, {transform_indices = @transform_3, window_bounds = array<i64: 1, 1, 1, 8, 9>}, {transform_indices = @transform_4, window_bounds = array<i64: 1, 1, 1, 8, 9>}, {transform_indices = @transform_5, window_bounds = array<i64: 1, 1, 1, 8, 9>}, {transform_indices = @transform_6, window_bounds = array<i64: 1, 1, 1, 8, 9>}, {transform_indices = @transform_7, window_bounds = array<i64: 1, 1, 1, 8, 9>}, {transform_indices = @transform_8, window_bounds = array<i64: 1, 1, 1, 8, 9>}, {pipeline_mode = #tpu.pipeline_mode<synchronous>, transform_indices = @transform_9, window_bounds = array<i64: 9, 9, 64>}, {transform_indices = @transform_10, window_bounds = array<i64: 1, 1, 1, 8, 64>}, {transform_indices = @transform_11, window_bounds = array<i64: 1, 1, 1, 2, 64>}]} {
    %c0 = arith.constant 0 : index
    %c0_0 = arith.constant 0 : index
    %c0_1 = arith.constant 0 : index
    %c0_2 = arith.constant 0 : index
    %c0_3 = arith.constant 0 : index
    %0 = vector.load %arg3[%c0, %c0_0, %c0_1, %c0_2, %c0_3] : memref<1x1x1x8x9xbf16, #tpu.memory_space<vmem>>, vector<1x1x1x8x9xbf16>
    %1 = vector.shape_cast %0 : vector<1x1x1x8x9xbf16> to vector<8x9xbf16>
    %c0_4 = arith.constant 0 : index
    %c0_5 = arith.constant 0 : index
    %c0_6 = arith.constant 0 : index
    %2 = vector.load %arg12[%c0_4, %c0_5, %c0_6] : memref<9x9x64xbf16, #tpu.memory_space<vmem>>, vector<1x9x64xbf16>
    %3 = vector.shape_cast %2 : vector<1x9x64xbf16> to vector<9x64xbf16>
    %cst = arith.constant dense<0.000000e+00> : vector<8x64xf32>
    %4 = tpu.matmul %1, %3, %cst {dimension_numbers = #tpu.dot_dimension_numbers<[1], [0], [0], [1], [0, 0, 1, 1], [], []>} : vector<8x9xbf16>, vector<9x64xbf16>, vector<8x64xf32> -> vector<8x64xf32>
    %c0_7 = arith.constant 0 : index
    %c0_8 = arith.constant 0 : index
    %c0_9 = arith.constant 0 : index
    %c0_10 = arith.constant 0 : index
    %c0_11 = arith.constant 0 : index
    %5 = vector.load %arg4[%c0_7, %c0_8, %c0_9, %c0_10, %c0_11] : memref<1x1x1x8x9xbf16, #tpu.memory_space<vmem>>, vector<1x1x1x8x9xbf16>
    %6 = vector.shape_cast %5 : vector<1x1x1x8x9xbf16> to vector<8x9xbf16>
    %c1 = arith.constant 1 : index
    %c0_12 = arith.constant 0 : index
    %c0_13 = arith.constant 0 : index
    %7 = vector.load %arg12[%c1, %c0_12, %c0_13] : memref<9x9x64xbf16, #tpu.memory_space<vmem>>, vector<1x9x64xbf16>
    %8 = vector.shape_cast %7 : vector<1x9x64xbf16> to vector<9x64xbf16>
    %cst_14 = arith.constant dense<0.000000e+00> : vector<8x64xf32>
    %9 = tpu.matmul %6, %8, %cst_14 {dimension_numbers = #tpu.dot_dimension_numbers<[1], [0], [0], [1], [0, 0, 1, 1], [], []>} : vector<8x9xbf16>, vector<9x64xbf16>, vector<8x64xf32> -> vector<8x64xf32>
    %10 = arith.addf %4, %9 : vector<8x64xf32>
    %c0_15 = arith.constant 0 : index
    %c0_16 = arith.constant 0 : index
    %c0_17 = arith.constant 0 : index
    %c0_18 = arith.constant 0 : index
    %c0_19 = arith.constant 0 : index
    %11 = vector.load %arg5[%c0_15, %c0_16, %c0_17, %c0_18, %c0_19] : memref<1x1x1x8x9xbf16, #tpu.memory_space<vmem>>, vector<1x1x1x8x9xbf16>
    %12 = vector.shape_cast %11 : vector<1x1x1x8x9xbf16> to vector<8x9xbf16>
    %c2 = arith.constant 2 : index
    %c0_20 = arith.constant 0 : index
    %c0_21 = arith.constant 0 : index
    %13 = vector.load %arg12[%c2, %c0_20, %c0_21] : memref<9x9x64xbf16, #tpu.memory_space<vmem>>, vector<1x9x64xbf16>
    %14 = vector.shape_cast %13 : vector<1x9x64xbf16> to vector<9x64xbf16>
    %cst_22 = arith.constant dense<0.000000e+00> : vector<8x64xf32>
    %15 = tpu.matmul %12, %14, %cst_22 {dimension_numbers = #tpu.dot_dimension_numbers<[1], [0], [0], [1], [0, 0, 1, 1], [], []>} : vector<8x9xbf16>, vector<9x64xbf16>, vector<8x64xf32> -> vector<8x64xf32>
    %16 = arith.addf %10, %15 : vector<8x64xf32>
    %c0_23 = arith.constant 0 : index
    %c0_24 = arith.constant 0 : index
    %c0_25 = arith.constant 0 : index
    %c0_26 = arith.constant 0 : index
    %c0_27 = arith.constant 0 : index
    %17 = vector.load %arg6[%c0_23, %c0_24, %c0_25, %c0_26, %c0_27] : memref<1x1x1x8x9xbf16, #tpu.memory_space<vmem>>, vector<1x1x1x8x9xbf16>
    %18 = vector.shape_cast %17 : vector<1x1x1x8x9xbf16> to vector<8x9xbf16>
    %c3 = arith.constant 3 : index
    %c0_28 = arith.constant 0 : index
    %c0_29 = arith.constant 0 : index
    %19 = vector.load %arg12[%c3, %c0_28, %c0_29] : memref<9x9x64xbf16, #tpu.memory_space<vmem>>, vector<1x9x64xbf16>
    %20 = vector.shape_cast %19 : vector<1x9x64xbf16> to vector<9x64xbf16>
    %cst_30 = arith.constant dense<0.000000e+00> : vector<8x64xf32>
    %21 = tpu.matmul %18, %20, %cst_30 {dimension_numbers = #tpu.dot_dimension_numbers<[1], [0], [0], [1], [0, 0, 1, 1], [], []>} : vector<8x9xbf16>, vector<9x64xbf16>, vector<8x64xf32> -> vector<8x64xf32>
    %22 = arith.addf %16, %21 : vector<8x64xf32>
    %c0_31 = arith.constant 0 : index
    %c0_32 = arith.constant 0 : index
    %c0_33 = arith.constant 0 : index
    %c0_34 = arith.constant 0 : index
    %c0_35 = arith.constant 0 : index
    %23 = vector.load %arg7[%c0_31, %c0_32, %c0_33, %c0_34, %c0_35] : memref<1x1x1x8x9xbf16, #tpu.memory_space<vmem>>, vector<1x1x1x8x9xbf16>
    %24 = vector.shape_cast %23 : vector<1x1x1x8x9xbf16> to vector<8x9xbf16>
    %c4 = arith.constant 4 : index
    %c0_36 = arith.constant 0 : index
    %c0_37 = arith.constant 0 : index
    %25 = vector.load %arg12[%c4, %c0_36, %c0_37] : memref<9x9x64xbf16, #tpu.memory_space<vmem>>, vector<1x9x64xbf16>
    %26 = vector.shape_cast %25 : vector<1x9x64xbf16> to vector<9x64xbf16>
    %cst_38 = arith.constant dense<0.000000e+00> : vector<8x64xf32>
    %27 = tpu.matmul %24, %26, %cst_38 {dimension_numbers = #tpu.dot_dimension_numbers<[1], [0], [0], [1], [0, 0, 1, 1], [], []>} : vector<8x9xbf16>, vector<9x64xbf16>, vector<8x64xf32> -> vector<8x64xf32>
    %28 = arith.addf %22, %27 : vector<8x64xf32>
    %c0_39 = arith.constant 0 : index
    %c0_40 = arith.constant 0 : index
    %c0_41 = arith.constant 0 : index
    %c0_42 = arith.constant 0 : index
    %c0_43 = arith.constant 0 : index
    %29 = vector.load %arg8[%c0_39, %c0_40, %c0_41, %c0_42, %c0_43] : memref<1x1x1x8x9xbf16, #tpu.memory_space<vmem>>, vector<1x1x1x8x9xbf16>
    %30 = vector.shape_cast %29 : vector<1x1x1x8x9xbf16> to vector<8x9xbf16>
    %c5 = arith.constant 5 : index
    %c0_44 = arith.constant 0 : index
    %c0_45 = arith.constant 0 : index
    %31 = vector.load %arg12[%c5, %c0_44, %c0_45] : memref<9x9x64xbf16, #tpu.memory_space<vmem>>, vector<1x9x64xbf16>
    %32 = vector.shape_cast %31 : vector<1x9x64xbf16> to vector<9x64xbf16>
    %cst_46 = arith.constant dense<0.000000e+00> : vector<8x64xf32>
    %33 = tpu.matmul %30, %32, %cst_46 {dimension_numbers = #tpu.dot_dimension_numbers<[1], [0], [0], [1], [0, 0, 1, 1], [], []>} : vector<8x9xbf16>, vector<9x64xbf16>, vector<8x64xf32> -> vector<8x64xf32>
    %34 = arith.addf %28, %33 : vector<8x64xf32>
    %c0_47 = arith.constant 0 : index
    %c0_48 = arith.constant 0 : index
    %c0_49 = arith.constant 0 : index
    %c0_50 = arith.constant 0 : index
    %c0_51 = arith.constant 0 : index
    %35 = vector.load %arg9[%c0_47, %c0_48, %c0_49, %c0_50, %c0_51] : memref<1x1x1x8x9xbf16, #tpu.memory_space<vmem>>, vector<1x1x1x8x9xbf16>
    %36 = vector.shape_cast %35 : vector<1x1x1x8x9xbf16> to vector<8x9xbf16>
    %c6 = arith.constant 6 : index
    %c0_52 = arith.constant 0 : index
    %c0_53 = arith.constant 0 : index
    %37 = vector.load %arg12[%c6, %c0_52, %c0_53] : memref<9x9x64xbf16, #tpu.memory_space<vmem>>, vector<1x9x64xbf16>
    %38 = vector.shape_cast %37 : vector<1x9x64xbf16> to vector<9x64xbf16>
    %cst_54 = arith.constant dense<0.000000e+00> : vector<8x64xf32>
    %39 = tpu.matmul %36, %38, %cst_54 {dimension_numbers = #tpu.dot_dimension_numbers<[1], [0], [0], [1], [0, 0, 1, 1], [], []>} : vector<8x9xbf16>, vector<9x64xbf16>, vector<8x64xf32> -> vector<8x64xf32>
    %40 = arith.addf %34, %39 : vector<8x64xf32>
    %c0_55 = arith.constant 0 : index
    %c0_56 = arith.constant 0 : index
    %c0_57 = arith.constant 0 : index
    %c0_58 = arith.constant 0 : index
    %c0_59 = arith.constant 0 : index
    %41 = vector.load %arg10[%c0_55, %c0_56, %c0_57, %c0_58, %c0_59] : memref<1x1x1x8x9xbf16, #tpu.memory_space<vmem>>, vector<1x1x1x8x9xbf16>
    %42 = vector.shape_cast %41 : vector<1x1x1x8x9xbf16> to vector<8x9xbf16>
    %c7 = arith.constant 7 : index
    %c0_60 = arith.constant 0 : index
    %c0_61 = arith.constant 0 : index
    %43 = vector.load %arg12[%c7, %c0_60, %c0_61] : memref<9x9x64xbf16, #tpu.memory_space<vmem>>, vector<1x9x64xbf16>
    %44 = vector.shape_cast %43 : vector<1x9x64xbf16> to vector<9x64xbf16>
    %cst_62 = arith.constant dense<0.000000e+00> : vector<8x64xf32>
    %45 = tpu.matmul %42, %44, %cst_62 {dimension_numbers = #tpu.dot_dimension_numbers<[1], [0], [0], [1], [0, 0, 1, 1], [], []>} : vector<8x9xbf16>, vector<9x64xbf16>, vector<8x64xf32> -> vector<8x64xf32>
    %46 = arith.addf %40, %45 : vector<8x64xf32>
    %c0_63 = arith.constant 0 : index
    %c0_64 = arith.constant 0 : index
    %c0_65 = arith.constant 0 : index
    %c0_66 = arith.constant 0 : index
    %c0_67 = arith.constant 0 : index
    %47 = vector.load %arg11[%c0_63, %c0_64, %c0_65, %c0_66, %c0_67] : memref<1x1x1x8x9xbf16, #tpu.memory_space<vmem>>, vector<1x1x1x8x9xbf16>
    %48 = vector.shape_cast %47 : vector<1x1x1x8x9xbf16> to vector<8x9xbf16>
    %c8 = arith.constant 8 : index
    %c0_68 = arith.constant 0 : index
    %c0_69 = arith.constant 0 : index
    %49 = vector.load %arg12[%c8, %c0_68, %c0_69] : memref<9x9x64xbf16, #tpu.memory_space<vmem>>, vector<1x9x64xbf16>
    %50 = vector.shape_cast %49 : vector<1x9x64xbf16> to vector<9x64xbf16>
    %cst_70 = arith.constant dense<0.000000e+00> : vector<8x64xf32>
    %51 = tpu.matmul %48, %50, %cst_70 {dimension_numbers = #tpu.dot_dimension_numbers<[1], [0], [0], [1], [0, 0, 1, 1], [], []>} : vector<8x9xbf16>, vector<9x64xbf16>, vector<8x64xf32> -> vector<8x64xf32>
    %52 = arith.addf %46, %51 : vector<8x64xf32>
    %53 = arith.truncf %52 : vector<8x64xf32> to vector<8x64xbf16>
    %c0_71 = arith.constant 0 : index
    %c0_72 = arith.constant 0 : index
    %c0_73 = arith.constant 0 : index
    %c0_74 = arith.constant 0 : index
    %c0_75 = arith.constant 0 : index
    %54 = vector.load %arg13[%c0_71, %c0_72, %c0_73, %c0_74, %c0_75] : memref<1x1x1x8x64xbf16, #tpu.memory_space<vmem>>, vector<1x1x1x8x64xbf16>
    %55 = vector.shape_cast %54 : vector<1x1x1x8x64xbf16> to vector<8x64xbf16>
    %56 = vector.shape_cast %53 : vector<8x64xbf16> to vector<1x1x1x8x64xbf16>
    tpu.vector_store %arg13[%c0_71, %c0_72, %c0_73, %c0_74, %c0_75], %56 {strides = array<i32>} : memref<1x1x1x8x64xbf16, #tpu.memory_space<vmem>>, vector<1x1x1x8x64xbf16>,
    %cst_76 = arith.constant dense<0.000000e+00> : vector<64xf32>
    %57 = vector.multi_reduction <add>, %52, %cst_76 [0] : vector<8x64xf32> to vector<64xf32>
    %58 = vector.shape_cast %57 : vector<64xf32> to vector<1x64xf32>
    %59 = arith.mulf %52, %52 : vector<8x64xf32>
    %cst_77 = arith.constant dense<0.000000e+00> : vector<64xf32>
    %60 = vector.multi_reduction <add>, %59, %cst_77 [0] : vector<8x64xf32> to vector<64xf32>
    %61 = vector.shape_cast %60 : vector<64xf32> to vector<1x64xf32>
    %62 = tpu.concatenate %58, %61 in 0 : vector<1x64xf32>, vector<1x64xf32> -> vector<2x64xf32>
    %c0_78 = arith.constant 0 : index
    %c0_79 = arith.constant 0 : index
    %c0_80 = arith.constant 0 : index
    %c0_81 = arith.constant 0 : index
    %c0_82 = arith.constant 0 : index
    %63 = vector.load %arg14[%c0_78, %c0_79, %c0_80, %c0_81, %c0_82] : memref<1x1x1x2x64xf32, #tpu.memory_space<vmem>>, vector<1x1x1x2x64xf32>
    %64 = vector.shape_cast %63 : vector<1x1x1x2x64xf32> to vector<2x64xf32>
    %65 = vector.shape_cast %62 : vector<2x64xf32> to vector<1x1x1x2x64xf32>
    tpu.vector_store %arg14[%c0_78, %c0_79, %c0_80, %c0_81, %c0_82], %65 {strides = array<i32>} : memref<1x1x1x2x64xf32, #tpu.memory_space<vmem>>, vector<1x1x1x2x64xf32>,
    return
  }
  func.func @transform_0(%arg0: i32, %arg1: i32, %arg2: i32) -> (i32, i32, i32, i32, i32) {
    %c0_i32 = arith.constant 0 : i32
    %0 = arith.addi %arg1, %c0_i32 : i32
    %c0_i32_0 = arith.constant 0 : i32
    %1 = arith.addi %arg0, %c0_i32_0 : i32
    %c0_i32_1 = arith.constant 0 : i32
    %c0_i32_2 = arith.constant 0 : i32
    %c0_i32_3 = arith.constant 0 : i32
    return %arg2, %0, %1, %c0_i32_1, %c0_i32_2 : i32, i32, i32, i32, i32
  }
  func.func @transform_1(%arg0: i32, %arg1: i32, %arg2: i32) -> (i32, i32, i32, i32, i32) {
    %c0_i32 = arith.constant 0 : i32
    %0 = arith.addi %arg1, %c0_i32 : i32
    %c1_i32 = arith.constant 1 : i32
    %1 = arith.addi %arg0, %c1_i32 : i32
    %c0_i32_0 = arith.constant 0 : i32
    %c0_i32_1 = arith.constant 0 : i32
    %c0_i32_2 = arith.constant 0 : i32
    return %arg2, %0, %1, %c0_i32_0, %c0_i32_1 : i32, i32, i32, i32, i32
  }
  func.func @transform_2(%arg0: i32, %arg1: i32, %arg2: i32) -> (i32, i32, i32, i32, i32) {
    %c0_i32 = arith.constant 0 : i32
    %0 = arith.addi %arg1, %c0_i32 : i32
    %c2_i32 = arith.constant 2 : i32
    %1 = arith.addi %arg0, %c2_i32 : i32
    %c0_i32_0 = arith.constant 0 : i32
    %c0_i32_1 = arith.constant 0 : i32
    %c0_i32_2 = arith.constant 0 : i32
    return %arg2, %0, %1, %c0_i32_0, %c0_i32_1 : i32, i32, i32, i32, i32
  }
  func.func @transform_3(%arg0: i32, %arg1: i32, %arg2: i32) -> (i32, i32, i32, i32, i32) {
    %c1_i32 = arith.constant 1 : i32
    %0 = arith.addi %arg1, %c1_i32 : i32
    %c0_i32 = arith.constant 0 : i32
    %1 = arith.addi %arg0, %c0_i32 : i32
    %c0_i32_0 = arith.constant 0 : i32
    %c0_i32_1 = arith.constant 0 : i32
    %c0_i32_2 = arith.constant 0 : i32
    return %arg2, %0, %1, %c0_i32_0, %c0_i32_1 : i32, i32, i32, i32, i32
  }
  func.func @transform_4(%arg0: i32, %arg1: i32, %arg2: i32) -> (i32, i32, i32, i32, i32) {
    %c1_i32 = arith.constant 1 : i32
    %0 = arith.addi %arg1, %c1_i32 : i32
    %c1_i32_0 = arith.constant 1 : i32
    %1 = arith.addi %arg0, %c1_i32_0 : i32
    %c0_i32 = arith.constant 0 : i32
    %c0_i32_1 = arith.constant 0 : i32
    %c0_i32_2 = arith.constant 0 : i32
    return %arg2, %0, %1, %c0_i32, %c0_i32_1 : i32, i32, i32, i32, i32
  }
  func.func @transform_5(%arg0: i32, %arg1: i32, %arg2: i32) -> (i32, i32, i32, i32, i32) {
    %c1_i32 = arith.constant 1 : i32
    %0 = arith.addi %arg1, %c1_i32 : i32
    %c2_i32 = arith.constant 2 : i32
    %1 = arith.addi %arg0, %c2_i32 : i32
    %c0_i32 = arith.constant 0 : i32
    %c0_i32_0 = arith.constant 0 : i32
    %c0_i32_1 = arith.constant 0 : i32
    return %arg2, %0, %1, %c0_i32, %c0_i32_0 : i32, i32, i32, i32, i32
  }
  func.func @transform_6(%arg0: i32, %arg1: i32, %arg2: i32) -> (i32, i32, i32, i32, i32) {
    %c2_i32 = arith.constant 2 : i32
    %0 = arith.addi %arg1, %c2_i32 : i32
    %c0_i32 = arith.constant 0 : i32
    %1 = arith.addi %arg0, %c0_i32 : i32
    %c0_i32_0 = arith.constant 0 : i32
    %c0_i32_1 = arith.constant 0 : i32
    %c0_i32_2 = arith.constant 0 : i32
    return %arg2, %0, %1, %c0_i32_0, %c0_i32_1 : i32, i32, i32, i32, i32
  }
  func.func @transform_7(%arg0: i32, %arg1: i32, %arg2: i32) -> (i32, i32, i32, i32, i32) {
    %c2_i32 = arith.constant 2 : i32
    %0 = arith.addi %arg1, %c2_i32 : i32
    %c1_i32 = arith.constant 1 : i32
    %1 = arith.addi %arg0, %c1_i32 : i32
    %c0_i32 = arith.constant 0 : i32
    %c0_i32_0 = arith.constant 0 : i32
    %c0_i32_1 = arith.constant 0 : i32
    return %arg2, %0, %1, %c0_i32, %c0_i32_0 : i32, i32, i32, i32, i32
  }
  func.func @transform_8(%arg0: i32, %arg1: i32, %arg2: i32) -> (i32, i32, i32, i32, i32) {
    %c2_i32 = arith.constant 2 : i32
    %0 = arith.addi %arg1, %c2_i32 : i32
    %c2_i32_0 = arith.constant 2 : i32
    %1 = arith.addi %arg0, %c2_i32_0 : i32
    %c0_i32 = arith.constant 0 : i32
    %c0_i32_1 = arith.constant 0 : i32
    %c0_i32_2 = arith.constant 0 : i32
    return %arg2, %0, %1, %c0_i32, %c0_i32_1 : i32, i32, i32, i32, i32
  }
  func.func @transform_9(%arg0: i32, %arg1: i32, %arg2: i32) -> (i32, i32, i32) {
    %c0_i32 = arith.constant 0 : i32
    %c0_i32_0 = arith.constant 0 : i32
    %c0_i32_1 = arith.constant 0 : i32
    %c0_i32_2 = arith.constant 0 : i32
    return %c0_i32, %c0_i32_0, %c0_i32_1 : i32, i32, i32
  }
  func.func @transform_10(%arg0: i32, %arg1: i32, %arg2: i32) -> (i32, i32, i32, i32, i32) {
    %c0_i32 = arith.constant 0 : i32
    %c0_i32_0 = arith.constant 0 : i32
    %c0_i32_1 = arith.constant 0 : i32
    return %arg2, %arg1, %arg0, %c0_i32, %c0_i32_0 : i32, i32, i32, i32, i32
  }
  func.func @transform_11(%arg0: i32, %arg1: i32, %arg2: i32) -> (i32, i32, i32, i32, i32) {
    %c0_i32 = arith.constant 0 : i32
    %c0_i32_0 = arith.constant 0 : i32
    %c0_i32_1 = arith.constant 0 : i32
    return %arg2, %arg1, %arg0, %c0_i32, %c0_i32_0 : i32, i32, i32, i32, i32
  }
}

module attributes {stable_mosaic.version = 11 : i64} {
  func.func private @main(%arg0: i32) attributes {dimension_semantics = [#tpu.dimension_semantics<core_parallel>], iteration_bounds = array<i64: 2>, tpu.core_type = #tpu.core_type<sc_scalar_subcore>, window_params = []} {
    return
  }
}

module attributes {stable_mosaic.version = 11 : i64} {
  func.func private @main(%arg0: i32) attributes {dimension_semantics = [#tpu.dimension_semantics<core_parallel>], iteration_bounds = array<i64: 2>, tpu.core_type = #tpu.core_type<sc_scalar_subcore>, window_params = []} {
    return
  }
}

module attributes {stable_mosaic.version = 11 : i64} {
  func.func @_mm_bias_kernel(%arg0: i32, %arg1: memref<256x192xbf16, #tpu.memory_space<vmem>>, %arg2: memref<192x64xbf16, #tpu.memory_space<vmem>>, %arg3: memref<1x64xf32, #tpu.memory_space<vmem>>, %arg4: memref<256x64xbf16, #tpu.memory_space<vmem>>) attributes {dimension_semantics = [#tpu.dimension_semantics<parallel>], iteration_bounds = array<i64: 2>, scalar_prefetch = 0 : i64, scratch_operands = 0 : i64, tpu.core_type = #tpu.core_type<tc>, window_params = [{transform_indices = @transform_0, window_bounds = array<i64: 256, 192>}, {pipeline_mode = #tpu.pipeline_mode<synchronous>, transform_indices = @transform_1, window_bounds = array<i64: 192, 64>}, {pipeline_mode = #tpu.pipeline_mode<synchronous>, transform_indices = @transform_2, window_bounds = array<i64: 1, 64>}, {transform_indices = @transform_3, window_bounds = array<i64: 256, 64>}]} {
    %c0 = arith.constant 0 : index
    %c0_0 = arith.constant 0 : index
    %0 = vector.load %arg1[%c0, %c0_0] : memref<256x192xbf16, #tpu.memory_space<vmem>>, vector<256x192xbf16>
    %c0_1 = arith.constant 0 : index
    %c0_2 = arith.constant 0 : index
    %1 = vector.load %arg2[%c0_1, %c0_2] : memref<192x64xbf16, #tpu.memory_space<vmem>>, vector<192x64xbf16>
    %cst = arith.constant dense<0.000000e+00> : vector<256x64xf32>
    %2 = tpu.matmul %0, %1, %cst {dimension_numbers = #tpu.dot_dimension_numbers<[1], [0], [0], [1], [0, 0, 1, 1], [], []>} : vector<256x192xbf16>, vector<192x64xbf16>, vector<256x64xf32> -> vector<256x64xf32>
    %c0_3 = arith.constant 0 : index
    %c0_4 = arith.constant 0 : index
    %3 = vector.load %arg3[%c0_3, %c0_4] : memref<1x64xf32, #tpu.memory_space<vmem>>, vector<1x64xf32>
    %4 = vector.broadcast %3 : vector<1x64xf32> to vector<256x64xf32>
    %5 = arith.addf %2, %4 : vector<256x64xf32>
    %6 = arith.truncf %5 : vector<256x64xf32> to vector<256x64xbf16>
    %c0_5 = arith.constant 0 : index
    %c0_6 = arith.constant 0 : index
    %7 = vector.load %arg4[%c0_5, %c0_6] : memref<256x64xbf16, #tpu.memory_space<vmem>>, vector<256x64xbf16>
    tpu.vector_store %arg4[%c0_5, %c0_6], %6 {strides = array<i32>} : memref<256x64xbf16, #tpu.memory_space<vmem>>, vector<256x64xbf16>,
    return
  }
  func.func @transform_0(%arg0: i32) -> (i32, i32) {
    %c0_i32 = arith.constant 0 : i32
    %c0_i32_0 = arith.constant 0 : i32
    return %arg0, %c0_i32 : i32, i32
  }
  func.func @transform_1(%arg0: i32) -> (i32, i32) {
    %c0_i32 = arith.constant 0 : i32
    %c0_i32_0 = arith.constant 0 : i32
    %c0_i32_1 = arith.constant 0 : i32
    return %c0_i32, %c0_i32_0 : i32, i32
  }
  func.func @transform_2(%arg0: i32) -> (i32, i32) {
    %c0_i32 = arith.constant 0 : i32
    %c0_i32_0 = arith.constant 0 : i32
    %c0_i32_1 = arith.constant 0 : i32
    return %c0_i32, %c0_i32_0 : i32, i32
  }
  func.func @transform_3(%arg0: i32) -> (i32, i32) {
    %c0_i32 = arith.constant 0 : i32
    %c0_i32_0 = arith.constant 0 : i32
    return %arg0, %c0_i32 : i32, i32
  }
}

module attributes {stable_mosaic.version = 11 : i64} {
  func.func @_mm_bias_kernel(%arg0: i32, %arg1: memref<256x192xbf16, #tpu.memory_space<vmem>>, %arg2: memref<192x64xbf16, #tpu.memory_space<vmem>>, %arg3: memref<1x64xf32, #tpu.memory_space<vmem>>, %arg4: memref<256x64xbf16, #tpu.memory_space<vmem>>) attributes {dimension_semantics = [#tpu.dimension_semantics<parallel>], iteration_bounds = array<i64: 16>, scalar_prefetch = 0 : i64, scratch_operands = 0 : i64, tpu.core_type = #tpu.core_type<tc>, window_params = [{transform_indices = @transform_0, window_bounds = array<i64: 256, 192>}, {pipeline_mode = #tpu.pipeline_mode<synchronous>, transform_indices = @transform_1, window_bounds = array<i64: 192, 64>}, {pipeline_mode = #tpu.pipeline_mode<synchronous>, transform_indices = @transform_2, window_bounds = array<i64: 1, 64>}, {transform_indices = @transform_3, window_bounds = array<i64: 256, 64>}]} {
    %c0 = arith.constant 0 : index
    %c0_0 = arith.constant 0 : index
    %0 = vector.load %arg1[%c0, %c0_0] : memref<256x192xbf16, #tpu.memory_space<vmem>>, vector<256x192xbf16>
    %c0_1 = arith.constant 0 : index
    %c0_2 = arith.constant 0 : index
    %1 = vector.load %arg2[%c0_1, %c0_2] : memref<192x64xbf16, #tpu.memory_space<vmem>>, vector<192x64xbf16>
    %cst = arith.constant dense<0.000000e+00> : vector<256x64xf32>
    %2 = tpu.matmul %0, %1, %cst {dimension_numbers = #tpu.dot_dimension_numbers<[1], [0], [0], [1], [0, 0, 1, 1], [], []>} : vector<256x192xbf16>, vector<192x64xbf16>, vector<256x64xf32> -> vector<256x64xf32>
    %c0_3 = arith.constant 0 : index
    %c0_4 = arith.constant 0 : index
    %3 = vector.load %arg3[%c0_3, %c0_4] : memref<1x64xf32, #tpu.memory_space<vmem>>, vector<1x64xf32>
    %4 = vector.broadcast %3 : vector<1x64xf32> to vector<256x64xf32>
    %5 = arith.addf %2, %4 : vector<256x64xf32>
    %6 = arith.truncf %5 : vector<256x64xf32> to vector<256x64xbf16>
    %c0_5 = arith.constant 0 : index
    %c0_6 = arith.constant 0 : index
    %7 = vector.load %arg4[%c0_5, %c0_6] : memref<256x64xbf16, #tpu.memory_space<vmem>>, vector<256x64xbf16>
    tpu.vector_store %arg4[%c0_5, %c0_6], %6 {strides = array<i32>} : memref<256x64xbf16, #tpu.memory_space<vmem>>, vector<256x64xbf16>,
    return
  }
  func.func @transform_0(%arg0: i32) -> (i32, i32) {
    %c0_i32 = arith.constant 0 : i32
    %c0_i32_0 = arith.constant 0 : i32
    return %arg0, %c0_i32 : i32, i32
  }
  func.func @transform_1(%arg0: i32) -> (i32, i32) {
    %c0_i32 = arith.constant 0 : i32
    %c0_i32_0 = arith.constant 0 : i32
    %c0_i32_1 = arith.constant 0 : i32
    return %c0_i32, %c0_i32_0 : i32, i32
  }
  func.func @transform_2(%arg0: i32) -> (i32, i32) {
    %c0_i32 = arith.constant 0 : i32
    %c0_i32_0 = arith.constant 0 : i32
    %c0_i32_1 = arith.constant 0 : i32
    return %c0_i32, %c0_i32_0 : i32, i32
  }
  func.func @transform_3(%arg0: i32) -> (i32, i32) {
    %c0_i32 = arith.constant 0 : i32
    %c0_i32_0 = arith.constant 0 : i32
    return %arg0, %c0_i32 : i32, i32
  }
}

module attributes {stable_mosaic.version = 11 : i64} {
  func.func @_mm_bias_kernel(%arg0: i32, %arg1: memref<256x192xbf16, #tpu.memory_space<vmem>>, %arg2: memref<192x64xbf16, #tpu.memory_space<vmem>>, %arg3: memref<1x64xf32, #tpu.memory_space<vmem>>, %arg4: memref<256x64xbf16, #tpu.memory_space<vmem>>) attributes {dimension_semantics = [#tpu.dimension_semantics<parallel>], iteration_bounds = array<i64: 64>, scalar_prefetch = 0 : i64, scratch_operands = 0 : i64, tpu.core_type = #tpu.core_type<tc>, window_params = [{transform_indices = @transform_0, window_bounds = array<i64: 256, 192>}, {pipeline_mode = #tpu.pipeline_mode<synchronous>, transform_indices = @transform_1, window_bounds = array<i64: 192, 64>}, {pipeline_mode = #tpu.pipeline_mode<synchronous>, transform_indices = @transform_2, window_bounds = array<i64: 1, 64>}, {transform_indices = @transform_3, window_bounds = array<i64: 256, 64>}]} {
    %c0 = arith.constant 0 : index
    %c0_0 = arith.constant 0 : index
    %0 = vector.load %arg1[%c0, %c0_0] : memref<256x192xbf16, #tpu.memory_space<vmem>>, vector<256x192xbf16>
    %c0_1 = arith.constant 0 : index
    %c0_2 = arith.constant 0 : index
    %1 = vector.load %arg2[%c0_1, %c0_2] : memref<192x64xbf16, #tpu.memory_space<vmem>>, vector<192x64xbf16>
    %cst = arith.constant dense<0.000000e+00> : vector<256x64xf32>
    %2 = tpu.matmul %0, %1, %cst {dimension_numbers = #tpu.dot_dimension_numbers<[1], [0], [0], [1], [0, 0, 1, 1], [], []>} : vector<256x192xbf16>, vector<192x64xbf16>, vector<256x64xf32> -> vector<256x64xf32>
    %c0_3 = arith.constant 0 : index
    %c0_4 = arith.constant 0 : index
    %3 = vector.load %arg3[%c0_3, %c0_4] : memref<1x64xf32, #tpu.memory_space<vmem>>, vector<1x64xf32>
    %4 = vector.broadcast %3 : vector<1x64xf32> to vector<256x64xf32>
    %5 = arith.addf %2, %4 : vector<256x64xf32>
    %6 = arith.truncf %5 : vector<256x64xf32> to vector<256x64xbf16>
    %c0_5 = arith.constant 0 : index
    %c0_6 = arith.constant 0 : index
    %7 = vector.load %arg4[%c0_5, %c0_6] : memref<256x64xbf16, #tpu.memory_space<vmem>>, vector<256x64xbf16>
    tpu.vector_store %arg4[%c0_5, %c0_6], %6 {strides = array<i32>} : memref<256x64xbf16, #tpu.memory_space<vmem>>, vector<256x64xbf16>,
    return
  }
  func.func @transform_0(%arg0: i32) -> (i32, i32) {
    %c0_i32 = arith.constant 0 : i32
    %c0_i32_0 = arith.constant 0 : i32
    return %arg0, %c0_i32 : i32, i32
  }
  func.func @transform_1(%arg0: i32) -> (i32, i32) {
    %c0_i32 = arith.constant 0 : i32
    %c0_i32_0 = arith.constant 0 : i32
    %c0_i32_1 = arith.constant 0 : i32
    return %c0_i32, %c0_i32_0 : i32, i32
  }
  func.func @transform_2(%arg0: i32) -> (i32, i32) {
    %c0_i32 = arith.constant 0 : i32
    %c0_i32_0 = arith.constant 0 : i32
    %c0_i32_1 = arith.constant 0 : i32
    return %c0_i32, %c0_i32_0 : i32, i32
  }
  func.func @transform_3(%arg0: i32) -> (i32, i32) {
    %c0_i32 = arith.constant 0 : i32
    %c0_i32_0 = arith.constant 0 : i32
    return %arg0, %c0_i32 : i32, i32
  }
}

</mosaic_0001>

<bundles_post_ra>
// kernel: tpu_custom_call.1
= control target key start
LH: loop header
LB: loop body
LE: loop exit
PB: predicated region body
PF: predicated region fallthrough
CT: control target
= control target key end

     0   :  { %s4108_s0 = inlined_call_operand.hbm [shape: bf16[1,4,6,8,9], index: 0, kind: input, shape index: {}]   ;;  %s4109_s1 = inlined_call_operand.hbm [shape: bf16[1,4,6,8,9], index: 1, kind: input, shape index: {}]   ;;  %s4110_s2 = inlined_call_operand.hbm [shape: bf16[1,4,6,8,9], index: 2, kind: input, shape index: {}]   ;;  %s4111_s3 = inlined_call_operand.hbm [shape: bf16[1,4,6,8,9], index: 3, kind: input, shape index: {}]   ;;  %s4112_s4 = inlined_call_operand.hbm [shape: bf16[1,4,6,8,9], index: 4, kind: input, shape index: {}]   ;;  %s4113_s5 = inlined_call_operand.hbm [shape: bf16[1,4,6,8,9], index: 5, kind: input, shape index: {}]   ;;  %s4114_s6 = inlined_call_operand.hbm [shape: bf16[1,4,6,8,9], index: 6, kind: input, shape index: {}]   ;;  %s4115_s7 = inlined_call_operand.hbm [shape: bf16[1,4,6,8,9], index: 7, kind: input, shape index: {}]   ;;  %s4116_s8 = inlined_call_operand.hbm [shape: bf16[1,4,6,8,9], index: 8, kind: input, shape index: {}]   ;;  %s4117_s9 = inlined_call_operand.hbm [shape: bf16[9,9,64], index: 9, kind: input, shape index: {}]   ;;  %s4118_s10 = inlined_call_operand.hbm [shape: bf16[1,2,4,8,64], index: 10, kind: output, shape index: {0}]   ;;  %s4119_s11 = inlined_call_operand.hbm [shape: f32[1,2,4,2,64], index: 11, kind: output, shape index: {1}]  }
   0x1   :  { %4194 = sst [smem:[#allocation70_spill]] %s4108_s0 }
   0x2   :  { %4195 = sst [smem:[#allocation71_spill]] %s4109_s1 }
   0x3   :  { %4196 = sst [smem:[#allocation72_spill]] %s4110_s2 }
   0x4   :  { %4197 = sst [smem:[#allocation73_spill]] %s4111_s3 }
   0x5   :  { %4198 = sst [smem:[#allocation74_spill]] %s4112_s4 }
   0x6   :  { %4199 = sst [smem:[#allocation75_spill]] %s4113_s5 }
   0x7   :  { %4200 = sst [smem:[#allocation76_spill]] %s4114_s6 }
   0x8   :  { %4201 = sst [smem:[#allocation77_spill]] %s4115_s7 }
   0x9   :  { %4202 = sst [smem:[#allocation78_spill]] %s4116_s8 }
   0xa   :  { %4203 = sst [smem:[#allocation79_spill]] %s4117_s9 }
   0xb   :  { %4204 = sst [smem:[#allocation80_spill]] %s4118_s10 }
   0xc   :  { %4205 = sst [smem:[#allocation81_spill]] %s4119_s11 }
   0xd   :  { %17 = vsyncpa [#allocation3], 0 }
   0xe   :  { %19 = vsyncpa [#allocation3 + $0x1], 0 }
   0xf   :  { %20 = vsyncpa [#allocation6], 0 }
  0x10   :  { %22 = vsyncpa [#allocation6 + $0x1], 0 }
  0x11   :  { %23 = vsyncpa [#allocation9], 0 }
  0x12   :  { %25 = vsyncpa [#allocation9 + $0x1], 0 }
  0x13   :  { %26 = vsyncpa [#allocation12], 0 }
  0x14   :  { %28 = vsyncpa [#allocation12 + $0x1], 0 }
  0x15   :  { %29 = vsyncpa [#allocation15], 0 }
  0x16   :  { %31 = vsyncpa [#allocation15 + $0x1], 0 }
  0x17   :  { %32 = vsyncpa [#allocation18], 0 }
  0x18   :  { %33 = vsyncpa [#allocation4], 0 }
  0x19   :  { %35 = vsyncpa [#allocation4 + $0x1], 0 }
  0x1a   :  { %36 = vsyncpa [#allocation21], 0 }
  0x1b   :  { %38 = vsyncpa [#allocation21 + $0x1], 0  ;;  %s3026_s17 = smov 0   ;;  %s3028_s18 = smov 0  }
  0x1c   :  { %s3030_s19 = smov 0   ;;  %s3032_s20 = smov 0  }
  0x1d   :  { %s3034_s21 = smov 0   ;;  %s3036_s22 = smov 0  }
  0x1e   :  { %s3038_s23 = smov 0   ;;  %s3040_s24 = smov 0  }
  0x1f   :  { %4206 = sst [smem:[#allocation34_spill]] %s3038_s23  ;;  %s3042_s25 = smov 0  }
  0x20   :  { %4207 = sst [smem:[#allocation35_spill]] %s3040_s24  ;;  %s3044_s26 = smov 0  }
  0x21   :  { %4208 = sst [smem:[#allocation36_spill]] %s3042_s25  ;;  %s3046_s27 = smov 0  }
  0x22   :  { %4209 = sst [smem:[#allocation37_spill]] %s3044_s26  ;;  %s3048_s28 = smov 0  }
  0x23   :  { %s3050_s29 = smov 0   ;;  %s3052_s30 = smov 0  }
  0x24   :  { %s3054_s12 = smov 0   ;;  %s3056_s13 = smov 0  }
  0x25   :  { %4210 = sst [smem:[#allocation38_spill]] %s3054_s12  ;;  %s3058_s14 = smov 0  }
  0x26   :  { %s3060_s15 = smov 0   ;;  %s3062_s16 = smov 0  }
  0x27   :  { %4211 = sst [smem:[#allocation39_spill]] %s3062_s16  ;;  %s3064_s11 = smov 0  }
  0x28   :  { %s3066_s10 = smov 0   ;;  %s3068_s8 = smov 0  }
  0x29   :  { %4212 = sst [smem:[#allocation40_spill]] %s3066_s10  ;;  %s3070_s6 = smov 0  }
  0x2a   :  { %s3072_s4 = smov 0   ;;  %s3074_s2 = smov 0  }
  0x2b   :  { %s3076_s0 = smov 0   ;;  %s3078_s9 = smov 0  }
  0x2c   :  { %s3080_s7 = smov 0   ;;  %s3082_s5 = smov 0  }
  0x2d   :  { %4213 = sst [smem:[#allocation41_spill]] %s3080_s7  ;;  %s3084_s3 = smov 0  }
  0x2e   :  { %s3086_s1 = smov 0   ;;  %s3088_s10 = smov 0  }
  0x2f   :  { %4214 = sst [smem:[#allocation42_spill]] %s3086_s1 }
  0x30   :  { %4215 = sst [smem:[#allocation43_spill]] %s3088_s10 }
  0x31 LB: > { %s4226_s23 = sld [smem:[#allocation34_spill]]  ;;  %s4227_s24 = sld [smem:[#allocation35_spill]]  ;;  %s2939_s3 = sphi %s3084_s3, %s4456_s3   ;;  %s2935_s5 = sphi %s3082_s5, %s4455_s5   ;;  %s2927_s9 = sphi %s3078_s9, %s4453_s9   ;;  %s2923_s0 = sphi %s3076_s0, %s4452_s0   ;;  %s2919_s2 = sphi %s3074_s2, %s4451_s2   ;;  %s2915_s4 = sphi %s3072_s4, %s4428_s4   ;;  %s2911_s6 = sphi %s3070_s6, %s4450_s6   ;;  %s2907_s8 = sphi %s3068_s8, %s4449_s8   ;;  %s2899_s11 = sphi %s3064_s11, %s4447_s11   ;;  %s2891_s15 = sphi %s3060_s15, %s4445_s15   ;;  %s2887_s14 = sphi %s3058_s14, %s4443_s14   ;;  %s2883_s13 = sphi %s3056_s13, %s4441_s13   ;;  %s2875_s30 = sphi %s3052_s30, %s4437_s30   ;;  %s2871_s29 = sphi %s3050_s29, %s4413_s29   ;;  %s2867_s28 = sphi %s3048_s28, %s4412_s28   ;;  %s2863_s27 = sphi %s3046_s27, %s4433_s27   ;;  %s2843_s22 = sphi %s3036_s22, %s4407_s22   ;;  %s2839_s21 = sphi %s3034_s21, %s4406_s21   ;;  %s2835_s20 = sphi %s3032_s20, %s4405_s20   ;;  %s2831_s19 = sphi %s3030_s19, %s4420_s19   ;;  %s2827_s18 = sphi %s3028_s18, %s4404_s18   ;;  %s2823_s17 = sphi %s3026_s17, %s4403_s17  }
  0x32   : > { %s4228_s25 = sld [smem:[#allocation36_spill]]  ;;  %s4229_s26 = sld [smem:[#allocation37_spill]] }
  0x33   : > { %s4230_s12 = sld [smem:[#allocation38_spill]]  ;;  %4231 = sst [smem:[#allocation34_spill]] %s2823_s17 }
  0x34   : > { %4232 = sst [smem:[#allocation35_spill]] %s2827_s18  ;;  %s4234_s16 = sld [smem:[#allocation39_spill]] }
  0x35   : > { %4233 = sst [smem:[#allocation36_spill]] %s2831_s19  ;;  %s4237_s10 = sld [smem:[#allocation40_spill]] }
  0x36   : > { %4235 = sst [smem:[#allocation37_spill]] %s2835_s20  ;;  %s4243_s7 = sld [smem:[#allocation41_spill]] }
  0x37   : > { %4236 = sst [smem:[#allocation38_spill]] %s2839_s21  ;;  %s4247_s1 = sld [smem:[#allocation42_spill]] }
  0x38   : > { %4238 = sst [smem:[#allocation40_spill]] %s2843_s22  ;;  %s4248_s17 = sld [smem:[#allocation43_spill]] }
  0x39   : > { %4239 = sst [smem:[#allocation39_spill]] %s4226_s23  ;;  %p113_p4 = scmp.ne.s32.totalorder %s2915_s4, %s2911_s6 }
  0x3a   : > { %4240 = sst [smem:[#allocation44_spill]] %s4227_s24  ;;  %s106_s24 = sadd.s32 1, %s2915_s4 }
  0x3b   : > { %4241 = sst [smem:[#allocation45_spill]] %s4228_s25  ;;  %p119_p5 = scmp.ne.s32.totalorder %s2911_s6, %s2907_s8 }
  0x3c   : > { %4242 = sst [smem:[#allocation46_spill]] %s2867_s28 }
  0x3d   : > { %4244 = sst [smem:[#allocation41_spill]] %s2871_s29 }
  0x3e   : > { %4245 = sst [smem:[#allocation47_spill]] %s2875_s30 }
  0x3f   : > { %4246 = sst [smem:[#allocation48_spill]] %s4230_s12 }
  0x40   : > { %4249 = sst [smem:[#allocation42_spill]] %s2891_s15 }
  0x41   : > { %4250 = sst [smem:[#allocation43_spill]] %s4234_s16  ;;  %s4263_s16 = smov %s4248_s17 }
  0x42   : > { %4251 = sst [smem:[#allocation49_spill]] %s2899_s11  ;;  %s3185_s18 = sadd.s32 4294967295, %s4263_s16  }
  0x43   : > { %4252 = sst [smem:[#allocation50_spill]] %s4237_s10  ;;  %p4152_p1 = scmp.eq.s32.totalorder %s4263_s16, 0 }
  0x44   : > { %4253 = sst [smem:[#allocation51_spill]] %s2911_s6  ;;  %p4151_p2 = scmp.eq.s32.totalorder %s3185_s18, 0 }
  0x45   : > { %4254 = sst [smem:[#allocation52_spill]] %s2915_s4  ;;  %p3210_p6 = por %p113_p4, %p4152_p1 }
  0x46   : > { %4255 = sst [smem:[#allocation53_spill]] %s2919_s2  ;;  %p3216_p7 = por %p119_p5, %p4151_p2 }
  0x47   : > { %4256 = sst [smem:[#allocation54_spill]] %s2923_s0  ;;  %p4150_p8 = scmp.lt.s32.totalorder %s4263_s16, 8 }
  0x48   : > { %4257 = sst [smem:[#allocation55_spill]] %s2927_s9  ;;  %s3228_s6 = sand.u32 1, %s4263_s16  }
  0x49   : > { %4258 = sst [smem:[#allocation56_spill]] %s4243_s7  ;;  %s3188_s7 = sadd.s32 1, %s2939_s3 }
  0x4a   : > { %4259 = sst [smem:[#allocation57_spill]] %s2935_s5  ;;  %p61_p0 = scmp.ge.s32.totalorder %s3188_s7, 2 }
  0x4b   : > { %4260 = sst [smem:[#allocation58_spill]] %s2939_s3  ;;  %s63_s5 = sadd.s32 1, %s4247_s1 }
  0x4c   : > { %4261 = sst [smem:[#allocation59_spill]] %s4247_s1  ;;  %p3247_p10 = pnand %p4150_p8, %p3210_p6 }
  0x4d   : > { %4262 = sst [smem:[#allocation60_spill]] %s4248_s17 }
  0x4e   : > { %4264 = sst [smem:[#allocation61_spill]] %s3188_s7  ;;  %p2285_p12 = pneg %p3247_p10 }
  0x4f   : > { %s3195_s19 = scalar_select %p61_p0, 0, %s3188_s7  }
  0x50   : > { %s64_s17 = scalar_select %p61_p0, %s63_s5, %s4247_s1 }
  0x51   : > { %4265 = sst [smem:[#allocation62_spill]] %s3195_s19  ;;  %s4266_s12 = smov %s3195_s19 }
  0x52   : > { %s3200_s23 = ssub.s32 %s2939_s3, %s4266_s12  ;;  %p65_p3 = scmp.ge.s32.totalorder %s64_s17, 4 }
  0x53   : > { %4267 = sst [smem:[#allocation63_spill]] %s3200_s23 }
  0x54   : > { %s4461_s17 = smov (%p65_p3, %s64_s17), 0 }
  0x55   : > { %4268 = sst [smem:[#allocation64_spill]] %s4461_s17  ;;  %s4269_s11 = smov %s4461_s17 }
  0x56   : > { %s4271_s19 = scalar_select %p3216_p7, 1, 0 }
  0x57   : > { %s98_s29 = sadd.s32 1, %s4269_s11  ;;  %s1942_s17 = smul.u32 6, %s2939_s3 }
  0x58   : > { %4272 = sst [smem:[#allocation65_spill]] %s4271_s19  ;;  %s3221_s30 = ssub.s32 %s63_s5, %s98_s29 }
  0x59   : > { %s103_s8 = sor.u32 %s3221_s30, %s3200_s23  ;;  %s478_s10 = sadd.s32 %s4247_s1, %s1942_s17 }
  0x5a   : > { %p104_p9 = scmp.eq.s32.totalorder %s103_s8, 0  ;;  %s3234_s0 = sshll.u32 %s478_s10, 6 }
  0x5b   : > { %s493_s19 = sand.u32 1, %s2915_s4   ;;  %s4274_s5 = sld [smem:[#allocation71_spill]] }
  0x5c   : > { %s3232_s2 = scalar_select %p104_p9, %s2915_s4, %s106_s24  }
  0x5d   : > { %s1786_s9 = sshll.u32 %s493_s19, 2  ;;  %s4153_s10 = scalar_lea.sflag [#allocation6], %s3228_s6 }
  0x5e   : > { %4273 = sst [smem:[#allocation66_spill]] %s3232_s2  ;;  %s495_s8 = scalar_lea.vmem [#allocation5], %s1786_s9 }
  0x5f   : > { %s507_s23 = sshll.u32 %s495_s8, 4  ;;  %s3251_s23 = int_to_ptr.vmem [resolvable:$true] %s507_s23 }
  0x61   : > { %s4275_s7 = smov %s4274_s5  ;;  %s1495_s29 = scalar_lea.hbm %s4274_s5, %s3234_s0 }
  0x62   : > { %s3241_s22 = scalar_lea.hbm %s1495_s29, 64  ;;  %s2313_s20 = scalar_lea.hbm %s1495_s29, 128 }
  0x63   : > { %p2284_p11 = scmp.ne.s32.totalorder %s3241_s22, %s2313_s20  ;;  %s2288_s25 = scalar_lea.hbm %s4275_s7, 1536 }
  0x64   : > { %p2289_p3 = scmp.lt.u32.totalorder %s3241_s22, %s4275_s7  ;;  %p2290_p4 = scmp.lt.u32.totalorder %s2288_s25, %s2313_s20 }
  0x65   : > { %p2286_p13 = pnand %p2285_p12, %p2284_p11  ;;  %p2292_p6 = scmp.lt.u32.totalorder %s2313_s20, %s3241_s22 }
  0x66   : > { %p2291_p5 = por %p2290_p4, %p2289_p3 }
  0x67   : > { %p2287_p0 = pneg %p2286_p13 }
  0x68   : > { %p2293_p9 = por %p2292_p6, %p2291_p5 }
  0x6a   : > { %p2294_p8 = pnand %p2293_p9, %p2287_p0 }
  0x6c   : > { %2297 = shalt.err (!%p2294_p8)
}
  0x6d   : > { %s2298_s5 = scalar_lea.vmem %s3251_s23, 64  ;;  %s2949_s29 = smov [#allocation5]  }
  0x6e   : > { %p2299_p11 = scmp.ne.s32.totalorder %s3251_s23, %s2298_s5  ;;  %s2303_s8 = sshll.u32 %s2949_s29, 4  ;;  %s2304_s8 = int_to_ptr.vmem [resolvable:$false] %s2303_s8 }
  0x6f   : > { %s2305_s9 = scalar_lea.vmem %s2304_s8, 128  ;;  %p2306_p1 = scmp.lt.s32.totalorder %s3251_s23, %s2304_s8 }
  0x70   : > { %p2301_p13 = pnand %p2299_p11, %p2285_p12  ;;  %p2307_p3 = scmp.lt.s32.totalorder %s2305_s9, %s2298_s5 }
  0x72   : > { %p2302_p2 = pneg %p2301_p13  ;;  %p2308_p4 = por %p2307_p3, %p2306_p1 }
  0x74   : > { %p2309_p5 = pnand %p2308_p4, %p2302_p2 }
  0x76   : > { %2312 = shalt.err (!%p2309_p5)
}
  0x77   : > { %s4277_s20 = sld [smem:[#allocation61_spill]]  ;;  %s3282_s24 = ssub.s32 %s4247_s1, %s4269_s11 }
  0x78   : > { %1979 = dma.hbm_to_vmem [thread:$0]  (!%p3247_p10), %s3241_s22, 64, %s3251_s23, %s4153_s10  }
  0x79   : > { %s162_s21 = sadd.s32 1, %s4266_s12  ;;  %s170_s19 = sadd.s32 1, %s2891_s15 }
  0x7a   : > { %p177_p1 = scmp.ne.s32.totalorder %s2891_s15, %s2887_s14  ;;  %p183_p8 = scmp.ne.s32.totalorder %s2887_s14, %s2883_s13 }
  0x7b   : > { %p4278_p12 = scmp.eq.s32.totalorder %s4263_s16, 0  ;;  %p4280_p6 = scmp.eq.s32.totalorder %s3185_s18, 0 }
  0x7c   : > { %s539_s23 = sand.u32 1, %s2891_s15   ;;  %p4284_p9 = scmp.lt.s32.totalorder %s4263_s16, 8 }
  0x7d   : > { %s3286_s25 = ssub.s32 %s4277_s20, %s162_s21  ;;  %p179_p0 = por %p177_p1, %p4278_p12 }
  0x7e   : > { %s167_s17 = sor.u32 %s3286_s25, %s3282_s24  ;;  %p3302_p10 = por %p183_p8, %p4280_p6 }
  0x7f   : > { %p168_p2 = scmp.eq.s32.totalorder %s167_s17, 0  ;;  %s1790_s29 = sshll.u32 %s539_s23, 2 }
  0x80   : > { %s4281_s22 = scalar_select %p3302_p10, 1, 0 }
  0x81   : > { %s3298_s5 = scalar_select %p168_p2, %s2891_s15, %s170_s19  }
  0x82   : > { %s4282_s20 = sld [smem:[#allocation73_spill]]  ;;  %s541_s13 = scalar_lea.vmem [#allocation8], %s1790_s29 }
  0x83   : > { %4279 = sst [smem:[#allocation67_spill]] %s3298_s5  ;;  %s553_s17 = sshll.u32 %s541_s13, 4  ;;  %s3319_s17 = int_to_ptr.vmem [resolvable:$true] %s553_s17 }
  0x84   : > { %p3315_p11 = pnand %p4284_p9, %p179_p0  ;;  %s4156_s23 = scalar_lea.sflag [#allocation9], %s3228_s6 }
  0x86   : > { %p2316_p3 = pneg %p3315_p11 }
  0x88   : > { %s4283_s10 = smov %s4282_s20  ;;  %s1515_s21 = scalar_lea.hbm %s4282_s20, %s3234_s0 }
  0x89   : > { %s3311_s7 = scalar_lea.hbm %s1515_s21, 384  ;;  %s2344_s2 = scalar_lea.hbm %s1515_s21, 448 }
  0x8a   : > { %p2315_p13 = scmp.ne.s32.totalorder %s3311_s7, %s2344_s2  ;;  %s2319_s9 = scalar_lea.hbm %s4283_s10, 1536 }
  0x8b   : > { %p2320_p1 = scmp.lt.u32.totalorder %s3311_s7, %s4283_s10  ;;  %p2321_p2 = scmp.lt.u32.totalorder %s2319_s9, %s2344_s2 }
  0x8c   : > { %p2317_p4 = pnand %p2316_p3, %p2315_p13  ;;  %p2323_p12 = scmp.lt.u32.totalorder %s2344_s2, %s3311_s7 }
  0x8d   : > { %p2322_p8 = por %p2321_p2, %p2320_p1 }
  0x8e   : > { %p2318_p5 = pneg %p2317_p4 }
  0x8f   : > { %p2324_p0 = por %p2323_p12, %p2322_p8 }
  0x91   : > { %p2325_p6 = pnand %p2324_p0, %p2318_p5 }
  0x93   : > { %2328 = shalt.err (!%p2325_p6)
}
  0x94   : > { %s2329_s21 = scalar_lea.vmem %s3319_s17, 64  ;;  %s2950_s29 = smov [#allocation8]  }
  0x95   : > { %p2330_p9 = scmp.ne.s32.totalorder %s3319_s17, %s2329_s21  ;;  %s2334_s8 = sshll.u32 %s2950_s29, 4  ;;  %s2335_s8 = int_to_ptr.vmem [resolvable:$false] %s2334_s8 }
  0x96   : > { %s2336_s20 = scalar_lea.vmem %s2335_s8, 128  ;;  %p2337_p10 = scmp.lt.s32.totalorder %s3319_s17, %s2335_s8 }
  0x97   : > { %p2332_p13 = pnand %p2330_p9, %p2316_p3  ;;  %p2338_p1 = scmp.lt.s32.totalorder %s2336_s20, %s2329_s21 }
  0x99   : > { %p2333_p4 = pneg %p2332_p13  ;;  %p2339_p2 = por %p2338_p1, %p2337_p10 }
  0x9b   : > { %p2340_p8 = pnand %p2339_p2, %p2333_p4 }
  0x9d   : > { %2343 = shalt.err (!%p2340_p8)
}
  0x9e   : > { %1985 = dma.hbm_to_vmem [thread:$0]  (!%p3315_p11), %s3311_s7, 64, %s3319_s17, %s4156_s23  }
  0x9f   : > { %s129_s2 = sadd.s32 2, %s4247_s1  ;;  %s130_s19 = sadd.s32 2, %s4269_s11 }
  0xa0   : > { %s3350_s9 = ssub.s32 %s129_s2, %s130_s19  ;;  %s238_s13 = sadd.s32 1, %s2867_s28 }
  0xa1   : > { %s235_s21 = sor.u32 %s3286_s25, %s3350_s9  ;;  %p245_p10 = scmp.ne.s32.totalorder %s2867_s28, %s2863_s27 }
  0xa2   : > { %p236_p3 = scmp.eq.s32.totalorder %s235_s21, 0  ;;  %p251_p5 = scmp.ne.s32.totalorder %s2863_s27, %s4229_s26 }
  0xa3   : > { %p4286_p12 = scmp.eq.s32.totalorder %s4263_s16, 0  ;;  %p4288_p6 = scmp.eq.s32.totalorder %s3185_s18, 0 }
  0xa4   : > { %s3362_s29 = scalar_select %p236_p3, %s2867_s28, %s238_s13  }
  0xa5   : > { %p247_p0 = por %p245_p10, %p4286_p12  ;;  %p3366_p9 = por %p251_p5, %p4288_p6 }
  0xa6   : > { %4287 = sst [smem:[#allocation68_spill]] %s3362_s29  ;;  %s586_s7 = sand.u32 1, %s2867_s28  }
  0xa7   : > { %s4289_s8 = scalar_select %p3366_p9, 1, 0 }
  0xa8   : > { %s1794_s17 = sshll.u32 %s586_s7, 2  ;;  %s4290_s19 = sld [smem:[#allocation75_spill]] }
  0xa9   : > { %s588_s26 = scalar_lea.vmem [#allocation11], %s1794_s17  ;;  %p4292_p11 = scmp.lt.s32.totalorder %s4263_s16, 8 }
  0xaa   : > { %s601_s21 = sshll.u32 %s588_s26, 4  ;;  %s4163_s7 = scalar_lea.sflag [#allocation12], %s3228_s6  ;;  %s3383_s21 = int_to_ptr.vmem [resolvable:$true] %s601_s21 }
  0xab   : > { %p3379_p13 = pnand %p4292_p11, %p247_p0 }
  0xad   : > { %p2347_p1 = pneg %p3379_p13 }
  0xae   : > { %s4291_s23 = smov %s4290_s19  ;;  %s1535_s10 = scalar_lea.hbm %s4290_s19, %s3234_s0 }
  0xaf   : > { %s3375_s11 = scalar_lea.hbm %s1535_s10, 512  ;;  %s2375_s1 = scalar_lea.hbm %s1535_s10, 576 }
  0xb0   : > { %p2346_p4 = scmp.ne.s32.totalorder %s3375_s11, %s2375_s1  ;;  %s2350_s2 = scalar_lea.hbm %s4291_s23, 1536 }
  0xb1   : > { %p2351_p10 = scmp.lt.u32.totalorder %s3375_s11, %s4291_s23  ;;  %p2352_p3 = scmp.lt.u32.totalorder %s2350_s2, %s2375_s1 }
  0xb2   : > { %p2348_p2 = pnand %p2347_p1, %p2346_p4  ;;  %p2354_p12 = scmp.lt.u32.totalorder %s2375_s1, %s3375_s11 }
  0xb3   : > { %p2353_p5 = por %p2352_p3, %p2351_p10 }
  0xb4   : > { %p2349_p8 = pneg %p2348_p2 }
  0xb5   : > { %p2355_p0 = por %p2354_p12, %p2353_p5 }
  0xb7   : > { %p2356_p6 = pnand %p2355_p0, %p2349_p8 }
  0xb9   : > { %2359 = shalt.err (!%p2356_p6)
}
  0xba   : > { %s2360_s10 = scalar_lea.vmem %s3383_s21, 64  ;;  %s2951_s17 = smov [#allocation11]  }
  0xbb   : > { %p2361_p11 = scmp.ne.s32.totalorder %s3383_s21, %s2360_s10  ;;  %s2365_s20 = sshll.u32 %s2951_s17, 4  ;;  %s2366_s20 = int_to_ptr.vmem [resolvable:$false] %s2365_s20 }
  0xbc   : > { %s2367_s19 = scalar_lea.vmem %s2366_s20, 128  ;;  %p2368_p9 = scmp.lt.s32.totalorder %s3383_s21, %s2366_s20 }
  0xbd   : > { %p2363_p4 = pnand %p2361_p11, %p2347_p1  ;;  %p2369_p10 = scmp.lt.s32.totalorder %s2367_s19, %s2360_s10 }
  0xbf   : > { %p2364_p2 = pneg %p2363_p4  ;;  %p2370_p3 = por %p2369_p10, %p2368_p9 }
  0xc1   : > { %p2371_p5 = pnand %p2370_p3, %p2364_p2 }
  0xc3   : > { %2374 = shalt.err (!%p2371_p5)
}
  0xc4   : > { %s4294_s1 = sld [smem:[#allocation40_spill]]  ;;  %s4295_s2 = sld [smem:[#allocation38_spill]] }
  0xc5   : > { %s4296_s26 = sld [smem:[#allocation37_spill]]  ;;  %s261_s10 = sadd.s32 2, %s2939_s3 }
  0xc6   : > { %1991 = dma.hbm_to_vmem [thread:$0]  (!%p3379_p13), %s3375_s11, 64, %s3383_s21, %s4163_s7  }
  0xc7   : > { %s262_s13 = sadd.s32 2, %s4266_s12  ;;  %p4297_p12 = scmp.eq.s32.totalorder %s4263_s16, 0 }
  0xc8   : > { %s3414_s17 = ssub.s32 %s261_s10, %s262_s13  ;;  %p4299_p6 = scmp.eq.s32.totalorder %s3185_s18, 0 }
  0xc9   : > { %s301_s19 = sor.u32 %s3414_s17, %s3221_s30  ;;  %s4301_s7 = sld [smem:[#allocation77_spill]] }
  0xca   : > { %s304_s20 = sadd.s32 1, %s4294_s1  ;;  %p311_p9 = scmp.ne.s32.totalorder %s4294_s1, %s4295_s2 }
  0xcb   : > { %p302_p1 = scmp.eq.s32.totalorder %s301_s19, 0  ;;  %p317_p8 = scmp.ne.s32.totalorder %s4295_s2, %s4296_s26 }
  0xcc   : > { %p313_p0 = por %p311_p9, %p4297_p12  ;;  %s633_s11 = sand.u32 1, %s4294_s1  }
  0xcd   : > { %s3426_s23 = scalar_select %p302_p1, %s4294_s1, %s304_s20  }
  0xce   : > { %p3430_p11 = por %p317_p8, %p4299_p6  ;;  %s1798_s21 = sshll.u32 %s633_s11, 2 }
  0xcf   : > { %4298 = sst [smem:[#allocation37_spill]] %s3426_s23  ;;  %s1555_s12 = scalar_lea.hbm %s4301_s7, %s3234_s0 }
  0xd0   : > { %s4300_s4 = scalar_select %p3430_p11, 1, 0 }
  0xd1   : > { %s3439_s3 = scalar_lea.hbm %s1555_s12, 832  ;;  %s635_s2 = scalar_lea.vmem [#allocation14], %s1798_s21 }
  0xd2   : > { %s648_s26 = sshll.u32 %s635_s2, 4  ;;  %p4302_p13 = scmp.lt.s32.totalorder %s4263_s16, 8  ;;  %s3447_s26 = int_to_ptr.vmem [resolvable:$true] %s648_s26 }
  0xd3   : > { %s4167_s1 = scalar_lea.sflag [#allocation15], %s3228_s6  ;;  %s2406_s19 = scalar_lea.hbm %s1555_s12, 896 }
  0xd4   : > { %p3443_p4 = pnand %p4302_p13, %p313_p0  ;;  %p2377_p2 = scmp.ne.s32.totalorder %s3439_s3, %s2406_s19 }
  0xd5   : > { %s2381_s10 = scalar_lea.hbm %s4301_s7, 1536  ;;  %p2382_p9 = scmp.lt.u32.totalorder %s3439_s3, %s4301_s7 }
  0xd6   : > { %p2378_p10 = pneg %p3443_p4  ;;  %p2383_p1 = scmp.lt.u32.totalorder %s2381_s10, %s2406_s19 }
  0xd7   : > { %p2385_p12 = scmp.lt.u32.totalorder %s2406_s19, %s3439_s3 }
  0xd8   : > { %p2379_p3 = pnand %p2378_p10, %p2377_p2  ;;  %p2384_p8 = por %p2383_p1, %p2382_p9 }
  0xda   : > { %p2380_p5 = pneg %p2379_p3  ;;  %p2386_p0 = por %p2385_p12, %p2384_p8 }
  0xdc   : > { %p2387_p6 = pnand %p2386_p0, %p2380_p5 }
  0xde   : > { %2390 = shalt.err (!%p2387_p6)
}
  0xdf   : > { %s2391_s12 = scalar_lea.vmem %s3447_s26, 64  ;;  %s2952_s11 = smov [#allocation14]  }
  0xe0   : > { %p2392_p13 = scmp.ne.s32.totalorder %s3447_s26, %s2391_s12  ;;  %s2396_s21 = sshll.u32 %s2952_s11, 4  ;;  %s2397_s21 = int_to_ptr.vmem [resolvable:$false] %s2396_s21 }
  0xe1   : > { %s2398_s13 = scalar_lea.vmem %s2397_s21, 128  ;;  %p2399_p11 = scmp.lt.s32.totalorder %s3447_s26, %s2397_s21 }
  0xe2   : > { %p2394_p2 = pnand %p2392_p13, %p2378_p10  ;;  %p2400_p9 = scmp.lt.s32.totalorder %s2398_s13, %s2391_s12 }
  0xe4   : > { %p2395_p3 = pneg %p2394_p2  ;;  %p2401_p1 = por %p2400_p9, %p2399_p11 }
  0xe6   : > { %p2402_p8 = pnand %p2401_p1, %p2395_p3 }
  0xe8   : > { %2405 = shalt.err (!%p2402_p8)
}
  0xe9   : > { %1997 = dma.hbm_to_vmem [thread:$0]  (!%p3443_p4), %s3439_s3, 64, %s3447_s26, %s4167_s1  }
  0xea   : > { %p1781_p10 = scmp.ge.s32.totalorder %s4263_s16, 1  ;;  %p443_p5 = scmp.lt.s32.totalorder %s4263_s16, 9 }
  0xeb   : > { %s2953_s10 = smov [#allocation17]   ;;  %p4305_p0 = scmp.eq.s32.totalorder %s3185_s18, 0 }
  0xec   : > { %p3478_p12 = pnand %p1781_p10, %p443_p5  ;;  %s455_s2 = sshll.u32 %s2953_s10, 4  ;;  %s456_s2 = int_to_ptr.vmem [resolvable:$true] %s455_s2 }
  0xed   : > { %s4307_s11 = sld [smem:[#allocation79_spill]] }
  0xee   : > { %s4304_s19 = scalar_select %p3478_p12, 1, 0 }
  0xef   : > { %p1969_p11 = pneg %p3478_p12 }
  0xf1   : > { %p3486_p6 = pnand %p1969_p11, %p4305_p0 }
  0xf3   : > { %s4308_s1 = smov %s4307_s11  ;;  %s2407_s21 = scalar_lea.hbm %s4307_s11, 1152 }
  0xf4   : > { %p2408_p4 = scmp.ne.s32.totalorder %s4308_s1, %s2407_s21  ;;  %p2409_p13 = pneg %p3486_p6 }
  0xf5   : > { %p2414_p9 = scmp.lt.u32.totalorder %s2407_s21, %s4308_s1 }
  0xf6   : > { %p2410_p2 = pnand %p2409_p13, %p2408_p4 }
  0xf8   : > { %p2411_p3 = pneg %p2410_p2 }
  0xfa   : > { %p2416_p1 = pnand %p2414_p9, %p2411_p3 }
  0xfc   : > { %2419 = shalt.err (!%p2416_p1)
}
  0xfd   : > { %s2420_s15 = scalar_lea.vmem %s456_s2, 1152  ;;  %p2428_p11 = scmp.lt.s32.totalorder %s456_s2, %s456_s2 }
  0xfe   : > { %p2421_p8 = scmp.ne.s32.totalorder %s456_s2, %s2420_s15  ;;  %p2429_p0 = scmp.lt.s32.totalorder %s2420_s15, %s2420_s15 }
 0x100   : > { %p2423_p10 = pnand %p2421_p8, %p2409_p13  ;;  %p2430_p7 = por %p2429_p0, %p2428_p11 }
 0x102   : > { %p2424_p5 = pneg %p2423_p10 }
 0x104   : > { %p2431_p12 = pnand %p2430_p7, %p2424_p5 }
 0x106   : > { %2434 = shalt.err (!%p2431_p12)
}
 0x107   : > { %s2954_s7 = smov 64   ;;  %s4309_s3 = sld [smem:[#allocation63_spill]] }
 0x108   : > { %s4310_s26 = sld [smem:[#allocation55_spill]]  ;;  %s4311_s11 = sld [smem:[#allocation54_spill]] }
 0x109   : > { %s4312_s5 = sld [smem:[#allocation53_spill]]  ;;  %s2955_s15 = smov 4  }
 0x10a   : > { %1972 = dma.hbm_to_vmem [thread:$0]  (!%p3486_p6), %s4308_s1, 1152, %s456_s2, [#allocation18], %s2954_s7, %s2954_s7, %s2955_s15  }
 0x10b   : > { %p400_p13 = scmp.eq.s32.totalorder %s3185_s18, 7  ;;  %p4314_p2 = scmp.eq.s32.totalorder %s4263_s16, 0 }
 0x10c   : > { %p4315_p9 = scmp.eq.s32.totalorder %s3185_s18, 0  ;;  %s4319_s2 = sadd.s32 4294967294, %s4263_s16  }
 0x10d   : > { %s71_s10 = sor.u32 %s3282_s24, %s4309_s3  ;;  %p406_p6 = scmp.eq.s32.totalorder %s4319_s2, 7 }
 0x10e   : > { %s74_s12 = sadd.s32 1, %s4310_s26  ;;  %p72_p7 = scmp.eq.s32.totalorder %s71_s10, 0 }
 0x10f   : > { %p81_p12 = scmp.ne.s32.totalorder %s4310_s26, %s4311_s11  ;;  %p87_p4 = scmp.ne.s32.totalorder %s4311_s11, %s4312_s5 }
 0x110   : > { %s3516_s29 = scalar_select %p72_p7, %s4310_s26, %s74_s12  }
 0x111   : > { %p83_p3 = por %p4314_p2, %p81_p12  ;;  %p3522_p1 = por %p4315_p9, %p87_p4 }
 0x112   : > { %4313 = sst [smem:[#allocation69_spill]] %s3516_s29  ;;  %p3526_p8 = por %p400_p13, %p81_p12 }
 0x113   : > { %s4316_s28 = scalar_select %p3522_p1, 1, 0 }
 0x114   : > { %s4317_s20 = scalar_select %p3526_p8, 1, 0 }
 0x115   : > { %s469_s7 = sand.u32 1, %s4310_s26   ;;  %s4320_s11 = sld [smem:[#allocation70_spill]] }
 0x116   : > { %4318 = sst [smem:[#allocation61_spill]] %s4317_s20  ;;  %p3539_p10 = por %p406_p6, %p87_p4 }
 0x117   : > { %s1784_s13 = sshll.u32 %s469_s7, 2  ;;  %p4324_p5 = scmp.lt.s32.totalorder %s4263_s16, 8 }
 0x118   : > { %s4322_s12 = scalar_select %p3539_p10, 1, 0 }
 0x119   : > { %p3545_p11 = pnand %p4324_p5, %p83_p3  ;;  %s473_s26 = scalar_lea.vmem [#allocation2], %s1784_s13 }
 0x11a   : > { %4323 = sst [smem:[#allocation63_spill]] %s4322_s12  ;;  %s484_s2 = sshll.u32 %s473_s26, 4  ;;  %s3549_s2 = int_to_ptr.vmem [resolvable:$true] %s484_s2 }
 0x11b   : > { %s4321_s10 = smov %s4320_s11  ;;  %s3537_s5 = scalar_lea.hbm %s4320_s11, %s3234_s0 }
 0x11c   : > { %s470_s15 = scalar_lea.sflag [#allocation3], %s469_s7  ;;  %s2435_s21 = scalar_lea.hbm %s3537_s5, 64 }
 0x11d   : > { %p2436_p0 = scmp.ne.s32.totalorder %s3537_s5, %s2435_s21  ;;  %p2437_p7 = pneg %p3545_p11 }
 0x11e   : > { %s2440_s23 = scalar_lea.hbm %s4321_s10, 1536  ;;  %p2441_p13 = scmp.lt.u32.totalorder %s3537_s5, %s4321_s10 }
 0x11f   : > { %p2438_p12 = pnand %p2437_p7, %p2436_p0  ;;  %p2442_p2 = scmp.lt.u32.totalorder %s2440_s23, %s2435_s21 }
 0x120   : > { %p2444_p9 = scmp.lt.u32.totalorder %s2435_s21, %s3537_s5 }
 0x121   : > { %p2439_p4 = pneg %p2438_p12  ;;  %p2443_p3 = por %p2442_p2, %p2441_p13 }
 0x123   : > { %p2445_p6 = por %p2444_p9, %p2443_p3 }
 0x125   : > { %p2446_p5 = pnand %p2445_p6, %p2439_p4 }
 0x127   : > { %2449 = shalt.err (!%p2446_p5)
}
 0x128   : > { %s2450_s7 = scalar_lea.vmem %s3549_s2, 64  ;;  %s2956_s29 = smov [#allocation2]  }
 0x129   : > { %p2451_p0 = scmp.ne.s32.totalorder %s3549_s2, %s2450_s7  ;;  %s2455_s13 = sshll.u32 %s2956_s29, 4  ;;  %s2456_s13 = int_to_ptr.vmem [resolvable:$false] %s2455_s13 }
 0x12a   : > { %s2457_s20 = scalar_lea.vmem %s2456_s13, 128  ;;  %p2458_p8 = scmp.lt.s32.totalorder %s3549_s2, %s2456_s13 }
 0x12b   : > { %p2453_p12 = pnand %p2451_p0, %p2437_p7  ;;  %p2459_p13 = scmp.lt.s32.totalorder %s2457_s20, %s2450_s7 }
 0x12d   : > { %p2454_p10 = pneg %p2453_p12  ;;  %p2460_p2 = por %p2459_p13, %p2458_p8 }
 0x12f   : > { %p2461_p3 = pnand %p2460_p2, %p2454_p10 }
 0x131   : > { %2464 = shalt.err (!%p2461_p3)
}
 0x132   : > { %s4326_s23 = sld [smem:[#allocation50_spill]]  ;;  %s4327_s12 = sld [smem:[#allocation49_spill]] }
 0x133   : > { %s4328_s26 = sld [smem:[#allocation43_spill]]  ;;  %s135_s21 = sor.u32 %s3350_s9, %s4309_s3 }
 0x134   : > { %1976 = dma.hbm_to_vmem [thread:$0]  (!%p3545_p11), %s3537_s5, 64, %s3549_s2, %s470_s15  }
 0x135   : > { %p136_p8 = scmp.eq.s32.totalorder %s135_s21, 0  ;;  %p4330_p4 = scmp.eq.s32.totalorder %s4263_s16, 0 }
 0x136   : > { %p4331_p6 = scmp.eq.s32.totalorder %s3185_s18, 0  ;;  %s4333_s10 = sld [smem:[#allocation72_spill]] }
 0x137   : > { %p4334_p11 = scmp.lt.s32.totalorder %s4263_s16, 8 }
 0x138   : > { %s138_s11 = sadd.s32 1, %s4326_s23  ;;  %p145_p10 = scmp.ne.s32.totalorder %s4326_s23, %s4327_s12 }
 0x139   : > { %p151_p7 = scmp.ne.s32.totalorder %s4327_s12, %s4328_s26  ;;  %s516_s1 = sand.u32 1, %s4326_s23  }
 0x13a   : > { %s4463_s23 = smov (!%p136_p8, %s4326_s23), %s138_s11  ;;  %p147_p9 = por %p145_p10, %p4330_p4 }
 0x13b   : > { %4329 = sst [smem:[#allocation43_spill]] %s4463_s23  ;;  %p3591_p5 = por %p151_p7, %p4331_p6 }
 0x13c   : > { %s1788_s29 = sshll.u32 %s516_s1, 2  ;;  %s1505_s5 = scalar_lea.hbm %s4333_s10, %s3234_s0 }
 0x13d   : > { %s4332_s7 = scalar_select %p3591_p5, 1, 0 }
 0x13e   : > { %s3599_s3 = scalar_lea.hbm %s1505_s5, 128  ;;  %s518_s2 = scalar_lea.vmem [#allocation7], %s1788_s29 }
 0x13f   : > { %s530_s15 = sshll.u32 %s518_s2, 4  ;;  %p3603_p0 = pnand %p4334_p11, %p147_p9  ;;  %s531_s15 = int_to_ptr.vmem [resolvable:$true] %s530_s15 }
 0x140   : > { %s2495_s26 = scalar_lea.hbm %s1505_s5, 192  ;;  %s2470_s1 = scalar_lea.hbm %s4333_s10, 1536 }
 0x141   : > { %p2466_p12 = scmp.ne.s32.totalorder %s3599_s3, %s2495_s26  ;;  %p2467_p13 = pneg %p3603_p0 }
 0x142   : > { %p2471_p8 = scmp.lt.u32.totalorder %s3599_s3, %s4333_s10  ;;  %p2472_p10 = scmp.lt.u32.totalorder %s2470_s1, %s2495_s26 }
 0x143   : > { %p2468_p2 = pnand %p2467_p13, %p2466_p12  ;;  %p2474_p4 = scmp.lt.u32.totalorder %s2495_s26, %s3599_s3 }
 0x144   : > { %p2473_p7 = por %p2472_p10, %p2471_p8 }
 0x145   : > { %p2469_p3 = pneg %p2468_p2 }
 0x146   : > { %p2475_p9 = por %p2474_p4, %p2473_p7 }
 0x148   : > { %p2476_p6 = pnand %p2475_p9, %p2469_p3 }
 0x14a   : > { %2479 = shalt.err (!%p2476_p6)
}
 0x14b   : > { %s2480_s20 = scalar_lea.vmem %s531_s15, 64  ;;  %s2957_s5 = smov [#allocation7]  }
 0x14c   : > { %p2481_p11 = scmp.ne.s32.totalorder %s531_s15, %s2480_s20  ;;  %s2485_s2 = sshll.u32 %s2957_s5, 4  ;;  %s2486_s2 = int_to_ptr.vmem [resolvable:$false] %s2485_s2 }
 0x14d   : > { %s2487_s21 = scalar_lea.vmem %s2486_s2, 128  ;;  %p2488_p5 = scmp.lt.s32.totalorder %s531_s15, %s2486_s2 }
 0x14e   : > { %p2483_p12 = pnand %p2481_p11, %p2467_p13  ;;  %p2489_p1 = scmp.lt.s32.totalorder %s2487_s21, %s2480_s20 }
 0x150   : > { %p2484_p2 = pneg %p2483_p12  ;;  %p2490_p8 = por %p2489_p1, %p2488_p5 }
 0x152   : > { %p2491_p10 = pnand %p2490_p8, %p2484_p2 }
 0x154   : > { %2494 = shalt.err (!%p2491_p10)
}
 0x155   : > { %s4336_s26 = scalar_lea.sflag [#allocation6], %s3228_s6  ;;  %s4337_s11 = sld [smem:[#allocation48_spill]] }
 0x156   : > { %s4338_s1 = sld [smem:[#allocation47_spill]]  ;;  %s4339_s29 = sld [smem:[#allocation41_spill]] }
 0x157   : > { %1982 = dma.hbm_to_vmem [thread:$0]  (!%p3603_p0), %s3599_s3, 64, %s531_s15, %s4336_s26  }
 0x158   : > { %s201_s13 = sor.u32 %s3286_s25, %s3221_s30  ;;  %p4341_p3 = scmp.eq.s32.totalorder %s4263_s16, 0 }
 0x159   : > { %p202_p1 = scmp.eq.s32.totalorder %s201_s13, 0  ;;  %p4342_p4 = scmp.eq.s32.totalorder %s3185_s18, 0 }
 0x15a   : > { %s4344_s23 = sld [smem:[#allocation74_spill]]  ;;  %p4345_p0 = scmp.lt.s32.totalorder %s4263_s16, 8 }
 0x15b   : > { %s204_s20 = sadd.s32 1, %s4337_s11  ;;  %s562_s12 = sand.u32 1, %s4337_s11  }
 0x15c   : > { %p211_p5 = scmp.ne.s32.totalorder %s4337_s11, %s4338_s1  ;;  %p217_p13 = scmp.ne.s32.totalorder %s4338_s1, %s4339_s29 }
 0x15d   : > { %s4465_s11 = smov (!%p202_p1, %s4337_s11), %s204_s20  ;;  %s1792_s2 = sshll.u32 %s562_s12, 2 }
 0x15e   : > { %4340 = sst [smem:[#allocation41_spill]] %s4465_s11  ;;  %p213_p7 = por %p211_p5, %p4341_p3 }
 0x15f   : > { %p3644_p9 = por %p217_p13, %p4342_p4  ;;  %s564_s25 = scalar_lea.vmem [#allocation10], %s1792_s2 }
 0x160   : > { %s1525_s3 = scalar_lea.hbm %s4344_s23, %s3234_s0  ;;  %s577_s15 = sshll.u32 %s564_s25, 4  ;;  %s578_s15 = int_to_ptr.vmem [resolvable:$true] %s577_s15 }
 0x161   : > { %s4343_s5 = scalar_select %p3644_p9, 1, 0 }
 0x162   : > { %s3652_s30 = scalar_lea.hbm %s1525_s3, 448  ;;  %p3656_p6 = pnand %p4345_p0, %p213_p7 }
 0x163   : > { %s2526_s1 = scalar_lea.hbm %s1525_s3, 512  ;;  %s2501_s13 = scalar_lea.hbm %s4344_s23, 1536 }
 0x164   : > { %p2497_p11 = scmp.ne.s32.totalorder %s3652_s30, %s2526_s1  ;;  %p2498_p12 = pneg %p3656_p6 }
 0x165   : > { %p2502_p10 = scmp.lt.u32.totalorder %s3652_s30, %s4344_s23  ;;  %p2503_p1 = scmp.lt.u32.totalorder %s2501_s13, %s2526_s1 }
 0x166   : > { %p2499_p2 = pnand %p2498_p12, %p2497_p11  ;;  %p2505_p13 = scmp.lt.u32.totalorder %s2526_s1, %s3652_s30 }
 0x167   : > { %p2504_p5 = por %p2503_p1, %p2502_p10 }
 0x168   : > { %p2500_p8 = pneg %p2499_p2 }
 0x169   : > { %p2506_p3 = por %p2505_p13, %p2504_p5 }
 0x16b   : > { %p2507_p7 = pnand %p2506_p3, %p2500_p8 }
 0x16d   : > { %2510 = shalt.err (!%p2507_p7)
}
 0x16e   : > { %s2511_s2 = scalar_lea.vmem %s578_s15, 64  ;;  %s2958_s21 = smov [#allocation10]  }
 0x16f   : > { %p2512_p4 = scmp.ne.s32.totalorder %s578_s15, %s2511_s2  ;;  %s2516_s3 = sshll.u32 %s2958_s21, 4  ;;  %s2517_s3 = int_to_ptr.vmem [resolvable:$false] %s2516_s3 }
 0x170   : > { %s2518_s25 = scalar_lea.vmem %s2517_s3, 128  ;;  %p2519_p2 = scmp.lt.s32.totalorder %s578_s15, %s2517_s3 }
 0x171   : > { %p2514_p0 = pnand %p2512_p4, %p2498_p12  ;;  %p2520_p9 = scmp.lt.s32.totalorder %s2518_s25, %s2511_s2 }
 0x173   : > { %p2515_p11 = pneg %p2514_p0  ;;  %p2521_p1 = por %p2520_p9, %p2519_p2 }
 0x175   : > { %p2522_p10 = pnand %p2521_p1, %p2515_p11 }
 0x177   : > { %2525 = shalt.err (!%p2522_p10)
}
 0x178   : > { %s4347_s1 = scalar_lea.sflag [#allocation9], %s3228_s6  ;;  %s4348_s10 = sld [smem:[#allocation45_spill]] }
 0x179   : > { %s4349_s29 = sld [smem:[#allocation44_spill]]  ;;  %s4350_s13 = sld [smem:[#allocation39_spill]] }
 0x17a   : > { %1988 = dma.hbm_to_vmem [thread:$0]  (!%p3656_p6), %s3652_s30, 64, %s578_s15, %s4347_s1  }
 0x17b   : > { %s267_s20 = sor.u32 %s3414_s17, %s3282_s24  ;;  %p4352_p5 = scmp.eq.s32.totalorder %s4263_s16, 0 }
 0x17c   : > { %p268_p9 = scmp.eq.s32.totalorder %s267_s20, 0  ;;  %p4353_p3 = scmp.eq.s32.totalorder %s3185_s18, 0 }
 0x17d   : > { %s4355_s23 = sld [smem:[#allocation76_spill]]  ;;  %p4356_p6 = scmp.lt.s32.totalorder %s4263_s16, 8 }
 0x17e   : > { %s270_s12 = sadd.s32 1, %s4348_s10  ;;  %s610_s26 = sand.u32 1, %s4348_s10  }
 0x17f   : > { %p277_p12 = scmp.ne.s32.totalorder %s4348_s10, %s4349_s29  ;;  %p283_p8 = scmp.ne.s32.totalorder %s4349_s29, %s4350_s13 }
 0x180   : > { %s4467_s10 = smov (!%p268_p9, %s4348_s10), %s270_s12  ;;  %s1796_s21 = sshll.u32 %s610_s26, 2 }
 0x181   : > { %4351 = sst [smem:[#allocation39_spill]] %s4467_s10  ;;  %p279_p13 = por %p277_p12, %p4352_p5 }
 0x182   : > { %p3697_p7 = por %p283_p8, %p4353_p3  ;;  %s612_s15 = scalar_lea.vmem [#allocation13], %s1796_s21 }
 0x183   : > { %s1545_s30 = scalar_lea.hbm %s4355_s23, %s3234_s0  ;;  %s624_s1 = sshll.u32 %s612_s15, 4  ;;  %s625_s1 = int_to_ptr.vmem [resolvable:$true] %s624_s1 }
 0x184   : > { %s4354_s2 = scalar_select %p3697_p7, 1, 0 }
 0x185   : > { %s3705_s24 = scalar_lea.hbm %s1545_s30, 768  ;;  %p3709_p4 = pnand %p4356_p6, %p279_p13 }
 0x186   : > { %s2557_s13 = scalar_lea.hbm %s1545_s30, 832  ;;  %s2532_s26 = scalar_lea.hbm %s4355_s23, 1536 }
 0x187   : > { %p2528_p0 = scmp.ne.s32.totalorder %s3705_s24, %s2557_s13  ;;  %p2529_p11 = pneg %p3709_p4 }
 0x188   : > { %p2533_p10 = scmp.lt.u32.totalorder %s3705_s24, %s4355_s23  ;;  %p2534_p9 = scmp.lt.u32.totalorder %s2532_s26, %s2557_s13 }
 0x189   : > { %p2530_p2 = pnand %p2529_p11, %p2528_p0  ;;  %p2536_p8 = scmp.lt.u32.totalorder %s2557_s13, %s3705_s24 }
 0x18a   : > { %p2535_p12 = por %p2534_p9, %p2533_p10 }
 0x18b   : > { %p2531_p1 = pneg %p2530_p2 }
 0x18c   : > { %p2537_p5 = por %p2536_p8, %p2535_p12 }
 0x18e   : > { %p2538_p13 = pnand %p2537_p5, %p2531_p1 }
 0x190   : > { %2541 = shalt.err (!%p2538_p13)
}
 0x191   : > { %s2542_s25 = scalar_lea.vmem %s625_s1, 64  ;;  %s2959_s30 = smov [#allocation13]  }
 0x192   : > { %p2543_p3 = scmp.ne.s32.totalorder %s625_s1, %s2542_s25  ;;  %s2547_s15 = sshll.u32 %s2959_s30, 4  ;;  %s2548_s15 = int_to_ptr.vmem [resolvable:$false] %s2547_s15 }
 0x193   : > { %s2549_s20 = scalar_lea.vmem %s2548_s15, 128  ;;  %p2550_p2 = scmp.lt.s32.totalorder %s625_s1, %s2548_s15 }
 0x194   : > { %p2545_p6 = pnand %p2543_p3, %p2529_p11  ;;  %p2551_p7 = scmp.lt.s32.totalorder %s2549_s20, %s2542_s25 }
 0x196   : > { %p2546_p0 = pneg %p2545_p6  ;;  %p2552_p9 = por %p2551_p7, %p2550_p2 }
 0x198   : > { %p2553_p10 = pnand %p2552_p9, %p2546_p0 }
 0x19a   : > { %2556 = shalt.err (!%p2553_p10)
}
 0x19b   : > { %s4358_s13 = scalar_lea.sflag [#allocation12], %s3228_s6  ;;  %s4359_s12 = sld [smem:[#allocation36_spill]] }
 0x19c   : > { %s4360_s26 = sld [smem:[#allocation35_spill]]  ;;  %s4361_s21 = sld [smem:[#allocation34_spill]] }
 0x19d   : > { %1994 = dma.hbm_to_vmem [thread:$0]  (!%p3709_p4), %s3705_s24, 64, %s625_s1, %s4358_s13  }
 0x19e   : > { %s335_s3 = sor.u32 %s3414_s17, %s3350_s9  ;;  %p4362_p12 = scmp.eq.s32.totalorder %s4263_s16, 0 }
 0x19f   : > { %p336_p7 = scmp.eq.s32.totalorder %s335_s3, 0  ;;  %p4363_p5 = scmp.eq.s32.totalorder %s3185_s18, 0 }
 0x1a0   : > { %s4365_s11 = sld [smem:[#allocation78_spill]]  ;;  %p4367_p4 = scmp.lt.s32.totalorder %s4263_s16, 8 }
 0x1a1   : > { %s338_s25 = sadd.s32 1, %s4359_s12  ;;  %s657_s29 = sand.u32 1, %s4359_s12  }
 0x1a2   : > { %p345_p11 = scmp.ne.s32.totalorder %s4359_s12, %s4360_s26  ;;  %p351_p1 = scmp.ne.s32.totalorder %s4360_s26, %s4361_s21 }
 0x1a3   : > { %s4469_s12 = smov (!%p336_p7, %s4359_s12), %s338_s25  ;;  %s1800_s15 = sshll.u32 %s657_s29, 2 }
 0x1a4   : > { %p347_p8 = por %p345_p11, %p4362_p12  ;;  %p3750_p13 = por %p351_p1, %p4363_p5 }
 0x1a5   : > { %s659_s17 = scalar_lea.vmem [#allocation16], %s1800_s15 }
 0x1a6   : > { %s4364_s30 = scalar_select %p3750_p13, 1, 0 }
 0x1a7   : > { %s4366_s10 = smov %s4365_s11  ;;  %s1565_s24 = scalar_lea.hbm %s4365_s11, %s3234_s0 }
 0x1a8   : > { %s3758_s9 = scalar_lea.hbm %s1565_s24, 896  ;;  %s672_s1 = sshll.u32 %s659_s17, 4  ;;  %s673_s1 = int_to_ptr.vmem [resolvable:$true] %s672_s1 }
 0x1a9   : > { %p3762_p3 = pnand %p4367_p4, %p347_p8  ;;  %s2588_s26 = scalar_lea.hbm %s1565_s24, 960 }
 0x1aa   : > { %p2559_p6 = scmp.ne.s32.totalorder %s3758_s9, %s2588_s26  ;;  %s2563_s11 = scalar_lea.hbm %s4366_s10, 1536 }
 0x1ab   : > { %p2560_p0 = pneg %p3762_p3  ;;  %p2564_p10 = scmp.lt.u32.totalorder %s3758_s9, %s4366_s10 }
 0x1ac   : > { %p2565_p7 = scmp.lt.u32.totalorder %s2563_s11, %s2588_s26  ;;  %p2567_p1 = scmp.lt.u32.totalorder %s2588_s26, %s3758_s9 }
 0x1ad   : > { %p2561_p2 = pnand %p2560_p0, %p2559_p6 }
 0x1ae   : > { %p2566_p11 = por %p2565_p7, %p2564_p10 }
 0x1af   : > { %p2562_p9 = pneg %p2561_p2 }
 0x1b0   : > { %p2568_p12 = por %p2567_p1, %p2566_p11 }
 0x1b2   : > { %p2569_p8 = pnand %p2568_p12, %p2562_p9 }
 0x1b4   : > { %2572 = shalt.err (!%p2569_p8)
}
 0x1b5   : > { %s2573_s25 = scalar_lea.vmem %s673_s1, 64  ;;  %s2960_s29 = smov [#allocation16]  }
 0x1b6   : > { %p2574_p5 = scmp.ne.s32.totalorder %s673_s1, %s2573_s25  ;;  %s2578_s15 = sshll.u32 %s2960_s29, 4  ;;  %s2579_s15 = int_to_ptr.vmem [resolvable:$false] %s2578_s15 }
 0x1b7   : > { %s2580_s20 = scalar_lea.vmem %s2579_s15, 128  ;;  %p2581_p2 = scmp.lt.s32.totalorder %s673_s1, %s2579_s15 }
 0x1b8   : > { %p2576_p4 = pnand %p2574_p5, %p2560_p0  ;;  %p2582_p13 = scmp.lt.s32.totalorder %s2580_s20, %s2573_s25 }
 0x1ba   : > { %p2577_p6 = pneg %p2576_p4  ;;  %p2583_p7 = por %p2582_p13, %p2581_p2 }
 0x1bc   : > { %p2584_p10 = pnand %p2583_p7, %p2577_p6 }
 0x1be   : > { %2587 = shalt.err (!%p2584_p10)
}
 0x1bf   : > { %s4369_s24 = scalar_lea.sflag [#allocation15], %s3228_s6  ;;  %p4370_p9 = scmp.ne.s32.totalorder %s4304_s19, 0 }
 0x1c0   : > { %2000 = dma.hbm_to_vmem [thread:$0]  (!%p3762_p3), %s3758_s9, 64, %s673_s1, %s4369_s24  }
 0x1c1   : > { %681 = sbr.rel (%p4370_p9) target bundleno = 842 (0x34a), region = 60  ;;  %s4371_s17 = sld [smem:[#allocation54_spill]] (!%p4370_p9) }
 0x1c2   : > { %p4372_p13 = scmp.ne.s32.totalorder (!%p4370_p9), %s4316_s28, 0 }
 0x1c7   : > { %s3791_s26 = sand.u32 (!%p4370_p9), 1, %s4371_s17  }
 0x1c8   : > { %s4187_s0 = sshll.u32 %s3791_s26, 2  ;;  %s684_s23 = scalar_lea.sflag [#allocation3], %s3791_s26 }
 0x1c9   : > { %s3797_s11 = scalar_lea.vmem [#allocation2], %s4187_s0 }
 0x1ca   : > { %2774 = dma.done.wait (%p4372_p13), %s684_s23, 64  }
 0x1cb   : > { %2776 = vsyncadd (%p4372_p13), %s684_s23, 4294967232  ;;  %s4373_s6 = sld [smem:[#allocation51_spill]]  ;;  %s4374_s19 = sld [smem:[#allocation65_spill]] }
 0x1cc   : > { %s3804_s9 = sand.u32 1, %s3185_s18  }
 0x1cd   : > { %s693_s21 = scalar_lea.sflag [#allocation6], %s3804_s9 }
 0x1d1   : > { %s694_s1 = sand.u32 1, %s4373_s6   ;;  %p4375_p3 = scmp.ne.s32.totalorder %s4374_s19, 0 }
 0x1d2   : > { %s3807_s13 = sshll.u32 %s694_s1, 2 }
 0x1d3   : > { %s696_s3 = scalar_lea.vmem [#allocation5], %s3807_s13 }
 0x1d4   : > { %2778 = dma.done.wait (%p4375_p3), %s693_s21, 64  }
 0x1d5   : > { %2780 = vsyncadd (%p4375_p3), %s693_s21, 4294967232  ;;  %s4376_s25 = sld [smem:[#allocation49_spill]]  ;;  %p4377_p0 = scmp.ne.s32.totalorder %s4332_s7, 0 }
 0x1db   : > { %s703_s28 = sand.u32 1, %s4376_s25  }
 0x1dc   : > { %s3816_s29 = sshll.u32 %s703_s28, 2 }
 0x1dd   : > { %s705_s15 = scalar_lea.vmem [#allocation7], %s3816_s29 }
 0x1de   : > { %2782 = dma.done.wait (%p4377_p0), %s693_s21, 64  }
 0x1df   : > { %2784 = vsyncadd (%p4377_p0), %s693_s21, 4294967232  ;;  %s712_s20 = sand.u32 1, %s2887_s14   ;;  %s711_s17 = scalar_lea.sflag [#allocation9], %s3804_s9 }
 0x1e0   : > { %s3824_s24 = sshll.u32 %s712_s20, 2  ;;  %p4378_p11 = scmp.ne.s32.totalorder %s4281_s22, 0 }
 0x1e2   : > { %2786 = dma.done.wait (%p4378_p11), %s711_s17, 64  }
 0x1e3   : > { %2788 = vsyncadd (%p4378_p11), %s711_s17, 4294967232  ;;  %s4379_s6 = sld [smem:[#allocation47_spill]]  ;;  %p4380_p1 = scmp.ne.s32.totalorder %s4343_s5, 0 }
 0x1e9   : > { %s721_s19 = sand.u32 1, %s4379_s6  }
 0x1ea   : > { %s3833_s1 = sshll.u32 %s721_s19, 2 }
 0x1eb   : > { %s723_s7 = scalar_lea.vmem [#allocation10], %s3833_s1 }
 0x1ec   : > { %2790 = dma.done.wait (%p4380_p1), %s711_s17, 64  }
 0x1ed   : > { %2792 = vsyncadd (%p4380_p1), %s711_s17, 4294967232  ;;  %s730_s21 = sand.u32 1, %s2863_s27   ;;  %s729_s22 = scalar_lea.sflag [#allocation12], %s3804_s9 }
 0x1ee   : > { %s3841_s25 = sshll.u32 %s730_s21, 2  ;;  %p4381_p12 = scmp.ne.s32.totalorder %s4289_s8, 0 }
 0x1ef   : > { %s732_s28 = scalar_lea.vmem [#allocation11], %s3841_s25 }
 0x1f0   : > { %2794 = dma.done.wait (%p4381_p12), %s729_s22, 64  }
 0x1f1   : > { %2796 = vsyncadd (%p4381_p12), %s729_s22, 4294967232  ;;  %s4382_s20 = sld [smem:[#allocation44_spill]]  ;;  %p4383_p8 = scmp.ne.s32.totalorder %s4354_s2, 0 }
 0x1f7   : > { %s739_s6 = sand.u32 1, %s4382_s20  }
 0x1f8   : > { %s3850_s19 = sshll.u32 %s739_s6, 2 }
 0x1f9   : > { %2798 = dma.done.wait (%p4383_p8), %s729_s22, 64  }
 0x1fa   : > { %2800 = vsyncadd (%p4383_p8), %s729_s22, 4294967232  ;;  %s4384_s17 = sld [smem:[#allocation38_spill]]  ;;  %s747_s8 = scalar_lea.sflag [#allocation15], %s3804_s9 }
 0x1fb   : > { %p4385_p5 = scmp.ne.s32.totalorder %s4300_s4, 0 }
 0x200   : > { %s748_s21 = sand.u32 1, %s4384_s17  }
 0x201   : > { %s3858_s0 = sshll.u32 %s748_s21, 2 }
 0x202   : > { %s750_s23 = scalar_lea.vmem [#allocation14], %s3858_s0 }
 0x203   : > { %2802 = dma.done.wait (%p4385_p5), %s747_s8, 64  }
 0x204   : > { %2804 = vsyncadd (%p4385_p5), %s747_s8, 4294967232  ;;  %s4386_s20 = sld [smem:[#allocation35_spill]]  ;;  %p4387_p4 = scmp.ne.s32.totalorder %s4364_s30, 0 }
 0x20a   : > { %s757_s6 = sand.u32 1, %s4386_s20  }
 0x20b   : > { %s3867_s5 = sshll.u32 %s757_s6, 2 }
 0x20c   : > { %s759_s2 = scalar_lea.vmem [#allocation16], %s3867_s5 }
 0x20d   : > { %2806 = dma.done.wait (%p4387_p4), %s747_s8, 64  }
 0x20e   : > { %2808 = vsyncadd (%p4387_p4), %s747_s8, 4294967232  ;;  %p4388_p6 = scmp.eq.s32.totalorder %s3185_s18, 0 }
 0x210   : > { %2810 = dma.done.wait (%p4388_p6), [#allocation18], 1152   ;;  %p4389_p2 = pmov %p4388_p6 }
 0x211   : > { %vm876_vm0 = vcmask 1043456   ;;  %v2961_v0 = vmov 0.0   ;;  %vm2962_vm1 = vmmov 0   ;;  %vm877_vm2 = vcmask 1044480   ;;  %v2274_v4 = vld [vmem:[#allocation17 + $0x8] sm:$0x1f]  }
 0x212   : > { %2812 = vsyncadd (%p4389_p2), [#allocation18], 4294966144  ;;  %1859 = vmatprep.subr.bf16.mxu1 %v2961_v0  ;;  %1883 = vmatprep.subr.bf16.mxu0 %v2961_v0  ;;  %v2963_v1 = vmov 65535   ;;  %v2275_v5 = vld [vmem:[#allocation17 + $0x20] sm:$0x1f]   ;;  %vm872_vm3 = vcmask 72704  }
 0x213   : > { %1861 = vmatprep.mubr.msk.bf16.mxu1 %vm2962_vm1, %v2961_v0  ;;  %1885 = vmatprep.mubr.msk.bf16.mxu0 %vm2962_vm1, %v2961_v0  ;;  %v878_v2 = vsel %vm876_vm0, 4294967295, %v2963_v1  ;;  %v2276_v8 = vld [vmem:[#allocation17 + $0x28] sm:$0x1f]   ;;  %v863_v9 = vld [vmem:[%s696_s3] sm:$0xf]  ;;  %s4390_s4 = scalar_lea.vmem [#allocation13], %s3850_s19 }
 0x214   : > { %v879_v3 = vsel %vm877_vm2, %v878_v2, 0  ;;  %v2277_v10 = vld [vmem:[#allocation17] sm:$0x1f]   ;;  %v1086_v11 = vld [vmem:[%s723_s7] sm:$0xf]  ;;  %s4391_s18 = sld [smem:[#allocation56_spill]] }
 0x215   : > { %v881_v6 = vand.u32 %v2274_v4, %v879_v3  ;;  %v1099_v7 = vand.u32 %v2275_v5, %v879_v3  ;;  %v1155_v12 = vand.u32 %v2276_v8, %v879_v3  ;;  %v932_v13 = vand.u32 %v2277_v10, %v879_v3  ;;  %v2279_v14 = vld [vmem:[#allocation17 + $0x10] sm:$0x1f]   ;;  %v860_v16 = vld [vmem:[%s3797_s11] sm:$0xf]  ;;  %v1142_v18 = vld [vmem:[%s732_s28] sm:$0xf] }
 0x216   : > { %v2278_v15 = vld [vmem:[#allocation17 + $0x30] sm:$0x1f]   ;;  %v987_v17 = vand.u32 %v2279_v14, %v879_v3  ;;  %v2281_v20 = vld [vmem:[#allocation17 + $0x18] sm:$0x1f]   ;;  %v974_v22 = vld [vmem:[%s705_s15] sm:$0xf] }
 0x217   : > { %1860 = vmatpush3.bf16.msra.mxu1 %v881_v6  ;;  %1884 = vmatpush3.bf16.msra.mxu0 %v1099_v7  ;;  %v1211_v19 = vand.u32 %v2278_v15, %v879_v3  ;;  %v2280_v21 = vld [vmem:[#allocation17 + $0x38] sm:$0x1f]   ;;  %v1043_v23 = vand.u32 %v2281_v20, %v879_v3  ;;  %v1198_v24 = vld [vmem:[%s4390_s4] sm:$0xf]  ;;  %s4392_s30 = sld [smem:[#allocation57_spill]]  ;;  %s4393_s11 = scalar_lea.vmem [#allocation8], %s3824_s24 }
 0x218   : > { %1865 = vmatprep.subr.bf16.mxu1 %v2961_v0  ;;  %1889 = vmatprep.subr.bf16.mxu0 %v2961_v0  ;;  %v1267_v25 = vand.u32 %v2280_v21, %v879_v3  ;;  %v2282_v26 = vld [vmem:[#allocation17 + $0x40] sm:$0x1f]   ;;  %v1030_v27 = vld [vmem:[%s4393_s11] sm:$0xf]  ;;  %v1310_v30 = vld [vmem:[%s759_s2] sm:$0xf] }
 0x219   : > { %v1254_v28 = vld [vmem:[%s750_s23] sm:$0xf]  ;;  %v1323_v29 = vand.u32 %v2282_v26, %v879_v3  ;;  %vm1369_vm4 = vcmask 523264   ;;  %s4394_s3 = sshll.u32 %s3791_s26, 2  ;;  %s4395_s24 = sld [smem:[#allocation61_spill]]  ;;  %vm1367_vm5 = vcmask 519168  }
 0x21a   : > { %1862 = vmatmul.mubr.msk.bf16.vlgmr.msra.gmra.mrb[0].mxu1 %vm872_vm3, %v863_v9  ;;  %1886 = vmatmul.mubr.msk.bf16.vlgmr.msra.gmra.mrb[0].mxu0 %vm872_vm3, %v1086_v11  ;;  %s1835_s0 = sshll.u32 %s4391_s18, 2  ;;  %s839_s29 = scalar_lea.vmem [#allocation19], %s4394_s3 }
 0x21b   : > { %1866 = vmatpush3.bf16.msra.mxu1 %v932_v13  ;;  %1890 = vmatpush3.bf16.msra.mxu0 %v1155_v12  ;;  %s1412_s15 = sshll.u32 %s839_s29, 4  ;;  %s4396_s7 = sld [smem:[#allocation80_spill]]  ;;  %s3943_s15 = int_to_ptr.vmem [resolvable:$true] %s1412_s15 }
 0x21c   : > { %1867 = vmatprep.mubr.msk.bf16.mxu1 %vm2962_vm1, %v2961_v0  ;;  %1891 = vmatprep.mubr.msk.bf16.mxu0 %vm2962_vm1, %v2961_v0  ;;  %s1390_s22 = scalar_lea.sflag [#allocation4], %s3791_s26  ;;  %s2589_s28 = scalar_lea.vmem %s3943_s15, 64 }
 0x21d   : > { %1895 = vmatprep.subr.bf16.mxu0 %v2961_v0  ;;  %1871 = vmatprep.subr.bf16.mxu1 %v2961_v0  ;;  %s3933_s9 = sadd.s32 %s4392_s30, %s1835_s0  ;;  %p2590_p7 = scmp.ne.s32.totalorder %s3943_s15, %s2589_s28 }
 0x21e   : > { %s1836_s13 = sshll.u32 %s3933_s9, 6  ;;  %s2964_s19 = smov [#allocation19]  }
 0x21f   : > { %p4397_p10 = scmp.ne.s32.totalorder %s4395_s24, 0  ;;  %s2593_s5 = sshll.u32 %s2964_s19, 4  ;;  %s2594_s5 = int_to_ptr.vmem [resolvable:$false] %s2593_s5 }
 0x220   : > { %s2595_s17 = scalar_lea.vmem %s2594_s5, 128  ;;  %p2596_p3 = scmp.lt.s32.totalorder %s3943_s15, %s2594_s5 }
 0x221   : > { %s3941_s25 = scalar_lea.hbm %s4396_s7, %s1836_s13  ;;  %p2591_p9 = pnand %p2590_p7, %p4397_p10 }
 0x222   : > { %p2597_p0 = scmp.lt.s32.totalorder %s2595_s17, %s2589_s28 }
 0x223   : > { %p2592_p13 = pneg %p2591_p9 }
 0x224   : > { %p2598_p11 = por %p2597_p0, %p2596_p3 }
 0x226   : > { %1868 = vmatmul.mubr.msk.bf16.vlgmr.msra.gmra.mrb[0].mxu1 %vm872_vm3, %v860_v16  ;;  %1892 = vmatmul.mubr.msk.bf16.vlgmr.msra.gmra.mrb[0].mxu0 %vm872_vm3, %v1142_v18  ;;  %p2599_p1 = pnand %p2598_p11, %p2592_p13 }
 0x227   : > { %1872 = vmatpush3.bf16.msra.mxu1 %v987_v17  ;;  %1896 = vmatpush3.bf16.msra.mxu0 %v1211_v19 }
 0x228   : > { %1873 = vmatprep.mubr.msk.bf16.mxu1 %vm2962_vm1, %v2961_v0  ;;  %1897 = vmatprep.mubr.msk.bf16.mxu0 %vm2962_vm1, %v2961_v0 }
 0x229   : > { %1901 = vmatprep.subr.bf16.mxu0 %v2961_v0  ;;  %1877 = vmatprep.subr.bf16.mxu1 %v2961_v0 }
 0x232   : > { %1874 = vmatmul.mubr.msk.bf16.vlgmr.msra.gmra.mrb[0].mxu1 %vm872_vm3, %v974_v22  ;;  %1898 = vmatmul.mubr.msk.bf16.vlgmr.msra.gmra.mrb[0].mxu0 %vm872_vm3, %v1198_v24 }
 0x233   : > { %1878 = vmatpush3.bf16.msra.mxu1 %v1043_v23  ;;  %1902 = vmatpush3.bf16.msra.mxu0 %v1267_v25 }
 0x234   : > { %1879 = vmatprep.mubr.msk.bf16.mxu1 %vm2962_vm1, %v2961_v0  ;;  %1903 = vmatprep.mubr.msk.bf16.mxu0 %vm2962_vm1, %v2961_v0 }
 0x235   : > { %1907 = vmatprep.subr.bf16.mxu0 %v2961_v0 }
 0x23e   : > { %1880 = vmatmul.mubr.msk.bf16.vlgmr.msra.gmra.mrb[0].mxu1 %vm872_vm3, %v1030_v27  ;;  %1904 = vmatmul.mubr.msk.bf16.vlgmr.msra.gmra.mrb[0].mxu0 %vm872_vm3, %v1254_v28 }
 0x23f   : > { %1908 = vmatpush3.bf16.msra.mxu0 %v1323_v29  ;;  %1909 = vmatprep.mubr.msk.bf16.mxu0 %vm2962_vm1, %v2961_v0 }
 0x24a   : > { %1910 = vmatmul.mubr.msk.bf16.vlgmr.msra.gmra.mrb[0].mxu0 %vm872_vm3, %v1310_v30 }
 0x311   : > { %v1079_v31 = vpop.f32.mrb[0].mxu1 }
 0x312   : > { %v1881_v32 = vpop.f32.mrb[1].mxu1 }
 0x313   : > { %v1082_v33 = vpop.f32.mrb[2].mxu1 }
 0x314   : > { %v1882_v34 = vpop.f32.mrb[3].mxu1 }
 0x31d   : > { %v1359_v35 = vpop.f32.mrb[0].mxu0 }
 0x31e   : > { %v1913_v36 = vadd.f32 %v1359_v35, %v1079_v31  ;;  %v1911_v37 = vpop.f32.mrb[1].mxu0 }
 0x31f   : > { %v1362_v38 = vpop.f32.mrb[2].mxu0 }
 0x320   : > { %v1366_v39 = vpack.c.bf16 %v1913_v36, %v1913_v36  ;;  %v1370_v40 = vsel %vm1369_vm4, %v1913_v36, 0.0  ;;  %v1377_v41 = vmul.f32 %v1913_v36, %v1913_v36  ;;  %v1912_v42 = vpop.f32.mrb[3].mxu0 }
 0x321   : > { %v1371_v43 = vrot.slane %v1370_v40, 4 }
 0x322   : > { %v1378_v44 = vsel %vm1369_vm4, %v1377_v41, 0.0  ;;  %1368 = vst.msk [vmem:[%s839_s29] sm:$0xf] %vm1367_vm5, %v1366_v39 }
 0x323   : > { %v1372_v45 = vadd.f32 %v1371_v43, %v1370_v40  ;;  %v1379_v46 = vrot.slane %v1378_v44, 4 }
 0x324   : > { %2602 = shalt.err (!%p2599_p1)
}
 0x325   : > { %s2603_s21 = scalar_lea.hbm %s3941_s25, 64  ;;  %s2607_s6 = scalar_lea.hbm %s4396_s7, 512 }
 0x326   : > { %p2604_p12 = scmp.ne.s32.totalorder %s3941_s25, %s2603_s21  ;;  %p2608_p4 = scmp.lt.u32.totalorder %s3941_s25, %s4396_s7 }
 0x327   : > { %p2609_p6 = scmp.lt.u32.totalorder %s2607_s6, %s2603_s21  ;;  %p2611_p7 = scmp.lt.u32.totalorder %s2603_s21, %s3941_s25 }
 0x328   : > { %p2605_p8 = pnand %p2604_p12, %p4397_p10 }
 0x329   : > { %p2610_p2 = por %p2609_p6, %p2608_p4 }
 0x32a   : > { %p2606_p5 = pneg %p2605_p8 }
 0x32b   : > { %p2612_p9 = por %p2611_p7, %p2610_p2 }
 0x32d   : > { %p2613_p13 = pnand %p2612_p9, %p2606_p5 }
 0x32f   : > { %2616 = shalt.err (!%p2613_p13)
}
 0x330   : > { %1965 = dma.vmem_to_hbm [thread:$0]  (%p4397_p10), %s3943_s15, 64, %s3941_s25, %s1390_s22   ;;  %v1373_v47 = vrot.slane %v1372_v45, 2  ;;  %v1380_v48 = vadd.f32 %v1379_v46, %v1378_v44  ;;  %vm1385_vm6 = vcmask 1040384   ;;  %vm1387_vm7 = vcmask 517120  }
 0x331   : > { %s1814_s18 = sshll.u32 %s3791_s26, 1  ;;  %s1838_s30 = sshll.u32 %s3933_s9, 5 }
 0x332   : > { %v1374_v49 = vadd.f32 %v1373_v47, %v1372_v45  ;;  %v1381_v50 = vrot.slane %v1380_v48, 2  ;;  %s846_s11 = scalar_lea.vmem [#allocation20], %s1814_s18  ;;  %s4398_s29 = sld [smem:[#allocation81_spill]] }
 0x333   : > { %s1429_s0 = sshll.u32 %s846_s11, 4  ;;  %s1395_s1 = scalar_lea.sflag [#allocation21], %s3791_s26  ;;  %s3974_s0 = int_to_ptr.vmem [resolvable:$true] %s1429_s0 }
 0x334   : > { %v1375_v51 = vrot.slane %v1374_v49, 1  ;;  %v1382_v52 = vadd.f32 %v1381_v50, %v1380_v48  ;;  %s2617_s9 = scalar_lea.vmem %s3974_s0, 32  ;;  %s2965_s25 = smov [#allocation20]  }
 0x335   : > { %p2618_p3 = scmp.ne.s32.totalorder %s3974_s0, %s2617_s9  ;;  %s2621_s22 = sshll.u32 %s2965_s25, 4  ;;  %s2622_s22 = int_to_ptr.vmem [resolvable:$false] %s2621_s22 }
 0x336   : > { %v1383_v53 = vrot.slane %v1382_v52, 1  ;;  %v1376_v54 = vadd.f32 %v1375_v51, %v1374_v49  ;;  %s2623_s28 = scalar_lea.vmem %s2622_s22, 64  ;;  %p2624_p1 = scmp.lt.s32.totalorder %s3974_s0, %s2622_s22 }
 0x337   : > { %p2619_p0 = pnand %p2618_p3, %p4397_p10  ;;  %p2625_p12 = scmp.lt.s32.totalorder %s2623_s28, %s2617_s9 }
 0x338   : > { %v1384_v55 = vadd.f32 %v1383_v53, %v1382_v52  ;;  %s4399_s23 = smov %s4398_s29  ;;  %s3972_s15 = scalar_lea.hbm %s4398_s29, %s1838_s30 }
 0x339   : > { %p2620_p11 = pneg %p2619_p0  ;;  %p2626_p8 = por %p2625_p12, %p2624_p1 }
 0x33a   : > { %v1386_v56 = vsel %vm1385_vm6, %v1376_v54, %v1384_v55 }
 0x33b   : > { %1388 = vst.msk [vmem:[%s846_s11] sm:$0x3] %vm1387_vm7, %v1386_v56  ;;  %p2627_p5 = pnand %p2626_p8, %p2620_p11 }
 0x33d   : > { %2630 = shalt.err (!%p2627_p5)
}
 0x33e   : > { %s2631_s26 = scalar_lea.hbm %s3972_s15, 32  ;;  %s2635_s17 = scalar_lea.hbm %s4399_s23, 256 }
 0x33f   : > { %p2632_p4 = scmp.ne.s32.totalorder %s3972_s15, %s2631_s26  ;;  %p2636_p7 = scmp.lt.u32.totalorder %s3972_s15, %s4399_s23 }
 0x340   : > { %p2637_p9 = scmp.lt.u32.totalorder %s2635_s17, %s2631_s26  ;;  %p2639_p3 = scmp.lt.u32.totalorder %s2631_s26, %s3972_s15 }
 0x341   : > { %p2633_p6 = pnand %p2632_p4, %p4397_p10 }
 0x342   : > { %p2638_p13 = por %p2637_p9, %p2636_p7 }
 0x343   : > { %p2634_p2 = pneg %p2633_p6 }
 0x344   : > { %p2640_p0 = por %p2639_p3, %p2638_p13 }
 0x346   : > { %p2641_p11 = pnand %p2640_p0, %p2634_p2 }
 0x348   : > { %2644 = shalt.err (!%p2641_p11)
}
 0x349   : > { %1966 = dma.vmem_to_hbm [thread:$0]  (%p4397_p10), %s3974_s0, 32, %s3972_s15, %s1395_s1  }
 0x34a PF: > { %s4400_s20 = sld [smem:[#allocation53_spill]]  ;;  %s4401_s6 = sld [smem:[#allocation63_spill]] }
 0x34b   : > { %p2011_p1 = scmp.ge.s32.totalorder %s4263_s16, 2 }
 0x350   : > { %s1441_s2 = sand.u32 1, %s4400_s20   ;;  %p4402_p12 = scmp.ne.s32.totalorder %s4401_s6, 0 }
 0x351   : > { %s1442_s4 = scalar_lea.sflag [#allocation4], %s1441_s2 }
 0x352   : > { %p2002_p8 = pnand %p2011_p1, %p4402_p12 }
 0x354   : > { %2814 = dma.done.wait (!%p2002_p8), %s1442_s4, 64  }
 0x355   : > { %2816 = vsyncadd (!%p2002_p8), %s1442_s4, 4294967232  ;;  %s1451_s18 = scalar_lea.sflag [#allocation21], %s1441_s2 }
 0x356   : > { %2818 = dma.done.wait (!%p2002_p8), %s1451_s18, 32  }
 0x357   : > { %2820 = vsyncadd (!%p2002_p8), %s1451_s18, 4294967264  ;;  %s4189_s7 = sadd.s32 1, %s4263_s16   ;;  %s4403_s17 = sld [smem:[#allocation35_spill]] }
 0x358   : > { %s4404_s18 = sld [smem:[#allocation36_spill]]  ;;  %s4405_s20 = sld [smem:[#allocation38_spill]] }
 0x359   : > { %s4406_s21 = sld [smem:[#allocation40_spill]]  ;;  %s4407_s22 = sld [smem:[#allocation37_spill]] }
 0x35a   : > { %s4408_s24 = sld [smem:[#allocation44_spill]]  ;;  %s4409_s30 = sld [smem:[#allocation45_spill]] }
 0x35b   : > { %s4410_s25 = sld [smem:[#allocation39_spill]]  ;;  %s4411_s11 = sld [smem:[#allocation46_spill]] }
 0x35c   : > { %s4412_s28 = sld [smem:[#allocation68_spill]]  ;;  %s4413_s29 = sld [smem:[#allocation47_spill]] }
 0x35d   : > { %s4414_s0 = sld [smem:[#allocation48_spill]]  ;;  %s4415_s13 = sld [smem:[#allocation41_spill]] }
 0x35e   : > { %p4005_p10 = scmp.ge.s32.totalorder %s4189_s7, 10   ;;  %s4418_s15 = sld [smem:[#allocation42_spill]] }
 0x35f   : > { %s4419_s1 = sld [smem:[#allocation67_spill]]  ;;  %s4420_s19 = smov %s4469_s12 }
 0x360   : > { %s4416_s3 = scalar_select %p4005_p10, 1, 0 }
 0x361   : > { %s4421_s9 = sld [smem:[#allocation49_spill]]  ;;  %s4422_s5 = sld [smem:[#allocation50_spill]] }
 0x362   : > { %4417 = sst [smem:[#allocation41_spill]] %s4416_s3  ;;  %s4423_s8 = sld [smem:[#allocation43_spill]] }
 0x363   : > { %s4424_s6 = sld [smem:[#allocation51_spill]]  ;;  %4425 = sst [smem:[#allocation34_spill]] %s4408_s24 }
 0x364   : > { %s4426_s2 = sld [smem:[#allocation52_spill]]  ;;  %4427 = sst [smem:[#allocation35_spill]] %s4409_s30 }
 0x365   : > { %s4428_s4 = sld [smem:[#allocation66_spill]]  ;;  %s4430_s7 = sld [smem:[#allocation54_spill]] }
 0x366   : > { %4429 = sst [smem:[#allocation36_spill]] %s4410_s25  ;;  %s4432_s10 = sld [smem:[#allocation55_spill]] }
 0x367   : > { %4431 = sst [smem:[#allocation37_spill]] %s2863_s27  ;;  %s4433_s27 = smov %s4411_s11 }
 0x368   : > { %s4434_s23 = sld [smem:[#allocation69_spill]]  ;;  %s4436_s16 = sld [smem:[#allocation59_spill]] }
 0x369   : > { %s4435_s3 = sld [smem:[#allocation58_spill]]  ;;  %s4437_s30 = smov %s4414_s0 }
 0x36a   : > { %s4438_s12 = sld [smem:[#allocation62_spill]]  ;;  %4439 = sst [smem:[#allocation38_spill]] %s4415_s13 }
 0x36b   : > { %s4440_s24 = sld [smem:[#allocation64_spill]]  ;;  %s4441_s13 = smov %s2887_s14 }
 0x36c   : > { %s4442_s25 = sld [smem:[#allocation60_spill]]  ;;  %s4443_s14 = smov %s4418_s15 }
 0x36d   : > { %s4445_s15 = smov %s4419_s1  ;;  %4446 = sst [smem:[#allocation39_spill]] %s4421_s9 }
 0x36e   : > { %s4447_s11 = smov %s4422_s5  ;;  %4448 = sst [smem:[#allocation40_spill]] %s4423_s8 }
 0x36f   : > { %s4449_s8 = smov %s4424_s6  ;;  %s4450_s6 = smov %s4426_s2 }
 0x370   : > { %s4451_s2 = smov %s4430_s7  ;;  %s4452_s0 = smov %s4432_s10 }
 0x371   : > { %s4453_s9 = smov %s4434_s23  ;;  %4454 = sst [smem:[#allocation41_spill]] %s4435_s3 }
 0x372   : > { %s4455_s5 = smov %s4436_s16  ;;  %s4456_s3 = smov %s4438_s12 }
 0x373   : > { %4457 = sst [smem:[#allocation42_spill]] %s4440_s24  ;;  %s4458_s1 = sadd.s32 1, %s4442_s25  }
 0x374   : > { %4459 = sst [smem:[#allocation43_spill]] %s4458_s1  ;;  %43 = sbr.rel (!%p4005_p10) target bundleno = 49 (0x31), region = 230 }
 0x37b   :  { %1456 = vsyncpa [#allocation3], 1 }
 0x37c   :  { %1458 = vsyncpa [#allocation3 + $0x1], 1 }
 0x37d   :  { %1459 = vsyncpa [#allocation6], 1 }
 0x37e   :  { %1461 = vsyncpa [#allocation6 + $0x1], 1 }
 0x37f   :  { %1462 = vsyncpa [#allocation9], 1 }
 0x380   :  { %1464 = vsyncpa [#allocation9 + $0x1], 1 }
 0x381   :  { %1465 = vsyncpa [#allocation12], 1 }
 0x382   :  { %1467 = vsyncpa [#allocation12 + $0x1], 1 }
 0x383   :  { %1468 = vsyncpa [#allocation15], 1 }
 0x384   :  { %1470 = vsyncpa [#allocation15 + $0x1], 1 }
 0x385   :  { %1471 = vsyncpa [#allocation18], 1 }
 0x386   :  { %1472 = vsyncpa [#allocation4], 1 }
 0x387   :  { %1474 = vsyncpa [#allocation4 + $0x1], 1 }
 0x388   :  { %1475 = vsyncpa [#allocation21], 1 }
 0x389   :  { %1477 = vsyncpa [#allocation21 + $0x1], 1 }

// kernel: forward.3
= control target key start
LH: loop header
LB: loop body
LE: loop exit
PB: predicated region body
PF: predicated region fallthrough
CT: control target
= control target key end

     0   :  { %8 = vsyncpa [#allocation3], 0  ;;  %s1857_s0 = inlined_call_operand.hbm [shape: bf16[512,192], index: 0, kind: input, shape index: {}]   ;;  %s1858_s1 = inlined_call_operand.hbm [shape: bf16[192,64], index: 1, kind: input, shape index: {}]   ;;  %s1859_s2 = inlined_call_operand.hbm [shape: f32[1,64], index: 2, kind: input, shape index: {}]   ;;  %s1860_s3 = inlined_call_operand.hbm [shape: bf16[512,64], index: 3, kind: output, shape index: {}]  }
   0x1   :  { %10 = vsyncpa [#allocation3 + $0x1], 0 }
   0x2   :  { %11 = vsyncpa [#allocation6], 0 }
   0x3   :  { %12 = vsyncpa [#allocation4], 0 }
   0x4   :  { %14 = vsyncpa [#allocation4 + $0x1], 0  ;;  %s1470_s12 = smov 0   ;;  %s1472_s13 = smov 0  }
   0x5   :  { %s1474_s14 = smov 0   ;;  %s1476_s15 = smov 0  }
   0x6 LB: > { %s1491_s16 = sadd.s32 4294967295, %s1437_s15   ;;  %s976_s17 = sadd.s32 4294967294, %s1437_s15   ;;  %s1437_s15 = sphi %s1476_s15, %s1880_s15   ;;  %s1433_s14 = sphi %s1474_s14, %s1879_s14   ;;  %s1429_s13 = sphi %s1472_s13, %s1878_s13   ;;  %s1425_s12 = sphi %s1470_s12, %s1877_s12  }
   0x7   : > { %p40_p0 = scmp.ne.s32.totalorder %s1429_s13, %s1425_s12  ;;  %p1861_p1 = scmp.eq.s32.totalorder %s1491_s16, 0 }
   0x8   : > { %p112_p3 = scmp.eq.s32.totalorder %s976_s17, 1  ;;  %p977_p5 = scmp.ge.s32.totalorder %s1437_s15, 1 }
   0x9   : > { %p1500_p4 = por %p1861_p1, %p40_p0  ;;  %p119_p7 = scmp.lt.s32.totalorder %s1437_s15, 3 }
   0xa   : > { %p1505_p6 = por %p112_p3, %p40_p0  ;;  %s1439_s21 = smov [#allocation5]  }
   0xb   : > { %s1864_s18 = scalar_select %p1500_p4, 1, 0 }
   0xc   : > { %s1865_s19 = scalar_select %p1505_p6, 1, 0 }
   0xd   : > { %p1510_p8 = pnand %p977_p5, %p119_p7  ;;  %s131_s22 = sshll.u32 %s1439_s21, 4  ;;  %s1514_s22 = int_to_ptr.vmem [resolvable:$true] %s131_s22 }
   0xe   : > { %s1440_s24 = smov [#allocation7]   ;;  %s1281_s28 = scalar_lea.hbm %s1858_s1, 1536 }
   0xf   : > { %p1159_p9 = pneg %p1510_p8  ;;  %s145_s25 = sshll.u32 %s1440_s24, 4  ;;  %s1525_s25 = int_to_ptr.vmem [resolvable:$true] %s145_s25 }
  0x10   : > { %p1282_p12 = scmp.ne.s32.totalorder %s1858_s1, %s1281_s28  ;;  %p1288_p5 = scmp.lt.u32.totalorder %s1281_s28, %s1858_s1 }
  0x11   : > { %p1521_p11 = pnand %p1159_p9, %p1861_p1 }
  0x13   : > { %p1283_p13 = pneg %p1521_p11 }
  0x15   : > { %p1284_p0 = pnand %p1283_p13, %p1282_p12 }
  0x17   : > { %p1285_p3 = pneg %p1284_p0 }
  0x19   : > { %p1290_p7 = pnand %p1288_p5, %p1285_p3 }
  0x1b   : > { %1293 = shalt.err (!%p1290_p7)
}
  0x1c   : > { %s1294_s6 = scalar_lea.vmem %s1514_s22, 1536  ;;  %p1302_p2 = scmp.lt.s32.totalorder %s1514_s22, %s1514_s22 }
  0x1d   : > { %p1295_p9 = scmp.ne.s32.totalorder %s1514_s22, %s1294_s6  ;;  %p1303_p12 = scmp.lt.s32.totalorder %s1294_s6, %s1294_s6 }
  0x1f   : > { %p1297_p10 = pnand %p1295_p9, %p1283_p13  ;;  %p1304_p0 = por %p1303_p12, %p1302_p2 }
  0x21   : > { %p1298_p1 = pneg %p1297_p10 }
  0x23   : > { %p1305_p6 = pnand %p1304_p0, %p1298_p1 }
  0x25   : > { %1308 = shalt.err (!%p1305_p6)
}
  0x26   : > { %s1441_s7 = smov 64   ;;  %s1442_s8 = smov 4  }
  0x27   : > { %1162 = dma.hbm_to_vmem [thread:$0]  (!%p1521_p11), %s1858_s1, 1536, %s1514_s22, [#allocation6], %s1441_s7, %s1441_s7, %s1442_s8  }
  0x28   : > { %s1309_s21 = scalar_lea.hbm %s1859_s2, 16 }
  0x29   : > { %p1310_p2 = scmp.ne.s32.totalorder %s1859_s2, %s1309_s21  ;;  %p1316_p10 = scmp.lt.u32.totalorder %s1309_s21, %s1859_s2 }
  0x2b   : > { %p1312_p1 = pnand %p1310_p2, %p1283_p13 }
  0x2d   : > { %p1313_p6 = pneg %p1312_p1 }
  0x2f   : > { %p1318_p3 = pnand %p1316_p10, %p1313_p6 }
  0x31   : > { %1321 = shalt.err (!%p1318_p3)
}
  0x32   : > { %s1322_s22 = scalar_lea.vmem %s1525_s25, 16  ;;  %s1329_s29 = scalar_lea.vmem %s1525_s25, 32 }
  0x33   : > { %p1323_p5 = scmp.ne.s32.totalorder %s1525_s25, %s1322_s22  ;;  %p1330_p12 = scmp.lt.s32.totalorder %s1525_s25, %s1525_s25 }
  0x34   : > { %p1331_p0 = scmp.lt.s32.totalorder %s1329_s29, %s1322_s22 }
  0x35   : > { %p1325_p7 = pnand %p1323_p5, %p1283_p13 }
  0x36   : > { %p1332_p2 = por %p1331_p0, %p1330_p12 }
  0x37   : > { %p1326_p9 = pneg %p1325_p7 }
  0x39   : > { %p1333_p1 = pnand %p1332_p2, %p1326_p9 }
  0x3b   : > { %1336 = shalt.err (!%p1333_p1)
}
  0x3c   : > { %1165 = dma.hbm_to_vmem [thread:$0]  (!%p1521_p11), %s1859_s2, 16, %s1525_s25, [#allocation6]  }
  0x3d   : > { %s1581_s5 = sadd.s32 1, %s1437_s15   ;;  %s27_s23 = sadd.s32 1, %s1433_s14 }
  0x3e   : > { %s24_s6 = ssub.s32 %s1437_s15, %s1581_s5  ;;  %p34_p13 = scmp.ne.s32.totalorder %s1433_s14, %s1429_s13 }
  0x3f   : > { %p25_p6 = scmp.eq.s32.totalorder %s24_s6, 0  ;;  %p35_p10 = scmp.eq.s32.totalorder %s1437_s15, 0 }
  0x40   : > { %p1868_p3 = scmp.eq.s32.totalorder %s1491_s16, 1  ;;  %p1176_p7 = scmp.lt.s32.totalorder %s1437_s15, 2 }
  0x41   : > { %s1597_s8 = scalar_select %p25_p6, %s1433_s14, %s27_s23  }
  0x42   : > { %p1591_p5 = por %p1868_p3, %p34_p13  ;;  %p36_p9 = por %p35_p10, %p34_p13 }
  0x43   : > { %s156_s9 = sand.u32 1, %s1433_s14   ;;  %s1089_s25 = sshll.u32 %s1437_s15, 12 }
  0x44   : > { %s1869_s7 = scalar_select %p1591_p5, 1, 0 }
  0x45   : > { %s981_s10 = sshll.u32 %s156_s9, 8  ;;  %s1604_s21 = scalar_lea.hbm %s1857_s0, %s1089_s25 }
  0x46   : > { %s160_s24 = scalar_lea.vmem [#allocation2], %s981_s10  ;;  %p1608_p11 = pnand %p1176_p7, %p36_p9 }
  0x47   : > { %s168_s26 = sshll.u32 %s160_s24, 4  ;;  %s1612_s28 = scalar_lea.sflag [#allocation3], %s156_s9  ;;  %s1606_s26 = int_to_ptr.vmem [resolvable:$true] %s168_s26 }
  0x48   : > { %s1337_s22 = scalar_lea.hbm %s1604_s21, 4096  ;;  %p1339_p0 = pneg %p1608_p11 }
  0x49   : > { %p1338_p12 = scmp.ne.s32.totalorder %s1604_s21, %s1337_s22  ;;  %s1342_s4 = scalar_lea.hbm %s1857_s0, 8192 }
  0x4a   : > { %p1343_p13 = scmp.lt.u32.totalorder %s1604_s21, %s1857_s0  ;;  %p1344_p6 = scmp.lt.u32.totalorder %s1342_s4, %s1337_s22 }
  0x4b   : > { %p1340_p2 = pnand %p1339_p0, %p1338_p12  ;;  %p1346_p3 = scmp.lt.u32.totalorder %s1337_s22, %s1604_s21 }
  0x4c   : > { %p1345_p10 = por %p1344_p6, %p1343_p13 }
  0x4d   : > { %p1341_p1 = pneg %p1340_p2 }
  0x4e   : > { %p1347_p7 = por %p1346_p3, %p1345_p10 }
  0x50   : > { %p1348_p9 = pnand %p1347_p7, %p1341_p1 }
  0x52   : > { %1351 = shalt.err (!%p1348_p9)
}
  0x53   : > { %s1352_s9 = scalar_lea.vmem %s1606_s26, 4096  ;;  %s1443_s10 = smov [#allocation2]  }
  0x54   : > { %p1353_p12 = scmp.ne.s32.totalorder %s1606_s26, %s1352_s9  ;;  %s1357_s25 = sshll.u32 %s1443_s10, 4  ;;  %s1358_s25 = int_to_ptr.vmem [resolvable:$false] %s1357_s25 }
  0x55   : > { %s1359_s11 = scalar_lea.vmem %s1358_s25, 8192  ;;  %p1360_p4 = scmp.lt.s32.totalorder %s1606_s26, %s1358_s25 }
  0x56   : > { %p1355_p2 = pnand %p1353_p12, %p1339_p0  ;;  %p1361_p13 = scmp.lt.s32.totalorder %s1359_s11, %s1352_s9 }
  0x58   : > { %p1356_p5 = pneg %p1355_p2  ;;  %p1362_p6 = por %p1361_p13, %p1360_p4 }
  0x5a   : > { %p1363_p10 = pnand %p1362_p6, %p1356_p5 }
  0x5c   : > { %1366 = shalt.err (!%p1363_p10)
}
  0x5d   : > { %s1444_s17 = smov 128   ;;  %s1445_s24 = smov 8  }
  0x5e   : > { %1169 = dma.hbm_to_vmem [thread:$0]  (!%p1608_p11), %s1604_s21, 4096, %s1606_s26, %s1612_s28, %s1444_s17, %s1444_s17, %s1445_s24  }
  0x5f   : > { %180 = sbr.rel (%p1510_p8) target bundleno = 444 (0x1bc), region = 32  ;;  %s1643_s22 = sand.u32 (!%p1510_p8), 1, %s1429_s13  }
  0x60   : > { %s986_s29 = sshll.u32 (!%p1510_p8), %s1643_s22, 8  ;;  %s183_s30 = scalar_lea.sflag (!%p1510_p8), [#allocation3], %s1643_s22 }
  0x61   : > { %s1647_s4 = scalar_lea.vmem (!%p1510_p8), [#allocation2], %s986_s29  ;;  %p1871_p4 = scmp.ne.s32.totalorder (!%p1510_p8), %s1864_s18, 0 }
  0x66   : > { %1412 = dma.done.wait (%p1871_p4), %s183_s30, 4096  }
  0x67   : > { %1414 = vsyncadd (%p1871_p4), %s183_s30, 4294963200  ;;  %p1872_p5 = scmp.eq.s32.totalorder %s1491_s16, 0 }
  0x69   : > { %1416 = dma.done.wait (%p1872_p5), [#allocation6], 1552   ;;  %p1873_p8 = pmov %p1872_p5 }
  0x6a   : > { %v1446_v0 = vmov 0   ;;  %v1221_v1 = vld [vmem:[#allocation5] sm:$0xff]   ;;  %v1222_v2 = vld [vmem:[#allocation5 + $0x8] sm:$0xff]   ;;  %v1223_v3 = vld [vmem:[#allocation5 + $0x10] sm:$0xff]   ;;  %vm499_vm0 = vcmask 523264   ;;  %s989_s18 = sshll.u32 %s1643_s22, 7 }
  0x6b   : > { %1418 = vsyncadd (%p1873_p8), [#allocation6], 4294965744  ;;  %548 = vmatprep.subr.bf16.mxu0 %v1446_v0  ;;  %1123 = vmatprep.subr.bf16.mxu1 %v1446_v0  ;;  %v1224_v4 = vld [vmem:[#allocation5 + $0x18] sm:$0xff]   ;;  %v1235_v5 = vld [vmem:[%s1647_s4 + $0x4] ss:$8 sps:$4 sm:$0xff]   ;;  %vm837_vm1 = vcmask 519168  }
  0x6c   : > { %549 = vmatpush1.bf16.msra.mxu0 %v1221_v1  ;;  %1135 = vmatpush1.bf16.msra.mxu1 %v1221_v1  ;;  %v1225_v6 = vld [vmem:[#allocation5 + $0x20] sm:$0xff]   ;;  %v1226_v8 = vld [vmem:[#allocation5 + $0x28] sm:$0xff]   ;;  %v1227_v9 = vld [vmem:[#allocation5 + $0x30] sm:$0xff]   ;;  %s1712_s20 = scalar_lea.vmem [#allocation8], %s989_s18  ;;  %s1122_s21 = sshll.u32 %s1491_s16, 11 }
  0x6d   : > { %550 = vmatprep.subr.bf16.mxu0 %v1446_v0  ;;  %1124 = vmatprep.subr.bf16.mxu1 %v1446_v0  ;;  %v1238_v7 = vld [vmem:[%s1647_s4 + $0x84] ss:$8 sps:$4 sm:$0xff]   ;;  %v1228_v10 = vld [vmem:[#allocation5 + $0x38] sm:$0xff]   ;;  %v1231_v13 = vld [vmem:[#allocation5 + $0x50] sm:$0xff]   ;;  %s884_s26 = sshll.u32 %s1712_s20, 4  ;;  %s1803_s23 = scalar_lea.hbm %s1860_s3, %s1122_s21  ;;  %s1805_s26 = int_to_ptr.vmem [resolvable:$true] %s884_s26 }
  0x6e   : > { %1035 = vmatprep.mubr.msk.bf16.mxu0 %vm499_vm0, %v1235_v5  ;;  %1043 = vmatprep.mubr.msk.bf16.mxu1 %vm499_vm0, %v1238_v7  ;;  %v1229_v11 = vld [vmem:[#allocation5 + $0x40] sm:$0xff]   ;;  %v1230_v12 = vld [vmem:[#allocation5 + $0x48] sm:$0xff]   ;;  %v1232_v14 = vld [vmem:[#allocation5 + $0x58] sm:$0xff]   ;;  %s871_s16 = scalar_lea.sflag [#allocation4], %s1643_s22  ;;  %s1367_s6 = scalar_lea.vmem %s1805_s26, 2048 }
  0x6f   : > { %v1233_v15 = vld [vmem:[%s1647_s4] ss:$8 sps:$4 sm:$0xff]   ;;  %v1239_v17 = vld [vmem:[%s1647_s4 + $0x14] ss:$8 sps:$4 sm:$0xff]   ;;  %v1243_v19 = vld [vmem:[%s1647_s4 + $0x10] ss:$8 sps:$4 sm:$0xff]   ;;  %p1368_p11 = scmp.ne.s32.totalorder %s1805_s26, %s1367_s6 }
  0x70   : > { %551 = vmatpush1.bf16.msra.mxu0 %v1222_v2  ;;  %1136 = vmatpush1.bf16.msra.mxu1 %v1222_v2  ;;  %v1236_v16 = vld [vmem:[%s1647_s4 + $0x80] ss:$8 sps:$4 sm:$0xff]   ;;  %v1241_v18 = vld [vmem:[%s1647_s4 + $0x94] ss:$8 sps:$4 sm:$0xff]   ;;  %v1244_v20 = vld [vmem:[%s1647_s4 + $0x90] ss:$8 sps:$4 sm:$0xff]  }
  0x71   : > { %552 = vmatprep.subr.bf16.mxu0 %v1446_v0  ;;  %1125 = vmatprep.subr.bf16.mxu1 %v1446_v0  ;;  %v1245_v21 = vld [vmem:[%s1647_s4 + $0x24] ss:$8 sps:$4 sm:$0xff]   ;;  %v1249_v23 = vld [vmem:[%s1647_s4 + $0x20] ss:$8 sps:$4 sm:$0xff]   ;;  %v1251_v25 = vld [vmem:[%s1647_s4 + $0x34] ss:$8 sps:$4 sm:$0xff]  }
  0x72   : > { %v1247_v22 = vld [vmem:[%s1647_s4 + $0xa4] ss:$8 sps:$4 sm:$0xff]   ;;  %v1250_v24 = vld [vmem:[%s1647_s4 + $0xa0] ss:$8 sps:$4 sm:$0xff]   ;;  %v1253_v26 = vld [vmem:[%s1647_s4 + $0xb4] ss:$8 sps:$4 sm:$0xff]  }
  0x73   : > { %v1255_v27 = vld [vmem:[%s1647_s4 + $0x30] ss:$8 sps:$4 sm:$0xff]   ;;  %v1257_v29 = vld [vmem:[%s1647_s4 + $0x44] ss:$8 sps:$4 sm:$0xff]   ;;  %v1261_v31 = vld [vmem:[%s1647_s4 + $0x40] ss:$8 sps:$4 sm:$0xff]  }
  0x74   : > { %553 = vmatpush1.bf16.msra.mxu0 %v1223_v3  ;;  %1137 = vmatpush1.bf16.msra.mxu1 %v1223_v3  ;;  %v1256_v28 = vld [vmem:[%s1647_s4 + $0xb0] ss:$8 sps:$4 sm:$0xff]   ;;  %v1259_v30 = vld [vmem:[%s1647_s4 + $0xc4] ss:$8 sps:$4 sm:$0xff]   ;;  %v1262_v32 = vld [vmem:[%s1647_s4 + $0xc0] ss:$8 sps:$4 sm:$0xff]  }
  0x75   : > { %554 = vmatprep.subr.bf16.mxu0 %v1446_v0  ;;  %1126 = vmatprep.subr.bf16.mxu1 %v1446_v0  ;;  %v1263_v33 = vld [vmem:[%s1647_s4 + $0x54] ss:$8 sps:$4 sm:$0xff]   ;;  %v1267_v35 = vld [vmem:[%s1647_s4 + $0x50] ss:$8 sps:$4 sm:$0xff]   ;;  %v1269_v37 = vld [vmem:[%s1647_s4 + $0x64] ss:$8 sps:$4 sm:$0xff]  }
  0x76   : > { %v1265_v34 = vld [vmem:[%s1647_s4 + $0xd4] ss:$8 sps:$4 sm:$0xff]   ;;  %v1268_v36 = vld [vmem:[%s1647_s4 + $0xd0] ss:$8 sps:$4 sm:$0xff]   ;;  %v1271_v38 = vld [vmem:[%s1647_s4 + $0xe4] ss:$8 sps:$4 sm:$0xff]  }
  0x77   : > { %v1273_v39 = vld [vmem:[%s1647_s4 + $0x60] ss:$8 sps:$4 sm:$0xff]   ;;  %v1275_v41 = vld [vmem:[%s1647_s4 + $0x74] ss:$8 sps:$4 sm:$0xff]   ;;  %v1279_v43 = vld [vmem:[%s1647_s4 + $0x70] ss:$8 sps:$4 sm:$0xff]  }
  0x78   : > { %555 = vmatpush1.bf16.msra.mxu0 %v1224_v4  ;;  %1138 = vmatpush1.bf16.msra.mxu1 %v1224_v4  ;;  %v1274_v40 = vld [vmem:[%s1647_s4 + $0xe0] ss:$8 sps:$4 sm:$0xff]   ;;  %v1277_v42 = vld [vmem:[%s1647_s4 + $0xf4] ss:$8 sps:$4 sm:$0xff]   ;;  %v1280_v44 = vld [vmem:[%s1647_s4 + $0xf0] ss:$8 sps:$4 sm:$0xff]  }
  0x79   : > { %556 = vmatprep.subr.bf16.mxu0 %v1446_v0  ;;  %1127 = vmatprep.subr.bf16.mxu1 %v1446_v0  ;;  %v1705_v45 = vld [vmem:[#allocation7] ss:$0 sm:$0xff]  ;;  %p1874_p0 = scmp.ne.s32.totalorder %s1869_s7, 0  ;;  %s1447_s9 = smov [#allocation8]  }
  0x7a   : > { %s1371_s10 = sshll.u32 %s1447_s9, 4  ;;  %s1372_s10 = int_to_ptr.vmem [resolvable:$false] %s1371_s10 }
  0x7b   : > { %p1369_p1 = pnand %p1368_p11, %p1874_p0  ;;  %s1373_s25 = scalar_lea.vmem %s1372_s10, 4096 }
  0x7c   : > { %557 = vmatpush1.bf16.msra.mxu0 %v1225_v6  ;;  %1139 = vmatpush1.bf16.msra.mxu1 %v1225_v6  ;;  %p1374_p7 = scmp.lt.s32.totalorder %s1805_s26, %s1372_s10  ;;  %p1375_p9 = scmp.lt.s32.totalorder %s1373_s25, %s1367_s6 }
  0x7d   : > { %558 = vmatprep.subr.bf16.mxu0 %v1446_v0  ;;  %1128 = vmatprep.subr.bf16.mxu1 %v1446_v0  ;;  %p1370_p3 = pneg %p1369_p1 }
  0x7e   : > { %p1376_p12 = por %p1375_p9, %p1374_p7 }
  0x80   : > { %559 = vmatpush1.bf16.msra.mxu0 %v1226_v8  ;;  %1140 = vmatpush1.bf16.msra.mxu1 %v1226_v8  ;;  %p1377_p2 = pnand %p1376_p12, %p1370_p3 }
  0x81   : > { %560 = vmatprep.subr.bf16.mxu0 %v1446_v0  ;;  %1129 = vmatprep.subr.bf16.mxu1 %v1446_v0 }
  0x84   : > { %561 = vmatpush1.bf16.msra.mxu0 %v1227_v9  ;;  %1141 = vmatpush1.bf16.msra.mxu1 %v1227_v9 }
  0x85   : > { %562 = vmatprep.subr.bf16.mxu0 %v1446_v0  ;;  %1130 = vmatprep.subr.bf16.mxu1 %v1446_v0 }
  0x88   : > { %563 = vmatpush1.bf16.msra.mxu0 %v1228_v10  ;;  %1142 = vmatpush1.bf16.msra.mxu1 %v1228_v10 }
  0x89   : > { %564 = vmatprep.subr.bf16.mxu0 %v1446_v0  ;;  %1131 = vmatprep.subr.bf16.mxu1 %v1446_v0 }
  0x8c   : > { %565 = vmatpush1.bf16.msra.mxu0 %v1229_v11  ;;  %1143 = vmatpush1.bf16.msra.mxu1 %v1229_v11 }
  0x8d   : > { %566 = vmatprep.subr.bf16.mxu0 %v1446_v0  ;;  %1132 = vmatprep.subr.bf16.mxu1 %v1446_v0 }
  0x90   : > { %567 = vmatpush1.bf16.msra.mxu0 %v1230_v12  ;;  %1144 = vmatpush1.bf16.msra.mxu1 %v1230_v12 }
  0x91   : > { %568 = vmatprep.subr.bf16.mxu0 %v1446_v0  ;;  %1133 = vmatprep.subr.bf16.mxu1 %v1446_v0 }
  0x94   : > { %569 = vmatpush1.bf16.msra.mxu0 %v1231_v13  ;;  %1145 = vmatpush1.bf16.msra.mxu1 %v1231_v13 }
  0x95   : > { %570 = vmatprep.subr.bf16.mxu0 %v1446_v0  ;;  %1134 = vmatprep.subr.bf16.mxu1 %v1446_v0 }
  0x98   : > { %571 = vmatpush1.bf16.msra.mxu0 %v1232_v14  ;;  %1146 = vmatpush1.bf16.msra.mxu1 %v1232_v14 }
  0x9b   : > { %581 = vmatmul.mubr.bf16.vlgmr.msra.gmra.mrb[0].mxu0 %v1233_v15  ;;  %645 = vmatmul.mubr.bf16.vlgmr.msra.gmra.mrb[0].mxu1 %v1236_v16 }
  0x9c   : > { %1036 = vmatprep.mubr.msk.bf16.mxu0 %vm499_vm0, %v1239_v17  ;;  %1044 = vmatprep.mubr.msk.bf16.mxu1 %vm499_vm0, %v1241_v18 }
  0xa3   : > { %589 = vmatmul.mubr.bf16.gmra.mrb[4].mxu0 %v1243_v19  ;;  %653 = vmatmul.mubr.bf16.gmra.mrb[4].mxu1 %v1244_v20 }
  0xa4   : > { %1037 = vmatprep.mubr.msk.bf16.mxu0 %vm499_vm0, %v1245_v21  ;;  %1045 = vmatprep.mubr.msk.bf16.mxu1 %vm499_vm0, %v1247_v22 }
  0xab   : > { %597 = vmatmul.mubr.bf16.gmra.mrb[8].mxu0 %v1249_v23  ;;  %661 = vmatmul.mubr.bf16.gmra.mrb[8].mxu1 %v1250_v24 }
  0xac   : > { %1038 = vmatprep.mubr.msk.bf16.mxu0 %vm499_vm0, %v1251_v25  ;;  %1046 = vmatprep.mubr.msk.bf16.mxu1 %vm499_vm0, %v1253_v26 }
  0xb3   : > { %605 = vmatmul.mubr.bf16.gmra.mrb[12].mxu0 %v1255_v27  ;;  %669 = vmatmul.mubr.bf16.gmra.mrb[12].mxu1 %v1256_v28 }
  0xb4   : > { %1039 = vmatprep.mubr.msk.bf16.mxu0 %vm499_vm0, %v1257_v29  ;;  %1047 = vmatprep.mubr.msk.bf16.mxu1 %vm499_vm0, %v1259_v30 }
  0xbb   : > { %613 = vmatmul.mubr.bf16.gmra.mrb[16].mxu0 %v1261_v31  ;;  %677 = vmatmul.mubr.bf16.gmra.mrb[16].mxu1 %v1262_v32 }
  0xbc   : > { %1040 = vmatprep.mubr.msk.bf16.mxu0 %vm499_vm0, %v1263_v33  ;;  %1048 = vmatprep.mubr.msk.bf16.mxu1 %vm499_vm0, %v1265_v34 }
  0xc3   : > { %621 = vmatmul.mubr.bf16.gmra.mrb[20].mxu0 %v1267_v35  ;;  %685 = vmatmul.mubr.bf16.gmra.mrb[20].mxu1 %v1268_v36 }
  0xc4   : > { %1041 = vmatprep.mubr.msk.bf16.mxu0 %vm499_vm0, %v1269_v37  ;;  %1049 = vmatprep.mubr.msk.bf16.mxu1 %vm499_vm0, %v1271_v38 }
  0xcb   : > { %629 = vmatmul.mubr.bf16.gmra.mrb[24].mxu0 %v1273_v39  ;;  %693 = vmatmul.mubr.bf16.gmra.mrb[24].mxu1 %v1274_v40 }
  0xcc   : > { %1042 = vmatprep.mubr.msk.bf16.mxu0 %vm499_vm0, %v1275_v41  ;;  %1050 = vmatprep.mubr.msk.bf16.mxu1 %vm499_vm0, %v1277_v42 }
  0xd3   : > { %637 = vmatmul.mubr.bf16.gmra.mrb[28].mxu0 %v1279_v43  ;;  %701 = vmatmul.mubr.bf16.gmra.mrb[28].mxu1 %v1280_v44 }
 0x16e   : > { %v582_v46 = vpop.f32.mrb[0].mxu0  ;;  %v646_v47 = vpop.f32.mrb[0].mxu1 }
 0x16f   : > { %v583_v48 = vadd.f32 %v1705_v45, %v582_v46  ;;  %v647_v49 = vadd.f32 %v1705_v45, %v646_v47  ;;  %v584_v50 = vpop.f32.mrb[1].mxu0  ;;  %v648_v51 = vpop.f32.mrb[1].mxu1 }
 0x170   : > { %v585_v52 = vpop.f32.mrb[2].mxu0  ;;  %v649_v53 = vpop.f32.mrb[2].mxu1 }
 0x171   : > { %v1090_v54 = vpack.c.bf16 %v583_v48, %v583_v48  ;;  %v1106_v55 = vpack.c.bf16 %v647_v49, %v647_v49  ;;  %v586_v56 = vadd.f32 %v1705_v45, %v585_v52  ;;  %v650_v57 = vadd.f32 %v1705_v45, %v649_v53  ;;  %v587_v58 = vpop.f32.mrb[3].mxu0  ;;  %v651_v59 = vpop.f32.mrb[3].mxu1 }
 0x173   : > { %838 = vst.msk [vmem:[%s1712_s20] sm:$0xf] %vm837_vm1, %v1090_v54  ;;  %854 = vst.msk [vmem:[%s1712_s20 + $0x40] sm:$0xf] %vm837_vm1, %v1106_v55  ;;  %v1091_v60 = vpack.c.bf16 %v586_v56, %v586_v56  ;;  %v1107_v61 = vpack.c.bf16 %v650_v57, %v650_v57 }
 0x175   : > { %839 = vst.msk [vmem:[%s1712_s20 + $0x4] sm:$0xf] %vm837_vm1, %v1091_v60  ;;  %855 = vst.msk [vmem:[%s1712_s20 + $0x44] sm:$0xf] %vm837_vm1, %v1107_v61 }
 0x176   : > { %v590_v62 = vpop.f32.mrb[4].mxu0  ;;  %v654_v63 = vpop.f32.mrb[4].mxu1 }
 0x177   : > { %v591_v0 = vadd.f32 %v1705_v45, %v590_v62  ;;  %v655_v1 = vadd.f32 %v1705_v45, %v654_v63  ;;  %v592_v2 = vpop.f32.mrb[5].mxu0  ;;  %v656_v3 = vpop.f32.mrb[5].mxu1 }
 0x178   : > { %v593_v4 = vpop.f32.mrb[6].mxu0  ;;  %v657_v5 = vpop.f32.mrb[6].mxu1 }
 0x179   : > { %v1092_v6 = vpack.c.bf16 %v591_v0, %v591_v0  ;;  %v1108_v7 = vpack.c.bf16 %v655_v1, %v655_v1  ;;  %v594_v8 = vadd.f32 %v1705_v45, %v593_v4  ;;  %v658_v9 = vadd.f32 %v1705_v45, %v657_v5  ;;  %v595_v10 = vpop.f32.mrb[7].mxu0  ;;  %v659_v11 = vpop.f32.mrb[7].mxu1 }
 0x17b   : > { %840 = vst.msk [vmem:[%s1712_s20 + $0x8] sm:$0xf] %vm837_vm1, %v1092_v6  ;;  %856 = vst.msk [vmem:[%s1712_s20 + $0x48] sm:$0xf] %vm837_vm1, %v1108_v7  ;;  %v1093_v12 = vpack.c.bf16 %v594_v8, %v594_v8  ;;  %v1109_v13 = vpack.c.bf16 %v658_v9, %v658_v9 }
 0x17d   : > { %841 = vst.msk [vmem:[%s1712_s20 + $0xc] sm:$0xf] %vm837_vm1, %v1093_v12  ;;  %857 = vst.msk [vmem:[%s1712_s20 + $0x4c] sm:$0xf] %vm837_vm1, %v1109_v13 }
 0x17e   : > { %v598_v14 = vpop.f32.mrb[8].mxu0  ;;  %v662_v15 = vpop.f32.mrb[8].mxu1 }
 0x17f   : > { %v599_v16 = vadd.f32 %v1705_v45, %v598_v14  ;;  %v663_v17 = vadd.f32 %v1705_v45, %v662_v15  ;;  %v600_v18 = vpop.f32.mrb[9].mxu0  ;;  %v664_v19 = vpop.f32.mrb[9].mxu1 }
 0x180   : > { %v601_v20 = vpop.f32.mrb[10].mxu0  ;;  %v665_v21 = vpop.f32.mrb[10].mxu1 }
 0x181   : > { %v1094_v22 = vpack.c.bf16 %v599_v16, %v599_v16  ;;  %v1110_v23 = vpack.c.bf16 %v663_v17, %v663_v17  ;;  %v602_v24 = vadd.f32 %v1705_v45, %v601_v20  ;;  %v666_v25 = vadd.f32 %v1705_v45, %v665_v21  ;;  %v603_v26 = vpop.f32.mrb[11].mxu0  ;;  %v667_v27 = vpop.f32.mrb[11].mxu1 }
 0x183   : > { %842 = vst.msk [vmem:[%s1712_s20 + $0x10] sm:$0xf] %vm837_vm1, %v1094_v22  ;;  %858 = vst.msk [vmem:[%s1712_s20 + $0x50] sm:$0xf] %vm837_vm1, %v1110_v23  ;;  %v1095_v28 = vpack.c.bf16 %v602_v24, %v602_v24  ;;  %v1111_v29 = vpack.c.bf16 %v666_v25, %v666_v25 }
 0x185   : > { %843 = vst.msk [vmem:[%s1712_s20 + $0x14] sm:$0xf] %vm837_vm1, %v1095_v28  ;;  %859 = vst.msk [vmem:[%s1712_s20 + $0x54] sm:$0xf] %vm837_vm1, %v1111_v29 }
 0x186   : > { %v606_v30 = vpop.f32.mrb[12].mxu0  ;;  %v670_v31 = vpop.f32.mrb[12].mxu1 }
 0x187   : > { %v607_v32 = vadd.f32 %v1705_v45, %v606_v30  ;;  %v671_v33 = vadd.f32 %v1705_v45, %v670_v31  ;;  %v608_v34 = vpop.f32.mrb[13].mxu0  ;;  %v672_v35 = vpop.f32.mrb[13].mxu1 }
 0x188   : > { %v609_v36 = vpop.f32.mrb[14].mxu0  ;;  %v673_v37 = vpop.f32.mrb[14].mxu1 }
 0x189   : > { %v1096_v38 = vpack.c.bf16 %v607_v32, %v607_v32  ;;  %v1112_v39 = vpack.c.bf16 %v671_v33, %v671_v33  ;;  %v610_v40 = vadd.f32 %v1705_v45, %v609_v36  ;;  %v674_v41 = vadd.f32 %v1705_v45, %v673_v37  ;;  %v611_v42 = vpop.f32.mrb[15].mxu0  ;;  %v675_v43 = vpop.f32.mrb[15].mxu1 }
 0x18b   : > { %844 = vst.msk [vmem:[%s1712_s20 + $0x18] sm:$0xf] %vm837_vm1, %v1096_v38  ;;  %860 = vst.msk [vmem:[%s1712_s20 + $0x58] sm:$0xf] %vm837_vm1, %v1112_v39  ;;  %v1097_v44 = vpack.c.bf16 %v610_v40, %v610_v40  ;;  %v1113_v46 = vpack.c.bf16 %v674_v41, %v674_v41 }
 0x18d   : > { %845 = vst.msk [vmem:[%s1712_s20 + $0x1c] sm:$0xf] %vm837_vm1, %v1097_v44  ;;  %861 = vst.msk [vmem:[%s1712_s20 + $0x5c] sm:$0xf] %vm837_vm1, %v1113_v46 }
 0x18e   : > { %v614_v47 = vpop.f32.mrb[16].mxu0  ;;  %v678_v48 = vpop.f32.mrb[16].mxu1 }
 0x18f   : > { %v615_v49 = vadd.f32 %v1705_v45, %v614_v47  ;;  %v679_v50 = vadd.f32 %v1705_v45, %v678_v48  ;;  %v616_v51 = vpop.f32.mrb[17].mxu0  ;;  %v680_v52 = vpop.f32.mrb[17].mxu1 }
 0x190   : > { %v617_v53 = vpop.f32.mrb[18].mxu0  ;;  %v681_v54 = vpop.f32.mrb[18].mxu1 }
 0x191   : > { %v1098_v55 = vpack.c.bf16 %v615_v49, %v615_v49  ;;  %v1114_v56 = vpack.c.bf16 %v679_v50, %v679_v50  ;;  %v618_v57 = vadd.f32 %v1705_v45, %v617_v53  ;;  %v682_v58 = vadd.f32 %v1705_v45, %v681_v54  ;;  %v619_v59 = vpop.f32.mrb[19].mxu0  ;;  %v683_v60 = vpop.f32.mrb[19].mxu1 }
 0x193   : > { %846 = vst.msk [vmem:[%s1712_s20 + $0x20] sm:$0xf] %vm837_vm1, %v1098_v55  ;;  %862 = vst.msk [vmem:[%s1712_s20 + $0x60] sm:$0xf] %vm837_vm1, %v1114_v56  ;;  %v1099_v61 = vpack.c.bf16 %v618_v57, %v618_v57  ;;  %v1115_v62 = vpack.c.bf16 %v682_v58, %v682_v58 }
 0x195   : > { %847 = vst.msk [vmem:[%s1712_s20 + $0x24] sm:$0xf] %vm837_vm1, %v1099_v61  ;;  %863 = vst.msk [vmem:[%s1712_s20 + $0x64] sm:$0xf] %vm837_vm1, %v1115_v62 }
 0x196   : > { %v622_v63 = vpop.f32.mrb[20].mxu0  ;;  %v686_v0 = vpop.f32.mrb[20].mxu1 }
 0x197   : > { %v623_v1 = vadd.f32 %v1705_v45, %v622_v63  ;;  %v687_v2 = vadd.f32 %v1705_v45, %v686_v0  ;;  %v624_v3 = vpop.f32.mrb[21].mxu0  ;;  %v688_v4 = vpop.f32.mrb[21].mxu1 }
 0x198   : > { %v625_v5 = vpop.f32.mrb[22].mxu0  ;;  %v689_v6 = vpop.f32.mrb[22].mxu1 }
 0x199   : > { %v1100_v7 = vpack.c.bf16 %v623_v1, %v623_v1  ;;  %v1116_v8 = vpack.c.bf16 %v687_v2, %v687_v2  ;;  %v626_v9 = vadd.f32 %v1705_v45, %v625_v5  ;;  %v690_v10 = vadd.f32 %v1705_v45, %v689_v6  ;;  %v627_v11 = vpop.f32.mrb[23].mxu0  ;;  %v691_v12 = vpop.f32.mrb[23].mxu1 }
 0x19b   : > { %848 = vst.msk [vmem:[%s1712_s20 + $0x28] sm:$0xf] %vm837_vm1, %v1100_v7  ;;  %864 = vst.msk [vmem:[%s1712_s20 + $0x68] sm:$0xf] %vm837_vm1, %v1116_v8  ;;  %v1101_v13 = vpack.c.bf16 %v626_v9, %v626_v9  ;;  %v1117_v14 = vpack.c.bf16 %v690_v10, %v690_v10 }
 0x19d   : > { %849 = vst.msk [vmem:[%s1712_s20 + $0x2c] sm:$0xf] %vm837_vm1, %v1101_v13  ;;  %865 = vst.msk [vmem:[%s1712_s20 + $0x6c] sm:$0xf] %vm837_vm1, %v1117_v14 }
 0x19e   : > { %v630_v15 = vpop.f32.mrb[24].mxu0  ;;  %v694_v16 = vpop.f32.mrb[24].mxu1 }
 0x19f   : > { %v631_v17 = vadd.f32 %v1705_v45, %v630_v15  ;;  %v695_v18 = vadd.f32 %v1705_v45, %v694_v16  ;;  %v632_v19 = vpop.f32.mrb[25].mxu0  ;;  %v696_v20 = vpop.f32.mrb[25].mxu1 }
 0x1a0   : > { %v633_v21 = vpop.f32.mrb[26].mxu0  ;;  %v697_v22 = vpop.f32.mrb[26].mxu1 }
 0x1a1   : > { %v1102_v23 = vpack.c.bf16 %v631_v17, %v631_v17  ;;  %v1118_v24 = vpack.c.bf16 %v695_v18, %v695_v18  ;;  %v634_v25 = vadd.f32 %v1705_v45, %v633_v21  ;;  %v698_v26 = vadd.f32 %v1705_v45, %v697_v22  ;;  %v635_v27 = vpop.f32.mrb[27].mxu0  ;;  %v699_v28 = vpop.f32.mrb[27].mxu1 }
 0x1a3   : > { %850 = vst.msk [vmem:[%s1712_s20 + $0x30] sm:$0xf] %vm837_vm1, %v1102_v23  ;;  %866 = vst.msk [vmem:[%s1712_s20 + $0x70] sm:$0xf] %vm837_vm1, %v1118_v24  ;;  %v1103_v29 = vpack.c.bf16 %v634_v25, %v634_v25  ;;  %v1119_v30 = vpack.c.bf16 %v698_v26, %v698_v26 }
 0x1a5   : > { %851 = vst.msk [vmem:[%s1712_s20 + $0x34] sm:$0xf] %vm837_vm1, %v1103_v29  ;;  %867 = vst.msk [vmem:[%s1712_s20 + $0x74] sm:$0xf] %vm837_vm1, %v1119_v30 }
 0x1a6   : > { %v638_v31 = vpop.f32.mrb[28].mxu0  ;;  %v702_v32 = vpop.f32.mrb[28].mxu1 }
 0x1a7   : > { %v639_v33 = vadd.f32 %v1705_v45, %v638_v31  ;;  %v703_v34 = vadd.f32 %v1705_v45, %v702_v32  ;;  %v640_v35 = vpop.f32.mrb[29].mxu0  ;;  %v704_v36 = vpop.f32.mrb[29].mxu1 }
 0x1a8   : > { %v641_v37 = vpop.f32.mrb[30].mxu0  ;;  %v705_v38 = vpop.f32.mrb[30].mxu1 }
 0x1a9   : > { %v1104_v39 = vpack.c.bf16 %v639_v33, %v639_v33  ;;  %v1120_v40 = vpack.c.bf16 %v703_v34, %v703_v34  ;;  %v642_v41 = vadd.f32 %v1705_v45, %v641_v37  ;;  %v706_v42 = vadd.f32 %v1705_v45, %v705_v38  ;;  %v643_v43 = vpop.f32.mrb[31].mxu0  ;;  %v707_v44 = vpop.f32.mrb[31].mxu1 }
 0x1ab   : > { %852 = vst.msk [vmem:[%s1712_s20 + $0x38] sm:$0xf] %vm837_vm1, %v1104_v39  ;;  %868 = vst.msk [vmem:[%s1712_s20 + $0x78] sm:$0xf] %vm837_vm1, %v1120_v40  ;;  %v1105_v46 = vpack.c.bf16 %v642_v41, %v642_v41  ;;  %v1121_v47 = vpack.c.bf16 %v706_v42, %v706_v42 }
 0x1ad   : > { %853 = vst.msk [vmem:[%s1712_s20 + $0x3c] sm:$0xf] %vm837_vm1, %v1105_v46  ;;  %869 = vst.msk [vmem:[%s1712_s20 + $0x7c] sm:$0xf] %vm837_vm1, %v1121_v47 }
 0x1ae   : > { %1380 = shalt.err (!%p1377_p2)
}
 0x1af   : > { %s1381_s11 = scalar_lea.hbm %s1803_s23, 2048  ;;  %s1385_s29 = scalar_lea.hbm %s1860_s3, 4096 }
 0x1b0   : > { %p1382_p13 = scmp.ne.s32.totalorder %s1803_s23, %s1381_s11  ;;  %p1386_p4 = scmp.lt.u32.totalorder %s1803_s23, %s1860_s3 }
 0x1b1   : > { %p1387_p5 = scmp.lt.u32.totalorder %s1385_s29, %s1381_s11  ;;  %p1389_p11 = scmp.lt.u32.totalorder %s1381_s11, %s1803_s23 }
 0x1b2   : > { %p1383_p6 = pnand %p1382_p13, %p1874_p0 }
 0x1b3   : > { %p1388_p8 = por %p1387_p5, %p1386_p4 }
 0x1b4   : > { %p1384_p10 = pneg %p1383_p6 }
 0x1b5   : > { %p1390_p1 = por %p1389_p11, %p1388_p8 }
 0x1b7   : > { %p1391_p3 = pnand %p1390_p1, %p1384_p10 }
 0x1b9   : > { %1394 = shalt.err (!%p1391_p3)
}
 0x1ba   : > { %s1448_s18 = smov 64   ;;  %s1449_s20 = smov 4  }
 0x1bb   : > { %1157 = dma.vmem_to_hbm [thread:$0]  (%p1874_p0), %s1805_s26, 2048, %s1803_s23, %s871_s16, %s1448_s18, %s1448_s18, %s1449_s20  }
 0x1bc PF: > { %s899_s21 = sand.u32 1, %s1425_s12   ;;  %p1875_p7 = scmp.ne.s32.totalorder %s1865_s19, 0 }
 0x1bd   : > { %p1876_p9 = scmp.ge.s32.totalorder %s1437_s15, 2  ;;  %s900_s27 = scalar_lea.sflag [#allocation4], %s899_s21 }
 0x1bf   : > { %p1171_p12 = pnand %p1876_p9, %p1875_p7 }
 0x1c1   : > { %1420 = dma.done.wait (!%p1171_p12), %s900_s27, 2048  }
 0x1c2   : > { %1422 = vsyncadd (!%p1171_p12), %s900_s27, 4294965248  ;;  %p17_p2 = scmp.ge.s32.totalorder %s1581_s5, 4   ;;  %s1877_s12 = smov %s1429_s13 }
 0x1c3   : > { %s1878_s13 = smov %s1433_s14  ;;  %s1879_s14 = smov %s1597_s8 }
 0x1c4   : > { %s1880_s15 = smov %s1581_s5  ;;  %19 = sbr.rel (!%p17_p2) target bundleno = 6 (0x6), region = 85 }
 0x1cb   :  { %905 = vsyncpa [#allocation3], 1 }
 0x1cc   :  { %907 = vsyncpa [#allocation3 + $0x1], 1 }
 0x1cd   :  { %908 = vsyncpa [#allocation6], 1 }
 0x1ce   :  { %909 = vsyncpa [#allocation4], 1 }
 0x1cf   :  { %911 = vsyncpa [#allocation4 + $0x1], 1 }

// kernel: forward.4
= control target key start
LH: loop header
LB: loop body
LE: loop exit
PB: predicated region body
PF: predicated region fallthrough
CT: control target
= control target key end

     0   :  { %8 = vsyncpa [#allocation3], 0  ;;  %s1848_s0 = inlined_call_operand.hbm [shape: bf16[4096,192], index: 0, kind: input, shape index: {}]   ;;  %s1849_s1 = inlined_call_operand.hbm [shape: bf16[192,64], index: 1, kind: input, shape index: {}]   ;;  %s1850_s2 = inlined_call_operand.hbm [shape: f32[1,64], index: 2, kind: input, shape index: {}]   ;;  %s1851_s3 = inlined_call_operand.hbm [shape: bf16[4096,64], index: 3, kind: output, shape index: {}]  }
   0x1   :  { %10 = vsyncpa [#allocation3 + $0x1], 0 }
   0x2   :  { %11 = vsyncpa [#allocation6], 0 }
   0x3   :  { %12 = vsyncpa [#allocation4], 0 }
   0x4   :  { %14 = vsyncpa [#allocation4 + $0x1], 0  ;;  %s1470_s12 = smov 0   ;;  %s1472_s13 = smov 0  }
   0x5   :  { %s1474_s14 = smov 0   ;;  %s1476_s15 = smov 0  }
   0x6 LB: > { %s1491_s16 = sadd.s32 4294967295, %s1437_s15   ;;  %s976_s17 = sadd.s32 4294967294, %s1437_s15   ;;  %s1437_s15 = sphi %s1476_s15, %s1870_s15   ;;  %s1433_s14 = sphi %s1474_s14, %s1869_s14   ;;  %s1429_s13 = sphi %s1472_s13, %s1868_s13   ;;  %s1425_s12 = sphi %s1470_s12, %s1867_s12  }
   0x7   : > { %p40_p0 = scmp.ne.s32.totalorder %s1429_s13, %s1425_s12  ;;  %p1852_p1 = scmp.eq.s32.totalorder %s1491_s16, 0 }
   0x8   : > { %p112_p3 = scmp.eq.s32.totalorder %s976_s17, 15  ;;  %p977_p5 = scmp.ge.s32.totalorder %s1437_s15, 1 }
   0x9   : > { %p1500_p4 = por %p1852_p1, %p40_p0  ;;  %p119_p7 = scmp.lt.s32.totalorder %s1437_s15, 17 }
   0xa   : > { %p1505_p6 = por %p112_p3, %p40_p0  ;;  %s1439_s21 = smov [#allocation5]  }
   0xb   : > { %s1855_s18 = scalar_select %p1500_p4, 1, 0 }
   0xc   : > { %s1856_s19 = scalar_select %p1505_p6, 1, 0 }
   0xd   : > { %p1510_p8 = pnand %p977_p5, %p119_p7  ;;  %s131_s22 = sshll.u32 %s1439_s21, 4  ;;  %s132_s22 = int_to_ptr.vmem [resolvable:$true] %s131_s22 }
   0xe   : > { %s1440_s24 = smov [#allocation7]   ;;  %s1281_s28 = scalar_lea.hbm %s1849_s1, 1536 }
   0xf   : > { %s1857_s20 = scalar_select %p1510_p8, 1, 0 }
  0x10   : > { %p1159_p9 = pneg %p1510_p8  ;;  %s145_s25 = sshll.u32 %s1440_s24, 4  ;;  %s1522_s25 = int_to_ptr.vmem [resolvable:$true] %s145_s25 }
  0x11   : > { %p1282_p11 = scmp.ne.s32.totalorder %s1849_s1, %s1281_s28  ;;  %p1288_p3 = scmp.lt.u32.totalorder %s1281_s28, %s1849_s1 }
  0x12   : > { %p1518_p10 = pnand %p1159_p9, %p1852_p1 }
  0x14   : > { %p1283_p12 = pneg %p1518_p10 }
  0x16   : > { %p1284_p13 = pnand %p1283_p12, %p1282_p11 }
  0x18   : > { %p1285_p0 = pneg %p1284_p13 }
  0x1a   : > { %p1290_p5 = pnand %p1288_p3, %p1285_p0 }
  0x1c   : > { %1293 = shalt.err (!%p1290_p5)
}
  0x1d   : > { %s1294_s6 = scalar_lea.vmem %s132_s22, 1536  ;;  %p1302_p2 = scmp.lt.s32.totalorder %s132_s22, %s132_s22 }
  0x1e   : > { %p1295_p7 = scmp.ne.s32.totalorder %s132_s22, %s1294_s6  ;;  %p1303_p6 = scmp.lt.s32.totalorder %s1294_s6, %s1294_s6 }
  0x20   : > { %p1297_p9 = pnand %p1295_p7, %p1283_p12  ;;  %p1304_p4 = por %p1303_p6, %p1302_p2 }
  0x22   : > { %p1298_p1 = pneg %p1297_p9 }
  0x24   : > { %p1305_p8 = pnand %p1304_p4, %p1298_p1 }
  0x26   : > { %1308 = shalt.err (!%p1305_p8)
}
  0x27   : > { %s1441_s7 = smov 64   ;;  %s1442_s8 = smov 4  }
  0x28   : > { %1162 = dma.hbm_to_vmem [thread:$0]  (!%p1518_p10), %s1849_s1, 1536, %s132_s22, [#allocation6], %s1441_s7, %s1441_s7, %s1442_s8  }
  0x29   : > { %s1309_s21 = scalar_lea.hbm %s1850_s2, 16 }
  0x2a   : > { %p1310_p11 = scmp.ne.s32.totalorder %s1850_s2, %s1309_s21  ;;  %p1316_p4 = scmp.lt.u32.totalorder %s1309_s21, %s1850_s2 }
  0x2c   : > { %p1312_p1 = pnand %p1310_p11, %p1283_p12 }
  0x2e   : > { %p1313_p2 = pneg %p1312_p1 }
  0x30   : > { %p1318_p6 = pnand %p1316_p4, %p1313_p2 }
  0x32   : > { %1321 = shalt.err (!%p1318_p6)
}
  0x33   : > { %s1322_s22 = scalar_lea.vmem %s1522_s25, 16  ;;  %s1329_s29 = scalar_lea.vmem %s1522_s25, 32 }
  0x34   : > { %p1323_p8 = scmp.ne.s32.totalorder %s1522_s25, %s1322_s22  ;;  %p1330_p3 = scmp.lt.s32.totalorder %s1522_s25, %s1522_s25 }
  0x35   : > { %p1331_p5 = scmp.lt.s32.totalorder %s1329_s29, %s1322_s22 }
  0x36   : > { %p1325_p13 = pnand %p1323_p8, %p1283_p12 }
  0x37   : > { %p1332_p7 = por %p1331_p5, %p1330_p3 }
  0x38   : > { %p1326_p0 = pneg %p1325_p13 }
  0x3a   : > { %p1333_p9 = pnand %p1332_p7, %p1326_p0 }
  0x3c   : > { %1336 = shalt.err (!%p1333_p9)
}
  0x3d   : > { %1165 = dma.hbm_to_vmem [thread:$0]  (!%p1518_p10), %s1850_s2, 16, %s1522_s25, [#allocation6]  }
  0x3e   : > { %s1573_s5 = sadd.s32 1, %s1437_s15   ;;  %s27_s23 = sadd.s32 1, %s1433_s14 }
  0x3f   : > { %s24_s6 = ssub.s32 %s1437_s15, %s1573_s5  ;;  %p34_p12 = scmp.ne.s32.totalorder %s1433_s14, %s1429_s13 }
  0x40   : > { %p25_p11 = scmp.eq.s32.totalorder %s24_s6, 0  ;;  %p35_p1 = scmp.eq.s32.totalorder %s1437_s15, 0 }
  0x41   : > { %p1859_p2 = scmp.eq.s32.totalorder %s1491_s16, 15  ;;  %p1176_p6 = scmp.lt.s32.totalorder %s1437_s15, 16 }
  0x42   : > { %s1589_s8 = scalar_select %p25_p11, %s1433_s14, %s27_s23  }
  0x43   : > { %p1583_p4 = por %p1859_p2, %p34_p12  ;;  %p36_p8 = por %p35_p1, %p34_p12 }
  0x44   : > { %s156_s9 = sand.u32 1, %s1433_s14   ;;  %s1089_s25 = sshll.u32 %s1437_s15, 12 }
  0x45   : > { %s981_s10 = sshll.u32 %s156_s9, 8  ;;  %s1596_s21 = scalar_lea.hbm %s1848_s0, %s1089_s25 }
  0x46   : > { %s160_s24 = scalar_lea.vmem [#allocation2], %s981_s10  ;;  %p1600_p10 = pnand %p1176_p6, %p36_p8 }
  0x47   : > { %s168_s26 = sshll.u32 %s160_s24, 4  ;;  %s1604_s28 = scalar_lea.sflag [#allocation3], %s156_s9  ;;  %s1598_s26 = int_to_ptr.vmem [resolvable:$true] %s168_s26 }
  0x48   : > { %s1337_s22 = scalar_lea.hbm %s1596_s21, 4096  ;;  %p1339_p0 = pneg %p1600_p10 }
  0x49   : > { %p1338_p13 = scmp.ne.s32.totalorder %s1596_s21, %s1337_s22  ;;  %s1342_s4 = scalar_lea.hbm %s1848_s0, 65536 }
  0x4a   : > { %p1343_p7 = scmp.lt.u32.totalorder %s1596_s21, %s1848_s0  ;;  %p1344_p9 = scmp.lt.u32.totalorder %s1342_s4, %s1337_s22 }
  0x4b   : > { %p1340_p3 = pnand %p1339_p0, %p1338_p13  ;;  %p1346_p11 = scmp.lt.u32.totalorder %s1337_s22, %s1596_s21 }
  0x4c   : > { %p1345_p12 = por %p1344_p9, %p1343_p7 }
  0x4d   : > { %p1341_p5 = pneg %p1340_p3 }
  0x4e   : > { %p1347_p1 = por %p1346_p11, %p1345_p12 }
  0x50   : > { %p1348_p2 = pnand %p1347_p1, %p1341_p5 }
  0x52   : > { %1351 = shalt.err (!%p1348_p2)
}
  0x53   : > { %s1352_s9 = scalar_lea.vmem %s1598_s26, 4096  ;;  %s1443_s10 = smov [#allocation2]  }
  0x54   : > { %p1353_p6 = scmp.ne.s32.totalorder %s1598_s26, %s1352_s9  ;;  %s1357_s25 = sshll.u32 %s1443_s10, 4  ;;  %s1358_s25 = int_to_ptr.vmem [resolvable:$false] %s1357_s25 }
  0x55   : > { %s1359_s11 = scalar_lea.vmem %s1358_s25, 8192  ;;  %p1360_p3 = scmp.lt.s32.totalorder %s1598_s26, %s1358_s25 }
  0x56   : > { %p1355_p8 = pnand %p1353_p6, %p1339_p0  ;;  %p1361_p7 = scmp.lt.s32.totalorder %s1359_s11, %s1352_s9 }
  0x58   : > { %p1356_p13 = pneg %p1355_p8  ;;  %p1362_p9 = por %p1361_p7, %p1360_p3 }
  0x5a   : > { %p1363_p12 = pnand %p1362_p9, %p1356_p13 }
  0x5c   : > { %1366 = shalt.err (!%p1363_p12)
}
  0x5d   : > { %s1444_s17 = smov 128   ;;  %s1445_s24 = smov 8  }
  0x5e   : > { %1169 = dma.hbm_to_vmem [thread:$0]  (!%p1600_p10), %s1596_s21, 4096, %s1598_s26, %s1604_s28, %s1444_s17, %s1444_s17, %s1445_s24  }
  0x5f   : > { %p1862_p0 = scmp.ne.s32.totalorder %s1857_s20, 0 }
  0x60   : > { %s1635_s22 = sand.u32 (!%p1862_p0), 1, %s1429_s13   ;;  %p1863_p5 = scmp.ne.s32.totalorder (!%p1862_p0), %s1855_s18, 0 }
  0x61   : > { %180 = sbr.rel (%p1862_p0) target bundleno = 446 (0x1be), region = 32  ;;  %s986_s29 = sshll.u32 (!%p1862_p0), %s1635_s22, 8 }
  0x62   : > { %s183_s30 = scalar_lea.sflag (!%p1862_p0), [#allocation3], %s1635_s22  ;;  %s1639_s4 = scalar_lea.vmem (!%p1862_p0), [#allocation2], %s986_s29 }
  0x68   : > { %1412 = dma.done.wait (%p1863_p5), %s183_s30, 4096  }
  0x69   : > { %1414 = vsyncadd (%p1863_p5), %s183_s30, 4294963200  ;;  %p1864_p10 = scmp.eq.s32.totalorder %s1491_s16, 0 }
  0x6b   : > { %1416 = dma.done.wait (%p1864_p10), [#allocation6], 1552   ;;  %p1865_p11 = pmov %p1864_p10 }
  0x6c   : > { %v1446_v0 = vmov 0   ;;  %v1221_v1 = vld [vmem:[#allocation5] sm:$0xff]   ;;  %v1222_v2 = vld [vmem:[#allocation5 + $0x8] sm:$0xff]   ;;  %v1223_v3 = vld [vmem:[#allocation5 + $0x10] sm:$0xff]   ;;  %vm499_vm0 = vcmask 523264   ;;  %s989_s18 = sshll.u32 %s1635_s22, 7 }
  0x6d   : > { %1418 = vsyncadd (%p1865_p11), [#allocation6], 4294965744  ;;  %548 = vmatprep.subr.bf16.mxu0 %v1446_v0  ;;  %1123 = vmatprep.subr.bf16.mxu1 %v1446_v0  ;;  %v1224_v4 = vld [vmem:[#allocation5 + $0x18] sm:$0xff]   ;;  %v1235_v5 = vld [vmem:[%s1639_s4 + $0x4] ss:$8 sps:$4 sm:$0xff]   ;;  %vm837_vm1 = vcmask 519168  }
  0x6e   : > { %549 = vmatpush1.bf16.msra.mxu0 %v1221_v1  ;;  %1135 = vmatpush1.bf16.msra.mxu1 %v1221_v1  ;;  %v1225_v6 = vld [vmem:[#allocation5 + $0x20] sm:$0xff]   ;;  %v1226_v8 = vld [vmem:[#allocation5 + $0x28] sm:$0xff]   ;;  %v1227_v9 = vld [vmem:[#allocation5 + $0x30] sm:$0xff]   ;;  %s1704_s20 = scalar_lea.vmem [#allocation8], %s989_s18  ;;  %s1122_s21 = sshll.u32 %s1491_s16, 11 }
  0x6f   : > { %550 = vmatprep.subr.bf16.mxu0 %v1446_v0  ;;  %1124 = vmatprep.subr.bf16.mxu1 %v1446_v0  ;;  %v1238_v7 = vld [vmem:[%s1639_s4 + $0x84] ss:$8 sps:$4 sm:$0xff]   ;;  %v1228_v10 = vld [vmem:[#allocation5 + $0x38] sm:$0xff]   ;;  %v1231_v13 = vld [vmem:[#allocation5 + $0x50] sm:$0xff]   ;;  %s884_s26 = sshll.u32 %s1704_s20, 4  ;;  %s1795_s23 = scalar_lea.hbm %s1851_s3, %s1122_s21  ;;  %s1797_s26 = int_to_ptr.vmem [resolvable:$true] %s884_s26 }
  0x70   : > { %1035 = vmatprep.mubr.msk.bf16.mxu0 %vm499_vm0, %v1235_v5  ;;  %1043 = vmatprep.mubr.msk.bf16.mxu1 %vm499_vm0, %v1238_v7  ;;  %v1229_v11 = vld [vmem:[#allocation5 + $0x40] sm:$0xff]   ;;  %v1230_v12 = vld [vmem:[#allocation5 + $0x48] sm:$0xff]   ;;  %v1232_v14 = vld [vmem:[#allocation5 + $0x58] sm:$0xff]   ;;  %s871_s16 = scalar_lea.sflag [#allocation4], %s1635_s22  ;;  %s1367_s6 = scalar_lea.vmem %s1797_s26, 2048 }
  0x71   : > { %v1233_v15 = vld [vmem:[%s1639_s4] ss:$8 sps:$4 sm:$0xff]   ;;  %v1239_v17 = vld [vmem:[%s1639_s4 + $0x14] ss:$8 sps:$4 sm:$0xff]   ;;  %v1243_v19 = vld [vmem:[%s1639_s4 + $0x10] ss:$8 sps:$4 sm:$0xff]   ;;  %p1368_p1 = scmp.ne.s32.totalorder %s1797_s26, %s1367_s6 }
  0x72   : > { %551 = vmatpush1.bf16.msra.mxu0 %v1222_v2  ;;  %1136 = vmatpush1.bf16.msra.mxu1 %v1222_v2  ;;  %v1236_v16 = vld [vmem:[%s1639_s4 + $0x80] ss:$8 sps:$4 sm:$0xff]   ;;  %v1241_v18 = vld [vmem:[%s1639_s4 + $0x94] ss:$8 sps:$4 sm:$0xff]   ;;  %v1244_v20 = vld [vmem:[%s1639_s4 + $0x90] ss:$8 sps:$4 sm:$0xff]  }
  0x73   : > { %552 = vmatprep.subr.bf16.mxu0 %v1446_v0  ;;  %1125 = vmatprep.subr.bf16.mxu1 %v1446_v0  ;;  %v1245_v21 = vld [vmem:[%s1639_s4 + $0x24] ss:$8 sps:$4 sm:$0xff]   ;;  %v1249_v23 = vld [vmem:[%s1639_s4 + $0x20] ss:$8 sps:$4 sm:$0xff]   ;;  %v1251_v25 = vld [vmem:[%s1639_s4 + $0x34] ss:$8 sps:$4 sm:$0xff]   ;;  %p1369_p2 = pnand %p1368_p1, %p1583_p4 }
  0x74   : > { %v1247_v22 = vld [vmem:[%s1639_s4 + $0xa4] ss:$8 sps:$4 sm:$0xff]   ;;  %v1250_v24 = vld [vmem:[%s1639_s4 + $0xa0] ss:$8 sps:$4 sm:$0xff]   ;;  %v1253_v26 = vld [vmem:[%s1639_s4 + $0xb4] ss:$8 sps:$4 sm:$0xff]  }
  0x75   : > { %v1255_v27 = vld [vmem:[%s1639_s4 + $0x30] ss:$8 sps:$4 sm:$0xff]   ;;  %v1257_v29 = vld [vmem:[%s1639_s4 + $0x44] ss:$8 sps:$4 sm:$0xff]   ;;  %v1261_v31 = vld [vmem:[%s1639_s4 + $0x40] ss:$8 sps:$4 sm:$0xff]   ;;  %p1370_p6 = pneg %p1369_p2 }
  0x76   : > { %553 = vmatpush1.bf16.msra.mxu0 %v1223_v3  ;;  %1137 = vmatpush1.bf16.msra.mxu1 %v1223_v3  ;;  %v1256_v28 = vld [vmem:[%s1639_s4 + $0xb0] ss:$8 sps:$4 sm:$0xff]   ;;  %v1259_v30 = vld [vmem:[%s1639_s4 + $0xc4] ss:$8 sps:$4 sm:$0xff]   ;;  %v1262_v32 = vld [vmem:[%s1639_s4 + $0xc0] ss:$8 sps:$4 sm:$0xff]  }
  0x77   : > { %554 = vmatprep.subr.bf16.mxu0 %v1446_v0  ;;  %1126 = vmatprep.subr.bf16.mxu1 %v1446_v0  ;;  %v1263_v33 = vld [vmem:[%s1639_s4 + $0x54] ss:$8 sps:$4 sm:$0xff]   ;;  %v1267_v35 = vld [vmem:[%s1639_s4 + $0x50] ss:$8 sps:$4 sm:$0xff]   ;;  %v1269_v37 = vld [vmem:[%s1639_s4 + $0x64] ss:$8 sps:$4 sm:$0xff]  }
  0x78   : > { %v1265_v34 = vld [vmem:[%s1639_s4 + $0xd4] ss:$8 sps:$4 sm:$0xff]   ;;  %v1268_v36 = vld [vmem:[%s1639_s4 + $0xd0] ss:$8 sps:$4 sm:$0xff]   ;;  %v1271_v38 = vld [vmem:[%s1639_s4 + $0xe4] ss:$8 sps:$4 sm:$0xff]  }
  0x79   : > { %v1273_v39 = vld [vmem:[%s1639_s4 + $0x60] ss:$8 sps:$4 sm:$0xff]   ;;  %v1275_v41 = vld [vmem:[%s1639_s4 + $0x74] ss:$8 sps:$4 sm:$0xff]   ;;  %v1279_v43 = vld [vmem:[%s1639_s4 + $0x70] ss:$8 sps:$4 sm:$0xff]  }
  0x7a   : > { %555 = vmatpush1.bf16.msra.mxu0 %v1224_v4  ;;  %1138 = vmatpush1.bf16.msra.mxu1 %v1224_v4  ;;  %v1274_v40 = vld [vmem:[%s1639_s4 + $0xe0] ss:$8 sps:$4 sm:$0xff]   ;;  %v1277_v42 = vld [vmem:[%s1639_s4 + $0xf4] ss:$8 sps:$4 sm:$0xff]   ;;  %v1280_v44 = vld [vmem:[%s1639_s4 + $0xf0] ss:$8 sps:$4 sm:$0xff]  }
  0x7b   : > { %556 = vmatprep.subr.bf16.mxu0 %v1446_v0  ;;  %1127 = vmatprep.subr.bf16.mxu1 %v1446_v0  ;;  %v1697_v45 = vld [vmem:[#allocation7] ss:$0 sm:$0xff]  ;;  %s1447_s9 = smov [#allocation8]  }
  0x7c   : > { %s1371_s10 = sshll.u32 %s1447_s9, 4  ;;  %s1372_s10 = int_to_ptr.vmem [resolvable:$false] %s1371_s10 }
  0x7d   : > { %s1373_s25 = scalar_lea.vmem %s1372_s10, 4096  ;;  %p1374_p8 = scmp.lt.s32.totalorder %s1797_s26, %s1372_s10 }
  0x7e   : > { %557 = vmatpush1.bf16.msra.mxu0 %v1225_v6  ;;  %1139 = vmatpush1.bf16.msra.mxu1 %v1225_v6  ;;  %p1375_p13 = scmp.lt.s32.totalorder %s1373_s25, %s1367_s6 }
  0x7f   : > { %558 = vmatprep.subr.bf16.mxu0 %v1446_v0  ;;  %1128 = vmatprep.subr.bf16.mxu1 %v1446_v0 }
  0x80   : > { %p1376_p3 = por %p1375_p13, %p1374_p8 }
  0x82   : > { %559 = vmatpush1.bf16.msra.mxu0 %v1226_v8  ;;  %1140 = vmatpush1.bf16.msra.mxu1 %v1226_v8  ;;  %p1377_p7 = pnand %p1376_p3, %p1370_p6 }
  0x83   : > { %560 = vmatprep.subr.bf16.mxu0 %v1446_v0  ;;  %1129 = vmatprep.subr.bf16.mxu1 %v1446_v0 }
  0x86   : > { %561 = vmatpush1.bf16.msra.mxu0 %v1227_v9  ;;  %1141 = vmatpush1.bf16.msra.mxu1 %v1227_v9 }
  0x87   : > { %562 = vmatprep.subr.bf16.mxu0 %v1446_v0  ;;  %1130 = vmatprep.subr.bf16.mxu1 %v1446_v0 }
  0x8a   : > { %563 = vmatpush1.bf16.msra.mxu0 %v1228_v10  ;;  %1142 = vmatpush1.bf16.msra.mxu1 %v1228_v10 }
  0x8b   : > { %564 = vmatprep.subr.bf16.mxu0 %v1446_v0  ;;  %1131 = vmatprep.subr.bf16.mxu1 %v1446_v0 }
  0x8e   : > { %565 = vmatpush1.bf16.msra.mxu0 %v1229_v11  ;;  %1143 = vmatpush1.bf16.msra.mxu1 %v1229_v11 }
  0x8f   : > { %566 = vmatprep.subr.bf16.mxu0 %v1446_v0  ;;  %1132 = vmatprep.subr.bf16.mxu1 %v1446_v0 }
  0x92   : > { %567 = vmatpush1.bf16.msra.mxu0 %v1230_v12  ;;  %1144 = vmatpush1.bf16.msra.mxu1 %v1230_v12 }
  0x93   : > { %568 = vmatprep.subr.bf16.mxu0 %v1446_v0  ;;  %1133 = vmatprep.subr.bf16.mxu1 %v1446_v0 }
  0x96   : > { %569 = vmatpush1.bf16.msra.mxu0 %v1231_v13  ;;  %1145 = vmatpush1.bf16.msra.mxu1 %v1231_v13 }
  0x97   : > { %570 = vmatprep.subr.bf16.mxu0 %v1446_v0  ;;  %1134 = vmatprep.subr.bf16.mxu1 %v1446_v0 }
  0x9a   : > { %571 = vmatpush1.bf16.msra.mxu0 %v1232_v14  ;;  %1146 = vmatpush1.bf16.msra.mxu1 %v1232_v14 }
  0x9d   : > { %581 = vmatmul.mubr.bf16.vlgmr.msra.gmra.mrb[0].mxu0 %v1233_v15  ;;  %645 = vmatmul.mubr.bf16.vlgmr.msra.gmra.mrb[0].mxu1 %v1236_v16 }
  0x9e   : > { %1036 = vmatprep.mubr.msk.bf16.mxu0 %vm499_vm0, %v1239_v17  ;;  %1044 = vmatprep.mubr.msk.bf16.mxu1 %vm499_vm0, %v1241_v18 }
  0xa5   : > { %589 = vmatmul.mubr.bf16.gmra.mrb[4].mxu0 %v1243_v19  ;;  %653 = vmatmul.mubr.bf16.gmra.mrb[4].mxu1 %v1244_v20 }
  0xa6   : > { %1037 = vmatprep.mubr.msk.bf16.mxu0 %vm499_vm0, %v1245_v21  ;;  %1045 = vmatprep.mubr.msk.bf16.mxu1 %vm499_vm0, %v1247_v22 }
  0xad   : > { %597 = vmatmul.mubr.bf16.gmra.mrb[8].mxu0 %v1249_v23  ;;  %661 = vmatmul.mubr.bf16.gmra.mrb[8].mxu1 %v1250_v24 }
  0xae   : > { %1038 = vmatprep.mubr.msk.bf16.mxu0 %vm499_vm0, %v1251_v25  ;;  %1046 = vmatprep.mubr.msk.bf16.mxu1 %vm499_vm0, %v1253_v26 }
  0xb5   : > { %605 = vmatmul.mubr.bf16.gmra.mrb[12].mxu0 %v1255_v27  ;;  %669 = vmatmul.mubr.bf16.gmra.mrb[12].mxu1 %v1256_v28 }
  0xb6   : > { %1039 = vmatprep.mubr.msk.bf16.mxu0 %vm499_vm0, %v1257_v29  ;;  %1047 = vmatprep.mubr.msk.bf16.mxu1 %vm499_vm0, %v1259_v30 }
  0xbd   : > { %613 = vmatmul.mubr.bf16.gmra.mrb[16].mxu0 %v1261_v31  ;;  %677 = vmatmul.mubr.bf16.gmra.mrb[16].mxu1 %v1262_v32 }
  0xbe   : > { %1040 = vmatprep.mubr.msk.bf16.mxu0 %vm499_vm0, %v1263_v33  ;;  %1048 = vmatprep.mubr.msk.bf16.mxu1 %vm499_vm0, %v1265_v34 }
  0xc5   : > { %621 = vmatmul.mubr.bf16.gmra.mrb[20].mxu0 %v1267_v35  ;;  %685 = vmatmul.mubr.bf16.gmra.mrb[20].mxu1 %v1268_v36 }
  0xc6   : > { %1041 = vmatprep.mubr.msk.bf16.mxu0 %vm499_vm0, %v1269_v37  ;;  %1049 = vmatprep.mubr.msk.bf16.mxu1 %vm499_vm0, %v1271_v38 }
  0xcd   : > { %629 = vmatmul.mubr.bf16.gmra.mrb[24].mxu0 %v1273_v39  ;;  %693 = vmatmul.mubr.bf16.gmra.mrb[24].mxu1 %v1274_v40 }
  0xce   : > { %1042 = vmatprep.mubr.msk.bf16.mxu0 %vm499_vm0, %v1275_v41  ;;  %1050 = vmatprep.mubr.msk.bf16.mxu1 %vm499_vm0, %v1277_v42 }
  0xd5   : > { %637 = vmatmul.mubr.bf16.gmra.mrb[28].mxu0 %v1279_v43  ;;  %701 = vmatmul.mubr.bf16.gmra.mrb[28].mxu1 %v1280_v44 }
 0x170   : > { %v582_v46 = vpop.f32.mrb[0].mxu0  ;;  %v646_v47 = vpop.f32.mrb[0].mxu1 }
 0x171   : > { %v583_v48 = vadd.f32 %v1697_v45, %v582_v46  ;;  %v647_v49 = vadd.f32 %v1697_v45, %v646_v47  ;;  %v584_v50 = vpop.f32.mrb[1].mxu0  ;;  %v648_v51 = vpop.f32.mrb[1].mxu1 }
 0x172   : > { %v585_v52 = vpop.f32.mrb[2].mxu0  ;;  %v649_v53 = vpop.f32.mrb[2].mxu1 }
 0x173   : > { %v1090_v54 = vpack.c.bf16 %v583_v48, %v583_v48  ;;  %v1106_v55 = vpack.c.bf16 %v647_v49, %v647_v49  ;;  %v586_v56 = vadd.f32 %v1697_v45, %v585_v52  ;;  %v650_v57 = vadd.f32 %v1697_v45, %v649_v53  ;;  %v587_v58 = vpop.f32.mrb[3].mxu0  ;;  %v651_v59 = vpop.f32.mrb[3].mxu1 }
 0x175   : > { %838 = vst.msk [vmem:[%s1704_s20] sm:$0xf] %vm837_vm1, %v1090_v54  ;;  %854 = vst.msk [vmem:[%s1704_s20 + $0x40] sm:$0xf] %vm837_vm1, %v1106_v55  ;;  %v1091_v60 = vpack.c.bf16 %v586_v56, %v586_v56  ;;  %v1107_v61 = vpack.c.bf16 %v650_v57, %v650_v57 }
 0x177   : > { %839 = vst.msk [vmem:[%s1704_s20 + $0x4] sm:$0xf] %vm837_vm1, %v1091_v60  ;;  %855 = vst.msk [vmem:[%s1704_s20 + $0x44] sm:$0xf] %vm837_vm1, %v1107_v61 }
 0x178   : > { %v590_v62 = vpop.f32.mrb[4].mxu0  ;;  %v654_v63 = vpop.f32.mrb[4].mxu1 }
 0x179   : > { %v591_v0 = vadd.f32 %v1697_v45, %v590_v62  ;;  %v655_v1 = vadd.f32 %v1697_v45, %v654_v63  ;;  %v592_v2 = vpop.f32.mrb[5].mxu0  ;;  %v656_v3 = vpop.f32.mrb[5].mxu1 }
 0x17a   : > { %v593_v4 = vpop.f32.mrb[6].mxu0  ;;  %v657_v5 = vpop.f32.mrb[6].mxu1 }
 0x17b   : > { %v1092_v6 = vpack.c.bf16 %v591_v0, %v591_v0  ;;  %v1108_v7 = vpack.c.bf16 %v655_v1, %v655_v1  ;;  %v594_v8 = vadd.f32 %v1697_v45, %v593_v4  ;;  %v658_v9 = vadd.f32 %v1697_v45, %v657_v5  ;;  %v595_v10 = vpop.f32.mrb[7].mxu0  ;;  %v659_v11 = vpop.f32.mrb[7].mxu1 }
 0x17d   : > { %840 = vst.msk [vmem:[%s1704_s20 + $0x8] sm:$0xf] %vm837_vm1, %v1092_v6  ;;  %856 = vst.msk [vmem:[%s1704_s20 + $0x48] sm:$0xf] %vm837_vm1, %v1108_v7  ;;  %v1093_v12 = vpack.c.bf16 %v594_v8, %v594_v8  ;;  %v1109_v13 = vpack.c.bf16 %v658_v9, %v658_v9 }
 0x17f   : > { %841 = vst.msk [vmem:[%s1704_s20 + $0xc] sm:$0xf] %vm837_vm1, %v1093_v12  ;;  %857 = vst.msk [vmem:[%s1704_s20 + $0x4c] sm:$0xf] %vm837_vm1, %v1109_v13 }
 0x180   : > { %v598_v14 = vpop.f32.mrb[8].mxu0  ;;  %v662_v15 = vpop.f32.mrb[8].mxu1 }
 0x181   : > { %v599_v16 = vadd.f32 %v1697_v45, %v598_v14  ;;  %v663_v17 = vadd.f32 %v1697_v45, %v662_v15  ;;  %v600_v18 = vpop.f32.mrb[9].mxu0  ;;  %v664_v19 = vpop.f32.mrb[9].mxu1 }
 0x182   : > { %v601_v20 = vpop.f32.mrb[10].mxu0  ;;  %v665_v21 = vpop.f32.mrb[10].mxu1 }
 0x183   : > { %v1094_v22 = vpack.c.bf16 %v599_v16, %v599_v16  ;;  %v1110_v23 = vpack.c.bf16 %v663_v17, %v663_v17  ;;  %v602_v24 = vadd.f32 %v1697_v45, %v601_v20  ;;  %v666_v25 = vadd.f32 %v1697_v45, %v665_v21  ;;  %v603_v26 = vpop.f32.mrb[11].mxu0  ;;  %v667_v27 = vpop.f32.mrb[11].mxu1 }
 0x185   : > { %842 = vst.msk [vmem:[%s1704_s20 + $0x10] sm:$0xf] %vm837_vm1, %v1094_v22  ;;  %858 = vst.msk [vmem:[%s1704_s20 + $0x50] sm:$0xf] %vm837_vm1, %v1110_v23  ;;  %v1095_v28 = vpack.c.bf16 %v602_v24, %v602_v24  ;;  %v1111_v29 = vpack.c.bf16 %v666_v25, %v666_v25 }
 0x187   : > { %843 = vst.msk [vmem:[%s1704_s20 + $0x14] sm:$0xf] %vm837_vm1, %v1095_v28  ;;  %859 = vst.msk [vmem:[%s1704_s20 + $0x54] sm:$0xf] %vm837_vm1, %v1111_v29 }
 0x188   : > { %v606_v30 = vpop.f32.mrb[12].mxu0  ;;  %v670_v31 = vpop.f32.mrb[12].mxu1 }
 0x189   : > { %v607_v32 = vadd.f32 %v1697_v45, %v606_v30  ;;  %v671_v33 = vadd.f32 %v1697_v45, %v670_v31  ;;  %v608_v34 = vpop.f32.mrb[13].mxu0  ;;  %v672_v35 = vpop.f32.mrb[13].mxu1 }
 0x18a   : > { %v609_v36 = vpop.f32.mrb[14].mxu0  ;;  %v673_v37 = vpop.f32.mrb[14].mxu1 }
 0x18b   : > { %v1096_v38 = vpack.c.bf16 %v607_v32, %v607_v32  ;;  %v1112_v39 = vpack.c.bf16 %v671_v33, %v671_v33  ;;  %v610_v40 = vadd.f32 %v1697_v45, %v609_v36  ;;  %v674_v41 = vadd.f32 %v1697_v45, %v673_v37  ;;  %v611_v42 = vpop.f32.mrb[15].mxu0  ;;  %v675_v43 = vpop.f32.mrb[15].mxu1 }
 0x18d   : > { %844 = vst.msk [vmem:[%s1704_s20 + $0x18] sm:$0xf] %vm837_vm1, %v1096_v38  ;;  %860 = vst.msk [vmem:[%s1704_s20 + $0x58] sm:$0xf] %vm837_vm1, %v1112_v39  ;;  %v1097_v44 = vpack.c.bf16 %v610_v40, %v610_v40  ;;  %v1113_v46 = vpack.c.bf16 %v674_v41, %v674_v41 }
 0x18f   : > { %845 = vst.msk [vmem:[%s1704_s20 + $0x1c] sm:$0xf] %vm837_vm1, %v1097_v44  ;;  %861 = vst.msk [vmem:[%s1704_s20 + $0x5c] sm:$0xf] %vm837_vm1, %v1113_v46 }
 0x190   : > { %v614_v47 = vpop.f32.mrb[16].mxu0  ;;  %v678_v48 = vpop.f32.mrb[16].mxu1 }
 0x191   : > { %v615_v49 = vadd.f32 %v1697_v45, %v614_v47  ;;  %v679_v50 = vadd.f32 %v1697_v45, %v678_v48  ;;  %v616_v51 = vpop.f32.mrb[17].mxu0  ;;  %v680_v52 = vpop.f32.mrb[17].mxu1 }
 0x192   : > { %v617_v53 = vpop.f32.mrb[18].mxu0  ;;  %v681_v54 = vpop.f32.mrb[18].mxu1 }
 0x193   : > { %v1098_v55 = vpack.c.bf16 %v615_v49, %v615_v49  ;;  %v1114_v56 = vpack.c.bf16 %v679_v50, %v679_v50  ;;  %v618_v57 = vadd.f32 %v1697_v45, %v617_v53  ;;  %v682_v58 = vadd.f32 %v1697_v45, %v681_v54  ;;  %v619_v59 = vpop.f32.mrb[19].mxu0  ;;  %v683_v60 = vpop.f32.mrb[19].mxu1 }
 0x195   : > { %846 = vst.msk [vmem:[%s1704_s20 + $0x20] sm:$0xf] %vm837_vm1, %v1098_v55  ;;  %862 = vst.msk [vmem:[%s1704_s20 + $0x60] sm:$0xf] %vm837_vm1, %v1114_v56  ;;  %v1099_v61 = vpack.c.bf16 %v618_v57, %v618_v57  ;;  %v1115_v62 = vpack.c.bf16 %v682_v58, %v682_v58 }
 0x197   : > { %847 = vst.msk [vmem:[%s1704_s20 + $0x24] sm:$0xf] %vm837_vm1, %v1099_v61  ;;  %863 = vst.msk [vmem:[%s1704_s20 + $0x64] sm:$0xf] %vm837_vm1, %v1115_v62 }
 0x198   : > { %v622_v63 = vpop.f32.mrb[20].mxu0  ;;  %v686_v0 = vpop.f32.mrb[20].mxu1 }
 0x199   : > { %v623_v1 = vadd.f32 %v1697_v45, %v622_v63  ;;  %v687_v2 = vadd.f32 %v1697_v45, %v686_v0  ;;  %v624_v3 = vpop.f32.mrb[21].mxu0  ;;  %v688_v4 = vpop.f32.mrb[21].mxu1 }
 0x19a   : > { %v625_v5 = vpop.f32.mrb[22].mxu0  ;;  %v689_v6 = vpop.f32.mrb[22].mxu1 }
 0x19b   : > { %v1100_v7 = vpack.c.bf16 %v623_v1, %v623_v1  ;;  %v1116_v8 = vpack.c.bf16 %v687_v2, %v687_v2  ;;  %v626_v9 = vadd.f32 %v1697_v45, %v625_v5  ;;  %v690_v10 = vadd.f32 %v1697_v45, %v689_v6  ;;  %v627_v11 = vpop.f32.mrb[23].mxu0  ;;  %v691_v12 = vpop.f32.mrb[23].mxu1 }
 0x19d   : > { %848 = vst.msk [vmem:[%s1704_s20 + $0x28] sm:$0xf] %vm837_vm1, %v1100_v7  ;;  %864 = vst.msk [vmem:[%s1704_s20 + $0x68] sm:$0xf] %vm837_vm1, %v1116_v8  ;;  %v1101_v13 = vpack.c.bf16 %v626_v9, %v626_v9  ;;  %v1117_v14 = vpack.c.bf16 %v690_v10, %v690_v10 }
 0x19f   : > { %849 = vst.msk [vmem:[%s1704_s20 + $0x2c] sm:$0xf] %vm837_vm1, %v1101_v13  ;;  %865 = vst.msk [vmem:[%s1704_s20 + $0x6c] sm:$0xf] %vm837_vm1, %v1117_v14 }
 0x1a0   : > { %v630_v15 = vpop.f32.mrb[24].mxu0  ;;  %v694_v16 = vpop.f32.mrb[24].mxu1 }
 0x1a1   : > { %v631_v17 = vadd.f32 %v1697_v45, %v630_v15  ;;  %v695_v18 = vadd.f32 %v1697_v45, %v694_v16  ;;  %v632_v19 = vpop.f32.mrb[25].mxu0  ;;  %v696_v20 = vpop.f32.mrb[25].mxu1 }
 0x1a2   : > { %v633_v21 = vpop.f32.mrb[26].mxu0  ;;  %v697_v22 = vpop.f32.mrb[26].mxu1 }
 0x1a3   : > { %v1102_v23 = vpack.c.bf16 %v631_v17, %v631_v17  ;;  %v1118_v24 = vpack.c.bf16 %v695_v18, %v695_v18  ;;  %v634_v25 = vadd.f32 %v1697_v45, %v633_v21  ;;  %v698_v26 = vadd.f32 %v1697_v45, %v697_v22  ;;  %v635_v27 = vpop.f32.mrb[27].mxu0  ;;  %v699_v28 = vpop.f32.mrb[27].mxu1 }
 0x1a5   : > { %850 = vst.msk [vmem:[%s1704_s20 + $0x30] sm:$0xf] %vm837_vm1, %v1102_v23  ;;  %866 = vst.msk [vmem:[%s1704_s20 + $0x70] sm:$0xf] %vm837_vm1, %v1118_v24  ;;  %v1103_v29 = vpack.c.bf16 %v634_v25, %v634_v25  ;;  %v1119_v30 = vpack.c.bf16 %v698_v26, %v698_v26 }
 0x1a7   : > { %851 = vst.msk [vmem:[%s1704_s20 + $0x34] sm:$0xf] %vm837_vm1, %v1103_v29  ;;  %867 = vst.msk [vmem:[%s1704_s20 + $0x74] sm:$0xf] %vm837_vm1, %v1119_v30 }
 0x1a8   : > { %v638_v31 = vpop.f32.mrb[28].mxu0  ;;  %v702_v32 = vpop.f32.mrb[28].mxu1 }
 0x1a9   : > { %v639_v33 = vadd.f32 %v1697_v45, %v638_v31  ;;  %v703_v34 = vadd.f32 %v1697_v45, %v702_v32  ;;  %v640_v35 = vpop.f32.mrb[29].mxu0  ;;  %v704_v36 = vpop.f32.mrb[29].mxu1 }
 0x1aa   : > { %v641_v37 = vpop.f32.mrb[30].mxu0  ;;  %v705_v38 = vpop.f32.mrb[30].mxu1 }
 0x1ab   : > { %v1104_v39 = vpack.c.bf16 %v639_v33, %v639_v33  ;;  %v1120_v40 = vpack.c.bf16 %v703_v34, %v703_v34  ;;  %v642_v41 = vadd.f32 %v1697_v45, %v641_v37  ;;  %v706_v42 = vadd.f32 %v1697_v45, %v705_v38  ;;  %v643_v43 = vpop.f32.mrb[31].mxu0  ;;  %v707_v44 = vpop.f32.mrb[31].mxu1 }
 0x1ad   : > { %852 = vst.msk [vmem:[%s1704_s20 + $0x38] sm:$0xf] %vm837_vm1, %v1104_v39  ;;  %868 = vst.msk [vmem:[%s1704_s20 + $0x78] sm:$0xf] %vm837_vm1, %v1120_v40  ;;  %v1105_v46 = vpack.c.bf16 %v642_v41, %v642_v41  ;;  %v1121_v47 = vpack.c.bf16 %v706_v42, %v706_v42 }
 0x1af   : > { %853 = vst.msk [vmem:[%s1704_s20 + $0x3c] sm:$0xf] %vm837_vm1, %v1105_v46  ;;  %869 = vst.msk [vmem:[%s1704_s20 + $0x7c] sm:$0xf] %vm837_vm1, %v1121_v47 }
 0x1b0   : > { %1380 = shalt.err (!%p1377_p7)
}
 0x1b1   : > { %s1381_s11 = scalar_lea.hbm %s1795_s23, 2048  ;;  %s1385_s29 = scalar_lea.hbm %s1851_s3, 32768 }
 0x1b2   : > { %p1382_p9 = scmp.ne.s32.totalorder %s1795_s23, %s1381_s11  ;;  %p1386_p5 = scmp.lt.u32.totalorder %s1795_s23, %s1851_s3 }
 0x1b3   : > { %p1387_p10 = scmp.lt.u32.totalorder %s1385_s29, %s1381_s11  ;;  %p1389_p1 = scmp.lt.u32.totalorder %s1381_s11, %s1795_s23 }
 0x1b4   : > { %p1383_p12 = pnand %p1382_p9, %p1583_p4 }
 0x1b5   : > { %p1388_p11 = por %p1387_p10, %p1386_p5 }
 0x1b6   : > { %p1384_p0 = pneg %p1383_p12 }
 0x1b7   : > { %p1390_p2 = por %p1389_p1, %p1388_p11 }
 0x1b9   : > { %p1391_p6 = pnand %p1390_p2, %p1384_p0 }
 0x1bb   : > { %1394 = shalt.err (!%p1391_p6)
}
 0x1bc   : > { %s1448_s18 = smov 64   ;;  %s1449_s20 = smov 4  }
 0x1bd   : > { %1157 = dma.vmem_to_hbm [thread:$0]  (%p1583_p4), %s1797_s26, 2048, %s1795_s23, %s871_s16, %s1448_s18, %s1448_s18, %s1449_s20  }
 0x1be PF: > { %p1179_p8 = scmp.ge.s32.totalorder %s1437_s15, 2  ;;  %s899_s21 = sand.u32 1, %s1425_s12  }
 0x1bf   : > { %p1866_p13 = scmp.ne.s32.totalorder %s1856_s19, 0  ;;  %s900_s27 = scalar_lea.sflag [#allocation4], %s899_s21 }
 0x1c1   : > { %p1171_p3 = pnand %p1179_p8, %p1866_p13 }
 0x1c3   : > { %1420 = dma.done.wait (!%p1171_p3), %s900_s27, 2048  }
 0x1c4   : > { %1422 = vsyncadd (!%p1171_p3), %s900_s27, 4294965248  ;;  %p17_p7 = scmp.ge.s32.totalorder %s1573_s5, 18   ;;  %s1867_s12 = smov %s1429_s13 }
 0x1c5   : > { %s1868_s13 = smov %s1433_s14  ;;  %s1869_s14 = smov %s1589_s8 }
 0x1c6   : > { %s1870_s15 = smov %s1573_s5  ;;  %19 = sbr.rel (!%p17_p7) target bundleno = 6 (0x6), region = 85 }
 0x1cd   :  { %905 = vsyncpa [#allocation3], 1 }
 0x1ce   :  { %907 = vsyncpa [#allocation3 + $0x1], 1 }
 0x1cf   :  { %908 = vsyncpa [#allocation6], 1 }
 0x1d0   :  { %909 = vsyncpa [#allocation4], 1 }
 0x1d1   :  { %911 = vsyncpa [#allocation4 + $0x1], 1 }

// kernel: forward.5
= control target key start
LH: loop header
LB: loop body
LE: loop exit
PB: predicated region body
PF: predicated region fallthrough
CT: control target
= control target key end

     0   :  { %8 = vsyncpa [#allocation3], 0  ;;  %s1623_s0 = inlined_call_operand.hbm [shape: bf16[16384,192], index: 0, kind: input, shape index: {}]   ;;  %s1624_s1 = inlined_call_operand.hbm [shape: bf16[192,64], index: 1, kind: input, shape index: {}]   ;;  %s1625_s2 = inlined_call_operand.hbm [shape: f32[1,64], index: 2, kind: input, shape index: {}]   ;;  %s1626_s3 = inlined_call_operand.hbm [shape: bf16[16384,64], index: 3, kind: output, shape index: {}]  }
   0x1   :  { %10 = vsyncpa [#allocation3 + $0x1], 0 }
   0x2   :  { %11 = vsyncpa [#allocation6], 0 }
   0x3   :  { %12 = vsyncpa [#allocation4], 0 }
   0x4   :  { %14 = vsyncpa [#allocation4 + $0x1], 0  ;;  %s1277_s12 = smov 0   ;;  %s1279_s13 = smov 0  }
   0x5   :  { %s1281_s14 = smov 0   ;;  %s1283_s15 = smov 0  }
   0x6 LB: > { %s1298_s16 = sadd.s32 4294967295, %s1244_s15   ;;  %s847_s17 = sadd.s32 4294967294, %s1244_s15   ;;  %s1244_s15 = sphi %s1283_s15, %s1645_s15   ;;  %s1240_s14 = sphi %s1281_s14, %s1644_s14   ;;  %s1236_s13 = sphi %s1279_s13, %s1643_s13   ;;  %s1232_s12 = sphi %s1277_s12, %s1642_s12  }
   0x7   : > { %p40_p0 = scmp.ne.s32.totalorder %s1236_s13, %s1232_s12  ;;  %p1627_p1 = scmp.eq.s32.totalorder %s1298_s16, 0 }
   0x8   : > { %p112_p3 = scmp.eq.s32.totalorder %s847_s17, 63  ;;  %p848_p5 = scmp.ge.s32.totalorder %s1244_s15, 1 }
   0x9   : > { %p1307_p4 = por %p1627_p1, %p40_p0  ;;  %p119_p7 = scmp.lt.s32.totalorder %s1244_s15, 65 }
   0xa   : > { %p1312_p6 = por %p112_p3, %p40_p0  ;;  %s1246_s21 = smov [#allocation5]  }
   0xb   : > { %s1630_s18 = scalar_select %p1307_p4, 1, 0 }
   0xc   : > { %s1631_s19 = scalar_select %p1312_p6, 1, 0 }
   0xd   : > { %p1317_p8 = pnand %p848_p5, %p119_p7  ;;  %s131_s22 = sshll.u32 %s1246_s21, 4  ;;  %s132_s22 = int_to_ptr.vmem [resolvable:$true] %s131_s22 }
   0xe   : > { %s1247_s24 = smov [#allocation7]   ;;  %s1088_s28 = scalar_lea.hbm %s1624_s1, 1536 }
   0xf   : > { %s1632_s20 = scalar_select %p1317_p8, 1, 0 }
  0x10   : > { %p966_p9 = pneg %p1317_p8  ;;  %s145_s25 = sshll.u32 %s1247_s24, 4  ;;  %s1329_s25 = int_to_ptr.vmem [resolvable:$true] %s145_s25 }
  0x11   : > { %p1089_p11 = scmp.ne.s32.totalorder %s1624_s1, %s1088_s28  ;;  %p1095_p3 = scmp.lt.u32.totalorder %s1088_s28, %s1624_s1 }
  0x12   : > { %p1325_p10 = pnand %p966_p9, %p1627_p1 }
  0x14   : > { %p1090_p12 = pneg %p1325_p10 }
  0x16   : > { %p1091_p13 = pnand %p1090_p12, %p1089_p11 }
  0x18   : > { %p1092_p0 = pneg %p1091_p13 }
  0x1a   : > { %p1097_p5 = pnand %p1095_p3, %p1092_p0 }
  0x1c   : > { %1100 = shalt.err (!%p1097_p5)
}
  0x1d   : > { %s1101_s6 = scalar_lea.vmem %s132_s22, 1536  ;;  %p1109_p2 = scmp.lt.s32.totalorder %s132_s22, %s132_s22 }
  0x1e   : > { %p1102_p7 = scmp.ne.s32.totalorder %s132_s22, %s1101_s6  ;;  %p1110_p6 = scmp.lt.s32.totalorder %s1101_s6, %s1101_s6 }
  0x20   : > { %p1104_p9 = pnand %p1102_p7, %p1090_p12  ;;  %p1111_p4 = por %p1110_p6, %p1109_p2 }
  0x22   : > { %p1105_p1 = pneg %p1104_p9 }
  0x24   : > { %p1112_p8 = pnand %p1111_p4, %p1105_p1 }
  0x26   : > { %1115 = shalt.err (!%p1112_p8)
}
  0x27   : > { %s1248_s7 = smov 64   ;;  %s1249_s8 = smov 4  }
  0x28   : > { %969 = dma.hbm_to_vmem [thread:$0]  (!%p1325_p10), %s1624_s1, 1536, %s132_s22, [#allocation6], %s1248_s7, %s1248_s7, %s1249_s8  }
  0x29   : > { %s1116_s21 = scalar_lea.hbm %s1625_s2, 16 }
  0x2a   : > { %p1117_p11 = scmp.ne.s32.totalorder %s1625_s2, %s1116_s21  ;;  %p1123_p4 = scmp.lt.u32.totalorder %s1116_s21, %s1625_s2 }
  0x2c   : > { %p1119_p1 = pnand %p1117_p11, %p1090_p12 }
  0x2e   : > { %p1120_p2 = pneg %p1119_p1 }
  0x30   : > { %p1125_p6 = pnand %p1123_p4, %p1120_p2 }
  0x32   : > { %1128 = shalt.err (!%p1125_p6)
}
  0x33   : > { %s1129_s22 = scalar_lea.vmem %s1329_s25, 16  ;;  %s1136_s29 = scalar_lea.vmem %s1329_s25, 32 }
  0x34   : > { %p1130_p8 = scmp.ne.s32.totalorder %s1329_s25, %s1129_s22  ;;  %p1137_p3 = scmp.lt.s32.totalorder %s1329_s25, %s1329_s25 }
  0x35   : > { %p1138_p5 = scmp.lt.s32.totalorder %s1136_s29, %s1129_s22 }
  0x36   : > { %p1132_p13 = pnand %p1130_p8, %p1090_p12 }
  0x37   : > { %p1139_p7 = por %p1138_p5, %p1137_p3 }
  0x38   : > { %p1133_p0 = pneg %p1132_p13 }
  0x3a   : > { %p1140_p9 = pnand %p1139_p7, %p1133_p0 }
  0x3c   : > { %1143 = shalt.err (!%p1140_p9)
}
  0x3d   : > { %972 = dma.hbm_to_vmem [thread:$0]  (!%p1325_p10), %s1625_s2, 16, %s1329_s25, [#allocation6]  }
  0x3e   : > { %s1380_s5 = sadd.s32 1, %s1244_s15   ;;  %s27_s23 = sadd.s32 1, %s1240_s14 }
  0x3f   : > { %s24_s6 = ssub.s32 %s1244_s15, %s1380_s5  ;;  %p34_p12 = scmp.ne.s32.totalorder %s1240_s14, %s1236_s13 }
  0x40   : > { %p25_p11 = scmp.eq.s32.totalorder %s24_s6, 0  ;;  %p35_p1 = scmp.eq.s32.totalorder %s1244_s15, 0 }
  0x41   : > { %p1634_p2 = scmp.eq.s32.totalorder %s1298_s16, 63  ;;  %p983_p6 = scmp.lt.s32.totalorder %s1244_s15, 64 }
  0x42   : > { %s1396_s8 = scalar_select %p25_p11, %s1240_s14, %s27_s23  }
  0x43   : > { %p1390_p4 = por %p1634_p2, %p34_p12  ;;  %p36_p8 = por %p35_p1, %p34_p12 }
  0x44   : > { %s156_s9 = sand.u32 1, %s1240_s14   ;;  %s928_s25 = sshll.u32 %s1244_s15, 12 }
  0x45   : > { %s852_s10 = sshll.u32 %s156_s9, 8  ;;  %s1403_s21 = scalar_lea.hbm %s1623_s0, %s928_s25 }
  0x46   : > { %s160_s24 = scalar_lea.vmem [#allocation2], %s852_s10  ;;  %p1407_p10 = pnand %p983_p6, %p36_p8 }
  0x47   : > { %s168_s26 = sshll.u32 %s160_s24, 4  ;;  %s1411_s28 = scalar_lea.sflag [#allocation3], %s156_s9  ;;  %s1405_s26 = int_to_ptr.vmem [resolvable:$true] %s168_s26 }
  0x48   : > { %s1144_s22 = scalar_lea.hbm %s1403_s21, 4096  ;;  %p1146_p0 = pneg %p1407_p10 }
  0x49   : > { %p1145_p13 = scmp.ne.s32.totalorder %s1403_s21, %s1144_s22  ;;  %s1149_s4 = scalar_lea.hbm %s1623_s0, 262144 }
  0x4a   : > { %p1150_p7 = scmp.lt.u32.totalorder %s1403_s21, %s1623_s0  ;;  %p1151_p9 = scmp.lt.u32.totalorder %s1149_s4, %s1144_s22 }
  0x4b   : > { %p1147_p3 = pnand %p1146_p0, %p1145_p13  ;;  %p1153_p11 = scmp.lt.u32.totalorder %s1144_s22, %s1403_s21 }
  0x4c   : > { %p1152_p12 = por %p1151_p9, %p1150_p7 }
  0x4d   : > { %p1148_p5 = pneg %p1147_p3 }
  0x4e   : > { %p1154_p1 = por %p1153_p11, %p1152_p12 }
  0x50   : > { %p1155_p2 = pnand %p1154_p1, %p1148_p5 }
  0x52   : > { %1158 = shalt.err (!%p1155_p2)
}
  0x53   : > { %s1159_s9 = scalar_lea.vmem %s1405_s26, 4096  ;;  %s1250_s10 = smov [#allocation2]  }
  0x54   : > { %p1160_p6 = scmp.ne.s32.totalorder %s1405_s26, %s1159_s9  ;;  %s1164_s25 = sshll.u32 %s1250_s10, 4  ;;  %s1165_s25 = int_to_ptr.vmem [resolvable:$false] %s1164_s25 }
  0x55   : > { %s1166_s11 = scalar_lea.vmem %s1165_s25, 8192  ;;  %p1167_p3 = scmp.lt.s32.totalorder %s1405_s26, %s1165_s25 }
  0x56   : > { %p1162_p8 = pnand %p1160_p6, %p1146_p0  ;;  %p1168_p7 = scmp.lt.s32.totalorder %s1166_s11, %s1159_s9 }
  0x58   : > { %p1163_p13 = pneg %p1162_p8  ;;  %p1169_p9 = por %p1168_p7, %p1167_p3 }
  0x5a   : > { %p1170_p12 = pnand %p1169_p9, %p1163_p13 }
  0x5c   : > { %1173 = shalt.err (!%p1170_p12)
}
  0x5d   : > { %s1251_s17 = smov 128   ;;  %s1252_s24 = smov 8  }
  0x5e   : > { %976 = dma.hbm_to_vmem [thread:$0]  (!%p1407_p10), %s1403_s21, 4096, %s1405_s26, %s1411_s28, %s1251_s17, %s1251_s17, %s1252_s24  }
  0x5f   : > { %p1637_p0 = scmp.ne.s32.totalorder %s1632_s20, 0 }
  0x60   : > { %s1442_s22 = sand.u32 (!%p1637_p0), 1, %s1236_s13   ;;  %p1638_p5 = scmp.ne.s32.totalorder (!%p1637_p0), %s1630_s18, 0 }
  0x61   : > { %180 = sbr.rel (%p1637_p0) target bundleno = 446 (0x1be), region = 32  ;;  %s857_s29 = sshll.u32 (!%p1637_p0), %s1442_s22, 8 }
  0x62   : > { %s183_s30 = scalar_lea.sflag (!%p1637_p0), [#allocation3], %s1442_s22  ;;  %s1446_s4 = scalar_lea.vmem (!%p1637_p0), [#allocation2], %s857_s29 }
  0x68   : > { %1219 = dma.done.wait (%p1638_p5), %s183_s30, 4096  }
  0x69   : > { %1221 = vsyncadd (%p1638_p5), %s183_s30, 4294963200  ;;  %p1639_p10 = scmp.eq.s32.totalorder %s1298_s16, 0 }
  0x6b   : > { %1223 = dma.done.wait (%p1639_p10), [#allocation6], 1552   ;;  %p1640_p11 = pmov %p1639_p10 }
  0x6c   : > { %v1253_v0 = vmov 0   ;;  %v1028_v1 = vld [vmem:[#allocation5] sm:$0xff]   ;;  %v1029_v2 = vld [vmem:[#allocation5 + $0x8] sm:$0xff]   ;;  %v1030_v3 = vld [vmem:[#allocation5 + $0x10] sm:$0xff]   ;;  %vm499_vm0 = vcmask 523264   ;;  %s860_s18 = sshll.u32 %s1442_s22, 7 }
  0x6d   : > { %1225 = vsyncadd (%p1640_p11), [#allocation6], 4294965744  ;;  %548 = vmatprep.subr.bf16.mxu0 %v1253_v0  ;;  %930 = vmatprep.subr.bf16.mxu1 %v1253_v0  ;;  %v1031_v4 = vld [vmem:[#allocation5 + $0x18] sm:$0xff]   ;;  %v1042_v5 = vld [vmem:[%s1446_s4 + $0x4] ss:$8 sps:$4 sm:$0xff]   ;;  %s1511_s20 = scalar_lea.vmem [#allocation8], %s860_s18 }
  0x6e   : > { %549 = vmatpush1.bf16.msra.mxu0 %v1028_v1  ;;  %942 = vmatpush1.bf16.msra.mxu1 %v1028_v1  ;;  %v1032_v6 = vld [vmem:[#allocation5 + $0x20] sm:$0xff]   ;;  %v1033_v8 = vld [vmem:[#allocation5 + $0x28] sm:$0xff]   ;;  %v1034_v9 = vld [vmem:[#allocation5 + $0x30] sm:$0xff]   ;;  %s929_s21 = sshll.u32 %s1298_s16, 11  ;;  %s755_s26 = sshll.u32 %s1511_s20, 4  ;;  %s1576_s26 = int_to_ptr.vmem [resolvable:$true] %s755_s26 }
  0x6f   : > { %550 = vmatprep.subr.bf16.mxu0 %v1253_v0  ;;  %931 = vmatprep.subr.bf16.mxu1 %v1253_v0  ;;  %v1045_v7 = vld [vmem:[%s1446_s4 + $0x84] ss:$8 sps:$4 sm:$0xff]   ;;  %v1035_v10 = vld [vmem:[#allocation5 + $0x38] sm:$0xff]   ;;  %v1038_v13 = vld [vmem:[#allocation5 + $0x50] sm:$0xff]   ;;  %s1574_s23 = scalar_lea.hbm %s1626_s3, %s929_s21  ;;  %s742_s16 = scalar_lea.sflag [#allocation4], %s1442_s22 }
  0x70   : > { %906 = vmatprep.mubr.msk.bf16.mxu0 %vm499_vm0, %v1042_v5  ;;  %914 = vmatprep.mubr.msk.bf16.mxu1 %vm499_vm0, %v1045_v7  ;;  %v1036_v11 = vld [vmem:[#allocation5 + $0x40] sm:$0xff]   ;;  %v1037_v12 = vld [vmem:[#allocation5 + $0x48] sm:$0xff]   ;;  %v1039_v14 = vld [vmem:[#allocation5 + $0x58] sm:$0xff]   ;;  %s1174_s6 = scalar_lea.vmem %s1576_s26, 2048  ;;  %s1254_s9 = smov [#allocation8]  }
  0x71   : > { %v1040_v15 = vld [vmem:[%s1446_s4] ss:$8 sps:$4 sm:$0xff]   ;;  %v1046_v17 = vld [vmem:[%s1446_s4 + $0x14] ss:$8 sps:$4 sm:$0xff]   ;;  %v1050_v19 = vld [vmem:[%s1446_s4 + $0x10] ss:$8 sps:$4 sm:$0xff]   ;;  %p1175_p1 = scmp.ne.s32.totalorder %s1576_s26, %s1174_s6 }
  0x72   : > { %551 = vmatpush1.bf16.msra.mxu0 %v1029_v2  ;;  %943 = vmatpush1.bf16.msra.mxu1 %v1029_v2  ;;  %v1043_v16 = vld [vmem:[%s1446_s4 + $0x80] ss:$8 sps:$4 sm:$0xff]   ;;  %v1048_v18 = vld [vmem:[%s1446_s4 + $0x94] ss:$8 sps:$4 sm:$0xff]   ;;  %v1051_v20 = vld [vmem:[%s1446_s4 + $0x90] ss:$8 sps:$4 sm:$0xff]  }
  0x73   : > { %552 = vmatprep.subr.bf16.mxu0 %v1253_v0  ;;  %932 = vmatprep.subr.bf16.mxu1 %v1253_v0  ;;  %v1052_v21 = vld [vmem:[%s1446_s4 + $0x24] ss:$8 sps:$4 sm:$0xff]   ;;  %v1056_v23 = vld [vmem:[%s1446_s4 + $0x20] ss:$8 sps:$4 sm:$0xff]   ;;  %v1058_v25 = vld [vmem:[%s1446_s4 + $0x34] ss:$8 sps:$4 sm:$0xff]   ;;  %p1176_p2 = pnand %p1175_p1, %p1390_p4 }
  0x74   : > { %v1054_v22 = vld [vmem:[%s1446_s4 + $0xa4] ss:$8 sps:$4 sm:$0xff]   ;;  %v1057_v24 = vld [vmem:[%s1446_s4 + $0xa0] ss:$8 sps:$4 sm:$0xff]   ;;  %v1060_v26 = vld [vmem:[%s1446_s4 + $0xb4] ss:$8 sps:$4 sm:$0xff]  }
  0x75   : > { %v1062_v27 = vld [vmem:[%s1446_s4 + $0x30] ss:$8 sps:$4 sm:$0xff]   ;;  %v1064_v29 = vld [vmem:[%s1446_s4 + $0x44] ss:$8 sps:$4 sm:$0xff]   ;;  %v1068_v31 = vld [vmem:[%s1446_s4 + $0x40] ss:$8 sps:$4 sm:$0xff]   ;;  %p1177_p6 = pneg %p1176_p2 }
  0x76   : > { %553 = vmatpush1.bf16.msra.mxu0 %v1030_v3  ;;  %944 = vmatpush1.bf16.msra.mxu1 %v1030_v3  ;;  %v1063_v28 = vld [vmem:[%s1446_s4 + $0xb0] ss:$8 sps:$4 sm:$0xff]   ;;  %v1066_v30 = vld [vmem:[%s1446_s4 + $0xc4] ss:$8 sps:$4 sm:$0xff]   ;;  %v1069_v32 = vld [vmem:[%s1446_s4 + $0xc0] ss:$8 sps:$4 sm:$0xff]  }
  0x77   : > { %554 = vmatprep.subr.bf16.mxu0 %v1253_v0  ;;  %933 = vmatprep.subr.bf16.mxu1 %v1253_v0  ;;  %v1070_v33 = vld [vmem:[%s1446_s4 + $0x54] ss:$8 sps:$4 sm:$0xff]   ;;  %v1074_v35 = vld [vmem:[%s1446_s4 + $0x50] ss:$8 sps:$4 sm:$0xff]   ;;  %v1076_v37 = vld [vmem:[%s1446_s4 + $0x64] ss:$8 sps:$4 sm:$0xff]  }
  0x78   : > { %v1072_v34 = vld [vmem:[%s1446_s4 + $0xd4] ss:$8 sps:$4 sm:$0xff]   ;;  %v1075_v36 = vld [vmem:[%s1446_s4 + $0xd0] ss:$8 sps:$4 sm:$0xff]   ;;  %v1078_v38 = vld [vmem:[%s1446_s4 + $0xe4] ss:$8 sps:$4 sm:$0xff]  }
  0x79   : > { %v1080_v39 = vld [vmem:[%s1446_s4 + $0x60] ss:$8 sps:$4 sm:$0xff]   ;;  %v1082_v41 = vld [vmem:[%s1446_s4 + $0x74] ss:$8 sps:$4 sm:$0xff]   ;;  %v1086_v43 = vld [vmem:[%s1446_s4 + $0x70] ss:$8 sps:$4 sm:$0xff]  }
  0x7a   : > { %555 = vmatpush1.bf16.msra.mxu0 %v1031_v4  ;;  %945 = vmatpush1.bf16.msra.mxu1 %v1031_v4  ;;  %v1081_v40 = vld [vmem:[%s1446_s4 + $0xe0] ss:$8 sps:$4 sm:$0xff]   ;;  %v1084_v42 = vld [vmem:[%s1446_s4 + $0xf4] ss:$8 sps:$4 sm:$0xff]   ;;  %v1087_v44 = vld [vmem:[%s1446_s4 + $0xf0] ss:$8 sps:$4 sm:$0xff]  }
  0x7b   : > { %556 = vmatprep.subr.bf16.mxu0 %v1253_v0  ;;  %934 = vmatprep.subr.bf16.mxu1 %v1253_v0  ;;  %v1504_v45 = vld [vmem:[#allocation7] ss:$0 sm:$0xff]  ;;  %s1178_s10 = sshll.u32 %s1254_s9, 4  ;;  %s1179_s10 = int_to_ptr.vmem [resolvable:$false] %s1178_s10 }
  0x7c   : > { %s1180_s25 = scalar_lea.vmem %s1179_s10, 4096  ;;  %p1181_p8 = scmp.lt.s32.totalorder %s1576_s26, %s1179_s10 }
  0x7d   : > { %p1182_p13 = scmp.lt.s32.totalorder %s1180_s25, %s1174_s6 }
  0x7e   : > { %557 = vmatpush1.bf16.msra.mxu0 %v1032_v6  ;;  %946 = vmatpush1.bf16.msra.mxu1 %v1032_v6 }
  0x7f   : > { %558 = vmatprep.subr.bf16.mxu0 %v1253_v0  ;;  %935 = vmatprep.subr.bf16.mxu1 %v1253_v0  ;;  %p1183_p3 = por %p1182_p13, %p1181_p8 }
  0x81   : > { %p1184_p7 = pnand %p1183_p3, %p1177_p6 }
  0x82   : > { %559 = vmatpush1.bf16.msra.mxu0 %v1033_v8  ;;  %947 = vmatpush1.bf16.msra.mxu1 %v1033_v8 }
  0x83   : > { %560 = vmatprep.subr.bf16.mxu0 %v1253_v0  ;;  %936 = vmatprep.subr.bf16.mxu1 %v1253_v0 }
  0x86   : > { %561 = vmatpush1.bf16.msra.mxu0 %v1034_v9  ;;  %948 = vmatpush1.bf16.msra.mxu1 %v1034_v9 }
  0x87   : > { %562 = vmatprep.subr.bf16.mxu0 %v1253_v0  ;;  %937 = vmatprep.subr.bf16.mxu1 %v1253_v0 }
  0x8a   : > { %563 = vmatpush1.bf16.msra.mxu0 %v1035_v10  ;;  %949 = vmatpush1.bf16.msra.mxu1 %v1035_v10 }
  0x8b   : > { %564 = vmatprep.subr.bf16.mxu0 %v1253_v0  ;;  %938 = vmatprep.subr.bf16.mxu1 %v1253_v0 }
  0x8e   : > { %565 = vmatpush1.bf16.msra.mxu0 %v1036_v11  ;;  %950 = vmatpush1.bf16.msra.mxu1 %v1036_v11 }
  0x8f   : > { %566 = vmatprep.subr.bf16.mxu0 %v1253_v0  ;;  %939 = vmatprep.subr.bf16.mxu1 %v1253_v0 }
  0x92   : > { %567 = vmatpush1.bf16.msra.mxu0 %v1037_v12  ;;  %951 = vmatpush1.bf16.msra.mxu1 %v1037_v12 }
  0x93   : > { %568 = vmatprep.subr.bf16.mxu0 %v1253_v0  ;;  %940 = vmatprep.subr.bf16.mxu1 %v1253_v0 }
  0x96   : > { %569 = vmatpush1.bf16.msra.mxu0 %v1038_v13  ;;  %952 = vmatpush1.bf16.msra.mxu1 %v1038_v13 }
  0x97   : > { %570 = vmatprep.subr.bf16.mxu0 %v1253_v0  ;;  %941 = vmatprep.subr.bf16.mxu1 %v1253_v0 }
  0x9a   : > { %571 = vmatpush1.bf16.msra.mxu0 %v1039_v14  ;;  %953 = vmatpush1.bf16.msra.mxu1 %v1039_v14 }
  0x9d   : > { %581 = vmatmul.mubr.bf16.vlgmr.msra.gmra.mrb[0].mxu0 %v1040_v15  ;;  %645 = vmatmul.mubr.bf16.vlgmr.msra.gmra.mrb[0].mxu1 %v1043_v16 }
  0x9e   : > { %907 = vmatprep.mubr.msk.bf16.mxu0 %vm499_vm0, %v1046_v17  ;;  %915 = vmatprep.mubr.msk.bf16.mxu1 %vm499_vm0, %v1048_v18 }
  0xa5   : > { %589 = vmatmul.mubr.bf16.gmra.mrb[4].mxu0 %v1050_v19  ;;  %653 = vmatmul.mubr.bf16.gmra.mrb[4].mxu1 %v1051_v20 }
  0xa6   : > { %908 = vmatprep.mubr.msk.bf16.mxu0 %vm499_vm0, %v1052_v21  ;;  %916 = vmatprep.mubr.msk.bf16.mxu1 %vm499_vm0, %v1054_v22 }
  0xad   : > { %597 = vmatmul.mubr.bf16.gmra.mrb[8].mxu0 %v1056_v23  ;;  %661 = vmatmul.mubr.bf16.gmra.mrb[8].mxu1 %v1057_v24 }
  0xae   : > { %909 = vmatprep.mubr.msk.bf16.mxu0 %vm499_vm0, %v1058_v25  ;;  %917 = vmatprep.mubr.msk.bf16.mxu1 %vm499_vm0, %v1060_v26 }
  0xb5   : > { %605 = vmatmul.mubr.bf16.gmra.mrb[12].mxu0 %v1062_v27  ;;  %669 = vmatmul.mubr.bf16.gmra.mrb[12].mxu1 %v1063_v28 }
  0xb6   : > { %910 = vmatprep.mubr.msk.bf16.mxu0 %vm499_vm0, %v1064_v29  ;;  %918 = vmatprep.mubr.msk.bf16.mxu1 %vm499_vm0, %v1066_v30 }
  0xbd   : > { %613 = vmatmul.mubr.bf16.gmra.mrb[16].mxu0 %v1068_v31  ;;  %677 = vmatmul.mubr.bf16.gmra.mrb[16].mxu1 %v1069_v32 }
  0xbe   : > { %911 = vmatprep.mubr.msk.bf16.mxu0 %vm499_vm0, %v1070_v33  ;;  %919 = vmatprep.mubr.msk.bf16.mxu1 %vm499_vm0, %v1072_v34 }
  0xc5   : > { %621 = vmatmul.mubr.bf16.gmra.mrb[20].mxu0 %v1074_v35  ;;  %685 = vmatmul.mubr.bf16.gmra.mrb[20].mxu1 %v1075_v36 }
  0xc6   : > { %912 = vmatprep.mubr.msk.bf16.mxu0 %vm499_vm0, %v1076_v37  ;;  %920 = vmatprep.mubr.msk.bf16.mxu1 %vm499_vm0, %v1078_v38 }
  0xcd   : > { %629 = vmatmul.mubr.bf16.gmra.mrb[24].mxu0 %v1080_v39  ;;  %693 = vmatmul.mubr.bf16.gmra.mrb[24].mxu1 %v1081_v40 }
  0xce   : > { %913 = vmatprep.mubr.msk.bf16.mxu0 %vm499_vm0, %v1082_v41  ;;  %921 = vmatprep.mubr.msk.bf16.mxu1 %vm499_vm0, %v1084_v42 }
  0xd5   : > { %637 = vmatmul.mubr.bf16.gmra.mrb[28].mxu0 %v1086_v43  ;;  %701 = vmatmul.mubr.bf16.gmra.mrb[28].mxu1 %v1087_v44 }
 0x170   : > { %v582_v46 = vpop.f32.mrb[0].mxu0  ;;  %v646_v47 = vpop.f32.mrb[0].mxu1 }
 0x171   : > { %v584_v48 = vpop.f32.mrb[1].mxu0  ;;  %v648_v49 = vpop.f32.mrb[1].mxu1  ;;  %v583_v52 = vadd.f32 %v1504_v45, %v582_v46  ;;  %v647_v53 = vadd.f32 %v1504_v45, %v646_v47 }
 0x172   : > { %v585_v50 = vpop.f32.mrb[2].mxu0  ;;  %v649_v51 = vpop.f32.mrb[2].mxu1 }
 0x173   : > { %v586_v54 = vadd.f32 %v1504_v45, %v585_v50  ;;  %v650_v55 = vadd.f32 %v1504_v45, %v649_v51  ;;  %v587_v56 = vpop.f32.mrb[3].mxu0  ;;  %v651_v57 = vpop.f32.mrb[3].mxu1 }
 0x175   : > { %v709_v58 = vpack.c.bf16 %v586_v54, %v583_v52  ;;  %v717_v59 = vpack.c.bf16 %v650_v55, %v647_v53 }
 0x177   : > { %725 = vst.msk [vmem:[%s1511_s20] sm:$0xff] %vm499_vm0, %v709_v58  ;;  %733 = vst.msk [vmem:[%s1511_s20 + $0x40] sm:$0xff] %vm499_vm0, %v717_v59 }
 0x178   : > { %v590_v60 = vpop.f32.mrb[4].mxu0  ;;  %v654_v61 = vpop.f32.mrb[4].mxu1 }
 0x179   : > { %v592_v62 = vpop.f32.mrb[5].mxu0  ;;  %v656_v63 = vpop.f32.mrb[5].mxu1  ;;  %v591_v2 = vadd.f32 %v1504_v45, %v590_v60  ;;  %v655_v3 = vadd.f32 %v1504_v45, %v654_v61 }
 0x17a   : > { %v593_v0 = vpop.f32.mrb[6].mxu0  ;;  %v657_v1 = vpop.f32.mrb[6].mxu1 }
 0x17b   : > { %v594_v4 = vadd.f32 %v1504_v45, %v593_v0  ;;  %v658_v5 = vadd.f32 %v1504_v45, %v657_v1  ;;  %v595_v6 = vpop.f32.mrb[7].mxu0  ;;  %v659_v7 = vpop.f32.mrb[7].mxu1 }
 0x17d   : > { %v710_v8 = vpack.c.bf16 %v594_v4, %v591_v2  ;;  %v718_v9 = vpack.c.bf16 %v658_v5, %v655_v3 }
 0x17f   : > { %726 = vst.msk [vmem:[%s1511_s20 + $0x8] sm:$0xff] %vm499_vm0, %v710_v8  ;;  %734 = vst.msk [vmem:[%s1511_s20 + $0x48] sm:$0xff] %vm499_vm0, %v718_v9 }
 0x180   : > { %v598_v10 = vpop.f32.mrb[8].mxu0  ;;  %v662_v11 = vpop.f32.mrb[8].mxu1 }
 0x181   : > { %v600_v12 = vpop.f32.mrb[9].mxu0  ;;  %v664_v13 = vpop.f32.mrb[9].mxu1  ;;  %v599_v16 = vadd.f32 %v1504_v45, %v598_v10  ;;  %v663_v17 = vadd.f32 %v1504_v45, %v662_v11 }
 0x182   : > { %v601_v14 = vpop.f32.mrb[10].mxu0  ;;  %v665_v15 = vpop.f32.mrb[10].mxu1 }
 0x183   : > { %v602_v18 = vadd.f32 %v1504_v45, %v601_v14  ;;  %v666_v19 = vadd.f32 %v1504_v45, %v665_v15  ;;  %v603_v20 = vpop.f32.mrb[11].mxu0  ;;  %v667_v21 = vpop.f32.mrb[11].mxu1 }
 0x185   : > { %v711_v22 = vpack.c.bf16 %v602_v18, %v599_v16  ;;  %v719_v23 = vpack.c.bf16 %v666_v19, %v663_v17 }
 0x187   : > { %727 = vst.msk [vmem:[%s1511_s20 + $0x10] sm:$0xff] %vm499_vm0, %v711_v22  ;;  %735 = vst.msk [vmem:[%s1511_s20 + $0x50] sm:$0xff] %vm499_vm0, %v719_v23 }
 0x188   : > { %v606_v24 = vpop.f32.mrb[12].mxu0  ;;  %v670_v25 = vpop.f32.mrb[12].mxu1 }
 0x189   : > { %v608_v26 = vpop.f32.mrb[13].mxu0  ;;  %v672_v27 = vpop.f32.mrb[13].mxu1  ;;  %v607_v30 = vadd.f32 %v1504_v45, %v606_v24  ;;  %v671_v31 = vadd.f32 %v1504_v45, %v670_v25 }
 0x18a   : > { %v609_v28 = vpop.f32.mrb[14].mxu0  ;;  %v673_v29 = vpop.f32.mrb[14].mxu1 }
 0x18b   : > { %v610_v32 = vadd.f32 %v1504_v45, %v609_v28  ;;  %v674_v33 = vadd.f32 %v1504_v45, %v673_v29  ;;  %v611_v34 = vpop.f32.mrb[15].mxu0  ;;  %v675_v35 = vpop.f32.mrb[15].mxu1 }
 0x18d   : > { %v712_v36 = vpack.c.bf16 %v610_v32, %v607_v30  ;;  %v720_v37 = vpack.c.bf16 %v674_v33, %v671_v31 }
 0x18f   : > { %728 = vst.msk [vmem:[%s1511_s20 + $0x18] sm:$0xff] %vm499_vm0, %v712_v36  ;;  %736 = vst.msk [vmem:[%s1511_s20 + $0x58] sm:$0xff] %vm499_vm0, %v720_v37 }
 0x190   : > { %v614_v38 = vpop.f32.mrb[16].mxu0  ;;  %v678_v39 = vpop.f32.mrb[16].mxu1 }
 0x191   : > { %v616_v40 = vpop.f32.mrb[17].mxu0  ;;  %v680_v41 = vpop.f32.mrb[17].mxu1  ;;  %v615_v44 = vadd.f32 %v1504_v45, %v614_v38  ;;  %v679_v46 = vadd.f32 %v1504_v45, %v678_v39 }
 0x192   : > { %v617_v42 = vpop.f32.mrb[18].mxu0  ;;  %v681_v43 = vpop.f32.mrb[18].mxu1 }
 0x193   : > { %v618_v47 = vadd.f32 %v1504_v45, %v617_v42  ;;  %v682_v48 = vadd.f32 %v1504_v45, %v681_v43  ;;  %v619_v49 = vpop.f32.mrb[19].mxu0  ;;  %v683_v50 = vpop.f32.mrb[19].mxu1 }
 0x195   : > { %v713_v51 = vpack.c.bf16 %v618_v47, %v615_v44  ;;  %v721_v52 = vpack.c.bf16 %v682_v48, %v679_v46 }
 0x197   : > { %729 = vst.msk [vmem:[%s1511_s20 + $0x20] sm:$0xff] %vm499_vm0, %v713_v51  ;;  %737 = vst.msk [vmem:[%s1511_s20 + $0x60] sm:$0xff] %vm499_vm0, %v721_v52 }
 0x198   : > { %v622_v53 = vpop.f32.mrb[20].mxu0  ;;  %v686_v54 = vpop.f32.mrb[20].mxu1 }
 0x199   : > { %v624_v55 = vpop.f32.mrb[21].mxu0  ;;  %v688_v56 = vpop.f32.mrb[21].mxu1  ;;  %v623_v59 = vadd.f32 %v1504_v45, %v622_v53  ;;  %v687_v60 = vadd.f32 %v1504_v45, %v686_v54 }
 0x19a   : > { %v625_v57 = vpop.f32.mrb[22].mxu0  ;;  %v689_v58 = vpop.f32.mrb[22].mxu1 }
 0x19b   : > { %v626_v61 = vadd.f32 %v1504_v45, %v625_v57  ;;  %v690_v62 = vadd.f32 %v1504_v45, %v689_v58  ;;  %v627_v63 = vpop.f32.mrb[23].mxu0  ;;  %v691_v0 = vpop.f32.mrb[23].mxu1 }
 0x19d   : > { %v714_v1 = vpack.c.bf16 %v626_v61, %v623_v59  ;;  %v722_v2 = vpack.c.bf16 %v690_v62, %v687_v60 }
 0x19f   : > { %730 = vst.msk [vmem:[%s1511_s20 + $0x28] sm:$0xff] %vm499_vm0, %v714_v1  ;;  %738 = vst.msk [vmem:[%s1511_s20 + $0x68] sm:$0xff] %vm499_vm0, %v722_v2 }
 0x1a0   : > { %v630_v3 = vpop.f32.mrb[24].mxu0  ;;  %v694_v4 = vpop.f32.mrb[24].mxu1 }
 0x1a1   : > { %v632_v5 = vpop.f32.mrb[25].mxu0  ;;  %v696_v6 = vpop.f32.mrb[25].mxu1  ;;  %v631_v9 = vadd.f32 %v1504_v45, %v630_v3  ;;  %v695_v10 = vadd.f32 %v1504_v45, %v694_v4 }
 0x1a2   : > { %v633_v7 = vpop.f32.mrb[26].mxu0  ;;  %v697_v8 = vpop.f32.mrb[26].mxu1 }
 0x1a3   : > { %v634_v11 = vadd.f32 %v1504_v45, %v633_v7  ;;  %v698_v12 = vadd.f32 %v1504_v45, %v697_v8  ;;  %v635_v13 = vpop.f32.mrb[27].mxu0  ;;  %v699_v14 = vpop.f32.mrb[27].mxu1 }
 0x1a5   : > { %v715_v15 = vpack.c.bf16 %v634_v11, %v631_v9  ;;  %v723_v16 = vpack.c.bf16 %v698_v12, %v695_v10 }
 0x1a7   : > { %731 = vst.msk [vmem:[%s1511_s20 + $0x30] sm:$0xff] %vm499_vm0, %v715_v15  ;;  %739 = vst.msk [vmem:[%s1511_s20 + $0x70] sm:$0xff] %vm499_vm0, %v723_v16 }
 0x1a8   : > { %v638_v17 = vpop.f32.mrb[28].mxu0  ;;  %v702_v18 = vpop.f32.mrb[28].mxu1 }
 0x1a9   : > { %v640_v19 = vpop.f32.mrb[29].mxu0  ;;  %v704_v20 = vpop.f32.mrb[29].mxu1  ;;  %v639_v23 = vadd.f32 %v1504_v45, %v638_v17  ;;  %v703_v24 = vadd.f32 %v1504_v45, %v702_v18 }
 0x1aa   : > { %v641_v21 = vpop.f32.mrb[30].mxu0  ;;  %v705_v22 = vpop.f32.mrb[30].mxu1 }
 0x1ab   : > { %v642_v25 = vadd.f32 %v1504_v45, %v641_v21  ;;  %v706_v26 = vadd.f32 %v1504_v45, %v705_v22  ;;  %v643_v27 = vpop.f32.mrb[31].mxu0  ;;  %v707_v28 = vpop.f32.mrb[31].mxu1 }
 0x1ad   : > { %v716_v29 = vpack.c.bf16 %v642_v25, %v639_v23  ;;  %v724_v30 = vpack.c.bf16 %v706_v26, %v703_v24 }
 0x1af   : > { %732 = vst.msk [vmem:[%s1511_s20 + $0x38] sm:$0xff] %vm499_vm0, %v716_v29  ;;  %740 = vst.msk [vmem:[%s1511_s20 + $0x78] sm:$0xff] %vm499_vm0, %v724_v30 }
 0x1b0   : > { %1187 = shalt.err (!%p1184_p7)
}
 0x1b1   : > { %s1188_s11 = scalar_lea.hbm %s1574_s23, 2048  ;;  %s1192_s29 = scalar_lea.hbm %s1626_s3, 131072 }
 0x1b2   : > { %p1189_p9 = scmp.ne.s32.totalorder %s1574_s23, %s1188_s11  ;;  %p1193_p5 = scmp.lt.u32.totalorder %s1574_s23, %s1626_s3 }
 0x1b3   : > { %p1194_p10 = scmp.lt.u32.totalorder %s1192_s29, %s1188_s11  ;;  %p1196_p1 = scmp.lt.u32.totalorder %s1188_s11, %s1574_s23 }
 0x1b4   : > { %p1190_p12 = pnand %p1189_p9, %p1390_p4 }
 0x1b5   : > { %p1195_p11 = por %p1194_p10, %p1193_p5 }
 0x1b6   : > { %p1191_p0 = pneg %p1190_p12 }
 0x1b7   : > { %p1197_p2 = por %p1196_p1, %p1195_p11 }
 0x1b9   : > { %p1198_p6 = pnand %p1197_p2, %p1191_p0 }
 0x1bb   : > { %1201 = shalt.err (!%p1198_p6)
}
 0x1bc   : > { %s1255_s18 = smov 128   ;;  %s1256_s20 = smov 8  }
 0x1bd   : > { %964 = dma.vmem_to_hbm [thread:$0]  (%p1390_p4), %s1576_s26, 2048, %s1574_s23, %s742_s16, %s1255_s18, %s1255_s18, %s1256_s20  }
 0x1be PF: > { %p986_p8 = scmp.ge.s32.totalorder %s1244_s15, 2  ;;  %s770_s21 = sand.u32 1, %s1232_s12  }
 0x1bf   : > { %p1641_p13 = scmp.ne.s32.totalorder %s1631_s19, 0  ;;  %s771_s27 = scalar_lea.sflag [#allocation4], %s770_s21 }
 0x1c1   : > { %p978_p3 = pnand %p986_p8, %p1641_p13 }
 0x1c3   : > { %1227 = dma.done.wait (!%p978_p3), %s771_s27, 2048  }
 0x1c4   : > { %1229 = vsyncadd (!%p978_p3), %s771_s27, 4294965248  ;;  %p17_p7 = scmp.ge.s32.totalorder %s1380_s5, 66   ;;  %s1642_s12 = smov %s1236_s13 }
 0x1c5   : > { %s1643_s13 = smov %s1240_s14  ;;  %s1644_s14 = smov %s1396_s8 }
 0x1c6   : > { %s1645_s15 = smov %s1380_s5  ;;  %19 = sbr.rel (!%p17_p7) target bundleno = 6 (0x6), region = 85 }
 0x1cd   :  { %776 = vsyncpa [#allocation3], 1 }
 0x1ce   :  { %778 = vsyncpa [#allocation3 + $0x1], 1 }
 0x1cf   :  { %779 = vsyncpa [#allocation6], 1 }
 0x1d0   :  { %780 = vsyncpa [#allocation4], 1 }
 0x1d1   :  { %782 = vsyncpa [#allocation4 + $0x1], 1 }

</bundles_post_ra>
